<compile_context>
chip_gen: v5e
topology: v5e:2x2
jax: 0.10.0
libtpu: 0.0.40
codegen_flags: <defaults>
</compile_context>

<pallas_src>
import functools
import math

import jax
import jax.numpy as jnp
from jax.experimental import pallas as pl
from jax.experimental.pallas import tpu as pltpu


def _round_up(x, m):
    return (x + m - 1) // m * m


# ----------------------------------------------------------------------------
# Pallas kernel: per layer l, per row tile i:  out_{l+1}[i] = sum_k A[i,k] @ X_l[k]
# ----------------------------------------------------------------------------
def lightgcn_kernel(a_ref, x0k_ref, x0i_ref, out_ref,
                    state_scr, xsum_scr, acc_scr, *, tm, tk, n_pad):
    l = pl.program_id(0)                      # layer            (outermost)
    i = pl.program_id(1)                      # output row tile
    k = pl.program_id(2)                      # reduction tile   (innermost)
    nl = pl.num_programs(0)
    nk = pl.num_programs(2)

    @pl.when(k == 0)
    def _init():
        acc_scr[...] = jnp.zeros_like(acc_scr)

    # Layer 0 multiplies against x0 (streamed bf16 k-tile); later layers read
    # the previous layer's propagation from the bf16 ping-pong state scratch.
    # Real scalar conditionals (pl.when) -- no dead loads from a jnp.where.
    @pl.when(l == 0)
    def _mm_layer0():
        acc_scr[...] += jnp.dot(a_ref[...], x0k_ref[...],
                                preferred_element_type=jnp.float32)

    @pl.when(l > 0)
    def _mm_later():
        read_start = pl.multiple_of((l % 2) * n_pad + k * tk, tk)
        acc_scr[...] += jnp.dot(a_ref[...],
                                state_scr[pl.ds(read_start, tk), :],
                                preferred_element_type=jnp.float32)

    @pl.when(k == nk - 1)
    def _finalize():
        out_rows = acc_scr[...]                          # out_{l+1} rows, f32
        rows = pl.multiple_of(i * tm, tm)

        # Stash the new propagation (bf16) for the next layer in the other
        # ping-pong slot; f32 -> bf16 cast happens once per (l, i), not per k.
        write_start = pl.multiple_of(((l + 1) % 2) * n_pad + i * tm, tm)
        state_scr[pl.ds(write_start, tm), :] = out_rows.astype(jnp.bfloat16)

        # Running sum x = x0 + sum_k out_k (f32).
        @pl.when(l == 0)
        def _():
            xsum_scr[pl.ds(rows, tm), :] = x0i_ref[...] + out_rows

        @pl.when(l > 0)
        def _():
            xsum_scr[pl.ds(rows, tm), :] = (
                xsum_scr[pl.ds(rows, tm), :] + out_rows)

        # Only the last layer's running sum is needed in HBM.
        @pl.when(l == nl - 1)
        def _():
            out_ref[...] = xsum_scr[pl.ds(rows, tm), :]


def lightgcn_propagate(a_norm, x0, num_layers, *, tm=512, tk=512):
    """Runs the whole multi-layer propagation in one tiled Pallas call."""
    n, d = x0.shape
    if num_layers == 0:
        return x0

    # Clamp tiles to the (128-padded) problem size; keep (8, 128) alignment.
    n128 = _round_up(n, 128)
    tm = min(tm, n128)
    tk = min(tk, n128)
    tile_lcm = tm * tk // math.gcd(tm, tk)
    n_pad = _round_up(n, tile_lcm)
    d_pad = _round_up(d, 128)                 # lane-dense stores / MXU N-dim

    a_p = jnp.pad(a_norm, ((0, n_pad - n), (0, n_pad - n))).astype(jnp.bfloat16)
    x0_f32 = jnp.pad(x0.astype(jnp.float32), ((0, n_pad - n), (0, d_pad - d)))
    x0_bf16 = x0_f32.astype(jnp.bfloat16)

    grid = (num_layers, n_pad // tm, n_pad // tk)
    kernel = functools.partial(lightgcn_kernel, tm=tm, tk=tk, n_pad=n_pad)

    # VMEM budget (double-buffered inputs/outputs + resident scratch).
    vmem_bytes = (
        2 * tm * tk * 2            # A tiles (bf16)
        + 2 * tk * d_pad * 2       # x0 matmul-operand tiles (bf16)
        + 2 * tm * d_pad * 4       # x0 sum-base tiles (f32)
        + 2 * tm * d_pad * 4       # output tiles (f32)
        + 2 * n_pad * d_pad * 2    # bf16 ping-pong propagation state
        + n_pad * d_pad * 4        # f32 running sum
        + tm * d_pad * 4)          # f32 row-tile accumulator
    try:
        vmem_cap = int(pltpu.get_tpu_info().vmem_capacity_bytes)
    except Exception:
        vmem_cap = 64 * 1024 * 1024
    # Leave headroom for Mosaic internal scratch (matters on v7x: 64 MiB total).
    vmem_ceiling = max(32 * 1024 * 1024, vmem_cap - 16 * 1024 * 1024)
    vmem_limit = int(min(vmem_ceiling, max(32 * 1024 * 1024, 2 * vmem_bytes)))

    cost = pl.CostEstimate(
        flops=2 * num_layers * n_pad * n_pad * d_pad,
        bytes_accessed=(num_layers * n_pad * n_pad * 2           # A stream/layer
                        + (n_pad // tm) * n_pad * d_pad * 2      # x0 (layer 0)
                        + n_pad * d_pad * 4                      # x0 sum base
                        + num_layers * n_pad * d_pad * 4),       # out writebacks
        transcendentals=0)

    out = pl.pallas_call(
        kernel,
        out_shape=jax.ShapeDtypeStruct((n_pad, d_pad), jnp.float32),
        grid_spec=pltpu.PrefetchScalarGridSpec(
            num_scalar_prefetch=0,
            grid=grid,
            in_specs=[
                # A tiles, streamed every step.
                pl.BlockSpec((tm, tk), lambda l, i, k: (i, k)),
                # x0 as the layer-0 matmul operand (bf16); block index held
                # constant for l > 0 so it is not re-fetched after layer 0.
                pl.BlockSpec((tk, d_pad),
                             lambda l, i, k: (jnp.where(l == 0, k, 0), 0)),
                # x0 as the layer-0 sum base (f32), keyed on the row tile.
                pl.BlockSpec((tm, d_pad),
                             lambda l, i, k: (jnp.where(l == 0, i, 0), 0)),
            ],
            out_specs=pl.BlockSpec((tm, d_pad), lambda l, i, k: (i, 0)),
            scratch_shapes=[
                pltpu.VMEM((2 * n_pad, d_pad), jnp.bfloat16),  # ping-pong out_k
                pltpu.VMEM((n_pad, d_pad), jnp.float32),       # x0 + sum out_k
                pltpu.VMEM((tm, d_pad), jnp.float32),          # row-tile acc
            ],
        ),
        # NOTE: the row-tile axis is deliberately NOT marked "parallel": all
        # row tiles share the VMEM state/xsum scratch across layers, so v7x
        # megacore sharding would split that state between cores and break
        # correctness. Keep the grid sequential ("arbitrary").
        compiler_params=pltpu.CompilerParams(
            dimension_semantics=("arbitrary", "arbitrary", "arbitrary"),
            vmem_limit_bytes=vmem_limit,
        ),
        cost_estimate=cost,
    )(a_p, x0_bf16, x0_f32)
    return out[:n, :d]


# ----------------------------------------------------------------------------
# Glue: parameter init, gcn_norm, dense adjacency construction
# ----------------------------------------------------------------------------
def xavier_uniform(key, shape):
    fan_in, fan_out = shape[0], shape[1]
    bound = (6.0 / (fan_in + fan_out)) ** 0.5
    return jax.random.uniform(key, shape, jnp.float32, -bound, bound)


def build_normalized_adjacency(edge_index, num_nodes):
    """gcn_norm with add_self_loops=False (LGConv default), edge_weight = 1."""
    row = edge_index[0]  # source j
    col = edge_index[1]  # target i
    ones = jnp.ones(row.shape[0], jnp.float32)
    deg = jnp.zeros((num_nodes,), jnp.float32).at[col].add(ones)
    deg_inv_sqrt = jnp.where(deg > 0, 1.0 / jnp.sqrt(deg), 0.0)
    norm = deg_inv_sqrt[row] * deg_inv_sqrt[col]
    # out[i] = sum_{(j->i)} norm * x[j]  =>  A[i, j] += norm
    a = jnp.zeros((num_nodes, num_nodes), jnp.float32).at[col, row].add(norm)
    return a


class LightGCNPallas:
    def __init__(self, num_users, num_items, embedding_dim=64, num_layers=3,
                 key=None):
        if key is None:
            key = jax.random.PRNGKey(0)
        ku, ki = jax.random.split(key)
        self.num_users = num_users
        self.num_items = num_items
        self.num_layers = num_layers
        self.user_embedding = xavier_uniform(ku, (num_users, embedding_dim))
        self.item_embedding = xavier_uniform(ki, (num_items, embedding_dim))

    def __call__(self, edge_index):
        x0 = jnp.concatenate([self.user_embedding, self.item_embedding], axis=0)
        n = x0.shape[0]
        a_norm = build_normalized_adjacency(edge_index, n)
        x = lightgcn_propagate(a_norm, x0, self.num_layers)
        return x[: self.num_users], x[self.num_users:]


# ----------------------------------------------------------------------------
# Pure-JAX f32 reference for a correctness check
# ----------------------------------------------------------------------------
def reference_forward(model, edge_index):
    x0 = jnp.concatenate([model.user_embedding, model.item_embedding], axis=0)
    a = build_normalized_adjacency(edge_index, x0.shape[0])
    out = x0
    x = x0
    for _ in range(model.num_layers):
        out = a @ out
        x = x + out
    return x[: model.num_users], x[model.num_users:]


if __name__ == "__main__":
    # N = 560 nodes -> n_pad = 1024 with 512x512 tiles -> grid (3, 2, 2):
    # exercises multiple layers, row tiles, and reduction tiles.
    num_users, num_items, emb_dim, num_layers = 300, 260, 64, 3

    key = jax.random.PRNGKey(0)
    k_model, k_u, k_i = jax.random.split(key, 3)

    # Deterministic synthetic bipartite interaction graph (undirected edges).
    n_interactions = 2000
    u = jax.random.randint(k_u, (n_interactions,), 0, num_users)
    v = jax.random.randint(k_i, (n_interactions,), 0, num_items) + num_users
    edge_index = jnp.stack(
        [jnp.concatenate([u, v]), jnp.concatenate([v, u])], axis=0
    ).astype(jnp.int32)                        # shape (2, 4000)

    model = LightGCNPallas(num_users, num_items, emb_dim, num_layers, key=k_model)

    user_out, item_out = model(edge_index)
    user_out = jax.block_until_ready(user_out)
    item_out = jax.block_until_ready(item_out)

    ref_u, ref_i = reference_forward(model, edge_index)
    assert user_out.shape == (num_users, emb_dim)
    assert item_out.shape == (num_items, emb_dim)

    # bf16 A / bf16 X operands with f32 accumulation vs f32 reference:
    # loose (but meaningful) absolute tolerance.
    err_u = float(jnp.max(jnp.abs(user_out - ref_u)))
    err_i = float(jnp.max(jnp.abs(item_out - ref_i)))
    assert err_u < 2e-2 and err_i < 2e-2, (err_u, err_i)

    print("KERNEL_OK")
</pallas_src>

<mosaic_0001>
module attributes {stable_mosaic.version = 11 : i64} {
  func.func @lightgcn_kernel(%arg0: i32, %arg1: i32, %arg2: i32, %arg3: memref<512x512xbf16, #tpu.memory_space<vmem>>, %arg4: memref<512x128xbf16, #tpu.memory_space<vmem>>, %arg5: memref<512x128xf32, #tpu.memory_space<vmem>>, %arg6: memref<512x128xf32, #tpu.memory_space<vmem>>, %arg7: memref<2048x128xbf16, #tpu.memory_space<vmem>>, %arg8: memref<1024x128xf32, #tpu.memory_space<vmem>>, %arg9: memref<512x128xf32, #tpu.memory_space<vmem>>) attributes {dimension_semantics = [#tpu.dimension_semantics<arbitrary>, #tpu.dimension_semantics<arbitrary>, #tpu.dimension_semantics<arbitrary>], iteration_bounds = array<i64: 3, 2, 2>, scalar_prefetch = 0 : i64, scratch_operands = 3 : i64, tpu.core_type = #tpu.core_type<tc>, window_params = [{transform_indices = @transform_0, window_bounds = array<i64: 512, 512>}, {transform_indices = @transform_1, window_bounds = array<i64: 512, 128>}, {transform_indices = @transform_2, window_bounds = array<i64: 512, 128>}, {transform_indices = @transform_3, window_bounds = array<i64: 512, 128>}]} {
    %c0_i32 = arith.constant 0 : i32
    %0 = arith.cmpi eq, %arg2, %c0_i32 : i32
    %1 = arith.extui %0 : i1 to i32
    %c0_i32_0 = arith.constant 0 : i32
    %2 = arith.cmpi ne, %1, %c0_i32_0 : i32
    scf.if %2 {
      %cst = arith.constant 0.000000e+00 : f32
      %12 = vector.broadcast %cst : f32 to vector<512x128xf32>
      %c0 = arith.constant 0 : index
      %c0_6 = arith.constant 0 : index
      %13 = vector.load %arg9[%c0, %c0_6] : memref<512x128xf32, #tpu.memory_space<vmem>>, vector<512x128xf32>
      tpu.vector_store %arg9[%c0, %c0_6], %12 {strides = array<i32>} : memref<512x128xf32, #tpu.memory_space<vmem>>, vector<512x128xf32>,
    } else {
    }
    %c0_i32_1 = arith.constant 0 : i32
    %3 = arith.cmpi eq, %arg0, %c0_i32_1 : i32
    %4 = arith.extui %3 : i1 to i32
    %c0_i32_2 = arith.constant 0 : i32
    %5 = arith.cmpi ne, %4, %c0_i32_2 : i32
    scf.if %5 {
      %c0 = arith.constant 0 : index
      %c0_6 = arith.constant 0 : index
      %12 = vector.load %arg9[%c0, %c0_6] : memref<512x128xf32, #tpu.memory_space<vmem>>, vector<512x128xf32>
      %c0_7 = arith.constant 0 : index
      %c0_8 = arith.constant 0 : index
      %13 = vector.load %arg3[%c0_7, %c0_8] : memref<512x512xbf16, #tpu.memory_space<vmem>>, vector<512x512xbf16>
      %c0_9 = arith.constant 0 : index
      %c0_10 = arith.constant 0 : index
      %14 = vector.load %arg4[%c0_9, %c0_10] : memref<512x128xbf16, #tpu.memory_space<vmem>>, vector<512x128xbf16>
      %cst = arith.constant dense<0.000000e+00> : vector<512x128xf32>
      %15 = tpu.matmul %13, %14, %cst {dimension_numbers = #tpu.dot_dimension_numbers<[1], [0], [0], [1], [0, 0, 1, 1], [], []>} : vector<512x512xbf16>, vector<512x128xbf16>, vector<512x128xf32> -> vector<512x128xf32>
      %16 = arith.addf %12, %15 : vector<512x128xf32>
      %c0_11 = arith.constant 0 : index
      %c0_12 = arith.constant 0 : index
      %17 = vector.load %arg9[%c0_11, %c0_12] : memref<512x128xf32, #tpu.memory_space<vmem>>, vector<512x128xf32>
      tpu.vector_store %arg9[%c0_11, %c0_12], %16 {strides = array<i32>} : memref<512x128xf32, #tpu.memory_space<vmem>>, vector<512x128xf32>,
    } else {
    }
    %c0_i32_3 = arith.constant 0 : i32
    %6 = arith.cmpi sgt, %arg0, %c0_i32_3 : i32
    %7 = arith.extui %6 : i1 to i32
    %c0_i32_4 = arith.constant 0 : i32
    %8 = arith.cmpi ne, %7, %c0_i32_4 : i32
    scf.if %8 {
      %c2_i32 = arith.constant 2 : i32
      %c0_i32_6 = arith.constant 0 : i32
      %12 = arith.cmpi eq, %c2_i32, %c0_i32_6 : i32
      %c1_i32_7 = arith.constant 1 : i32
      %13 = arith.select %12, %c1_i32_7, %c2_i32 : i32
      %14 = arith.remsi %arg0, %13 : i32
      %c0_i32_8 = arith.constant 0 : i32
      %15 = arith.cmpi ne, %14, %c0_i32_8 : i32
      %c0_i32_9 = arith.constant 0 : i32
      %16 = arith.cmpi slt, %14, %c0_i32_9 : i32
      %c0_i32_10 = arith.constant 0 : i32
      %17 = arith.cmpi slt, %13, %c0_i32_10 : i32
      %18 = arith.xori %16, %17 : i1
      %19 = arith.andi %18, %15 : i1
      %20 = arith.addi %14, %13 : i32
      %21 = arith.select %19, %20, %14 : i32
      %c1024_i32 = arith.constant 1024 : i32
      %22 = arith.muli %21, %c1024_i32 : i32
      %c512_i32 = arith.constant 512 : i32
      %23 = arith.muli %arg2, %c512_i32 : i32
      %24 = arith.addi %22, %23 : i32
      %25 = tpu.assume_multiple %24, 512 : i32
      %c0 = arith.constant 0 : index
      %c0_11 = arith.constant 0 : index
      %26 = vector.load %arg9[%c0, %c0_11] : memref<512x128xf32, #tpu.memory_space<vmem>>, vector<512x128xf32>
      %c0_12 = arith.constant 0 : index
      %c0_13 = arith.constant 0 : index
      %27 = vector.load %arg3[%c0_12, %c0_13] : memref<512x512xbf16, #tpu.memory_space<vmem>>, vector<512x512xbf16>
      %28 = arith.index_cast %25 : i32 to index
      %c0_14 = arith.constant 0 : index
      %29 = vector.load %arg7[%28, %c0_14] : memref<2048x128xbf16, #tpu.memory_space<vmem>>, vector<512x128xbf16>
      %cst = arith.constant dense<0.000000e+00> : vector<512x128xf32>
      %30 = tpu.matmul %27, %29, %cst {dimension_numbers = #tpu.dot_dimension_numbers<[1], [0], [0], [1], [0, 0, 1, 1], [], []>} : vector<512x512xbf16>, vector<512x128xbf16>, vector<512x128xf32> -> vector<512x128xf32>
      %31 = arith.addf %26, %30 : vector<512x128xf32>
      %c0_15 = arith.constant 0 : index
      %c0_16 = arith.constant 0 : index
      %32 = vector.load %arg9[%c0_15, %c0_16] : memref<512x128xf32, #tpu.memory_space<vmem>>, vector<512x128xf32>
      tpu.vector_store %arg9[%c0_15, %c0_16], %31 {strides = array<i32>} : memref<512x128xf32, #tpu.memory_space<vmem>>, vector<512x128xf32>,
    } else {
    }
    %c1_i32 = arith.constant 1 : i32
    %9 = arith.cmpi eq, %arg2, %c1_i32 : i32
    %10 = arith.extui %9 : i1 to i32
    %c0_i32_5 = arith.constant 0 : i32
    %11 = arith.cmpi ne, %10, %c0_i32_5 : i32
    scf.if %11 {
      %c0 = arith.constant 0 : index
      %c0_6 = arith.constant 0 : index
      %12 = vector.load %arg9[%c0, %c0_6] : memref<512x128xf32, #tpu.memory_space<vmem>>, vector<512x128xf32>
      %c512_i32 = arith.constant 512 : i32
      %13 = arith.muli %arg1, %c512_i32 : i32
      %14 = tpu.assume_multiple %13, 512 : i32
      %c1_i32_7 = arith.constant 1 : i32
      %15 = arith.addi %arg0, %c1_i32_7 : i32
      %c2_i32 = arith.constant 2 : i32
      %c0_i32_8 = arith.constant 0 : i32
      %16 = arith.cmpi eq, %c2_i32, %c0_i32_8 : i32
      %c1_i32_9 = arith.constant 1 : i32
      %17 = arith.select %16, %c1_i32_9, %c2_i32 : i32
      %18 = arith.remsi %15, %17 : i32
      %c0_i32_10 = arith.constant 0 : i32
      %19 = arith.cmpi ne, %18, %c0_i32_10 : i32
      %c0_i32_11 = arith.constant 0 : i32
      %20 = arith.cmpi slt, %18, %c0_i32_11 : i32
      %c0_i32_12 = arith.constant 0 : i32
      %21 = arith.cmpi slt, %17, %c0_i32_12 : i32
      %22 = arith.xori %20, %21 : i1
      %23 = arith.andi %22, %19 : i1
      %24 = arith.addi %18, %17 : i32
      %25 = arith.select %23, %24, %18 : i32
      %c1024_i32 = arith.constant 1024 : i32
      %26 = arith.muli %25, %c1024_i32 : i32
      %c512_i32_13 = arith.constant 512 : i32
      %27 = arith.muli %arg1, %c512_i32_13 : i32
      %28 = arith.addi %26, %27 : i32
      %29 = tpu.assume_multiple %28, 512 : i32
      %30 = arith.truncf %12 : vector<512x128xf32> to vector<512x128xbf16>
      %31 = arith.index_cast %29 : i32 to index
      %c0_14 = arith.constant 0 : index
      %32 = vector.load %arg7[%31, %c0_14] : memref<2048x128xbf16, #tpu.memory_space<vmem>>, vector<512x128xbf16>
      tpu.vector_store %arg7[%31, %c0_14], %30 {strides = array<i32>} : memref<2048x128xbf16, #tpu.memory_space<vmem>>, vector<512x128xbf16>,
      %c0_i32_15 = arith.constant 0 : i32
      %33 = arith.cmpi eq, %arg0, %c0_i32_15 : i32
      %34 = arith.extui %33 : i1 to i32
      %c0_i32_16 = arith.constant 0 : i32
      %35 = arith.cmpi ne, %34, %c0_i32_16 : i32
      scf.if %35 {
        %c0_21 = arith.constant 0 : index
        %c0_22 = arith.constant 0 : index
        %42 = vector.load %arg5[%c0_21, %c0_22] : memref<512x128xf32, #tpu.memory_space<vmem>>, vector<512x128xf32>
        %43 = arith.addf %42, %12 : vector<512x128xf32>
        %44 = arith.index_cast %14 : i32 to index
        %c0_23 = arith.constant 0 : index
        %45 = vector.load %arg8[%44, %c0_23] : memref<1024x128xf32, #tpu.memory_space<vmem>>, vector<512x128xf32>
        tpu.vector_store %arg8[%44, %c0_23], %43 {strides = array<i32>} : memref<1024x128xf32, #tpu.memory_space<vmem>>, vector<512x128xf32>,
      } else {
      }
      %c0_i32_17 = arith.constant 0 : i32
      %36 = arith.cmpi sgt, %arg0, %c0_i32_17 : i32
      %37 = arith.extui %36 : i1 to i32
      %c0_i32_18 = arith.constant 0 : i32
      %38 = arith.cmpi ne, %37, %c0_i32_18 : i32
      scf.if %38 {
        %42 = arith.index_cast %14 : i32 to index
        %c0_21 = arith.constant 0 : index
        %43 = vector.load %arg8[%42, %c0_21] : memref<1024x128xf32, #tpu.memory_space<vmem>>, vector<512x128xf32>
        %44 = arith.addf %43, %12 : vector<512x128xf32>
        %45 = arith.index_cast %14 : i32 to index
        %c0_22 = arith.constant 0 : index
        %46 = vector.load %arg8[%45, %c0_22] : memref<1024x128xf32, #tpu.memory_space<vmem>>, vector<512x128xf32>
        tpu.vector_store %arg8[%45, %c0_22], %44 {strides = array<i32>} : memref<1024x128xf32, #tpu.memory_space<vmem>>, vector<512x128xf32>,
      } else {
      }
      %c2_i32_19 = arith.constant 2 : i32
      %39 = arith.cmpi eq, %arg0, %c2_i32_19 : i32
      %40 = arith.extui %39 : i1 to i32
      %c0_i32_20 = arith.constant 0 : i32
      %41 = arith.cmpi ne, %40, %c0_i32_20 : i32
      scf.if %41 {
        %42 = arith.index_cast %14 : i32 to index
        %c0_21 = arith.constant 0 : index
        %43 = vector.load %arg8[%42, %c0_21] : memref<1024x128xf32, #tpu.memory_space<vmem>>, vector<512x128xf32>
        %c0_22 = arith.constant 0 : index
        %c0_23 = arith.constant 0 : index
        %44 = vector.load %arg6[%c0_22, %c0_23] : memref<512x128xf32, #tpu.memory_space<vmem>>, vector<512x128xf32>
        tpu.vector_store %arg6[%c0_22, %c0_23], %43 {strides = array<i32>} : memref<512x128xf32, #tpu.memory_space<vmem>>, vector<512x128xf32>,
      } else {
      }
    } else {
    }
    return
  }
  func.func @transform_0(%arg0: i32, %arg1: i32, %arg2: i32) -> (i32, i32) {
    %c0_i32 = arith.constant 0 : i32
    return %arg1, %arg2 : i32, i32
  }
  func.func @transform_1(%arg0: i32, %arg1: i32, %arg2: i32) -> (i32, i32) {
    %c0_i32 = arith.constant 0 : i32
    %0 = arith.cmpi eq, %arg0, %c0_i32 : i32
    %c0_i32_0 = arith.constant 0 : i32
    %1 = arith.select %0, %arg2, %c0_i32_0 : i32
    %c0_i32_1 = arith.constant 0 : i32
    %c0_i32_2 = arith.constant 0 : i32
    return %1, %c0_i32_1 : i32, i32
  }
  func.func @transform_2(%arg0: i32, %arg1: i32, %arg2: i32) -> (i32, i32) {
    %c0_i32 = arith.constant 0 : i32
    %0 = arith.cmpi eq, %arg0, %c0_i32 : i32
    %c0_i32_0 = arith.constant 0 : i32
    %1 = arith.select %0, %arg1, %c0_i32_0 : i32
    %c0_i32_1 = arith.constant 0 : i32
    %c0_i32_2 = arith.constant 0 : i32
    return %1, %c0_i32_1 : i32, i32
  }
  func.func @transform_3(%arg0: i32, %arg1: i32, %arg2: i32) -> (i32, i32) {
    %c0_i32 = arith.constant 0 : i32
    %c0_i32_0 = arith.constant 0 : i32
    return %arg1, %c0_i32 : i32, i32
  }
}

</mosaic_0001>

<bundles_post_ra>
// kernel: tpu_custom_call.1
= control target key start
LH: loop header
LB: loop body
LE: loop exit
PB: predicated region body
PF: predicated region fallthrough
CT: control target
= control target key end

     0   :  { %s9208_s0 = inlined_call_operand.hbm [shape: bf16[1024,1024], index: 0, kind: input, shape index: {}]   ;;  %s9209_s1 = inlined_call_operand.hbm [shape: bf16[1024,128], index: 1, kind: input, shape index: {}]   ;;  %s9210_s2 = inlined_call_operand.hbm [shape: f32[1024,128], index: 2, kind: input, shape index: {}]   ;;  %s9211_s3 = inlined_call_operand.hbm [shape: f32[1024,128], index: 3, kind: output, shape index: {}]  }
   0x1   :  { %9247 = sst [smem:[#allocation47_spill]] %s9208_s0 }
   0x2   :  { %9248 = sst [smem:[#allocation48_spill]] %s9209_s1 }
   0x3   :  { %9249 = sst [smem:[#allocation49_spill]] %s9210_s2 }
   0x4   :  { %9250 = sst [smem:[#allocation50_spill]] %s9211_s3 }
   0x5   :  { %8 = vsyncpa [#allocation6], 0 }
   0x6   :  { %10 = vsyncpa [#allocation6 + $0x1], 0 }
   0x7   :  { %11 = vsyncpa [#allocation9], 0 }
   0x8   :  { %13 = vsyncpa [#allocation9 + $0x1], 0 }
   0x9   :  { %14 = vsyncpa [#allocation7], 0 }
   0xa   :  { %16 = vsyncpa [#allocation7 + $0x1], 0  ;;  %s7440_s12 = smov 0   ;;  %s7442_s13 = smov 0  }
   0xb   :  { %s7444_s14 = smov 0   ;;  %s7446_s15 = smov 0  }
   0xc   :  { %s7448_s16 = smov 0   ;;  %s7450_s17 = smov 0  }
   0xd   :  { %s7452_s18 = smov 0   ;;  %s7454_s19 = smov 0  }
   0xe   :  { %s7456_s20 = smov 0   ;;  %s7458_s21 = smov 0  }
   0xf   :  { %s7460_s22 = smov 0   ;;  %s7462_s23 = smov 0  }
  0x10   :  { %s7464_s24 = smov 0   ;;  %s7466_s25 = smov 0  }
  0x11   :  { %s7468_s26 = smov 0   ;;  %s7470_s27 = smov 0  }
  0x12   :  { %s7472_s28 = smov 0   ;;  %s7474_s29 = smov 0  }
  0x13   :  { %s7476_s30 = smov 0  }
  0x14 LB: > { %9251 = sst [smem:[#allocation16_spill]] %s7336_s12  ;;  %s7536_s4 = sadd.s32 4294967295, %s7408_s30   ;;  %s7408_s30 = sphi %s7476_s30, %s22_s30   ;;  %s7404_s29 = sphi %s7474_s29, %s9364_s29   ;;  %s7400_s28 = sphi %s7472_s28, %s9363_s28   ;;  %s7396_s27 = sphi %s7470_s27, %s9350_s27   ;;  %s7392_s26 = sphi %s7468_s26, %s9362_s26   ;;  %s7388_s25 = sphi %s7466_s25, %s9361_s25   ;;  %s7384_s24 = sphi %s7464_s24, %s9349_s24   ;;  %s7380_s23 = sphi %s7462_s23, %s9348_s23   ;;  %s7376_s22 = sphi %s7460_s22, %s9360_s22   ;;  %s7372_s21 = sphi %s7458_s21, %s9359_s21   ;;  %s7368_s20 = sphi %s7456_s20, %s9346_s20   ;;  %s7364_s19 = sphi %s7454_s19, %s9358_s19   ;;  %s7360_s18 = sphi %s7452_s18, %s9357_s18   ;;  %s7356_s17 = sphi %s7450_s17, %s9356_s17   ;;  %s7352_s16 = sphi %s7448_s16, %s9355_s16   ;;  %s7348_s15 = sphi %s7446_s15, %s9353_s15   ;;  %s7344_s14 = sphi %s7444_s14, %s9344_s14   ;;  %s7340_s13 = sphi %s7442_s13, %s9352_s13   ;;  %s7336_s12 = sphi %s7440_s12, %s9351_s12  }
  0x15   : > { %9252 = sst [smem:[#allocation17_spill]] %s7344_s14  ;;  %s34_s6 = sadd.s32 1, %s7396_s27 }
  0x16   : > { %9253 = sst [smem:[#allocation18_spill]] %s7368_s20  ;;  %s37_s7 = sadd.s32 1, %s7400_s28 }
  0x17   : > { %9254 = sst [smem:[#allocation19_spill]] %s7380_s23  ;;  %p35_p0 = scmp.ge.s32.totalorder %s34_s6, 2 }
  0x18   : > { %9255 = sst [smem:[#allocation20_spill]] %s7384_s24  ;;  %s41_s8 = sadd.s32 1, %s7404_s29 }
  0x19   : > { %9256 = sst [smem:[#allocation21_spill]] %s7388_s25  ;;  %p58_p1 = scmp.eq.s32.totalorder %s7408_s30, 0 }
  0x1a   : > { %9257 = sst [smem:[#allocation22_spill]] %s7392_s26  ;;  %p64_p2 = scmp.eq.s32.totalorder %s7536_s4, 0 }
  0x1b   : > { %9258 = sst [smem:[#allocation23_spill]] %s7396_s27  ;;  %s9366_s6 = smov (%p35_p0, %s34_s6), 0 }
  0x1c   : > { %9259 = sst [smem:[#allocation24_spill]] %s9366_s6  ;;  %s9368_s7 = smov (!%p35_p0, %s37_s7), %s7400_s28 }
  0x1d   : > { %s46_s9 = ssub.s32 %s7396_s27, %s9366_s6  ;;  %p9219_p3 = scmp.eq.s32.totalorder %s7404_s29, 0 }
  0x1e   : > { %p39_p4 = scmp.ge.s32.totalorder %s9368_s7, 2  ;;  %s80_s10 = sadd.s32 1, %s7368_s20 }
  0x1f   : > { %s7554_s11 = scalar_select %p9219_p3, %s7396_s27, 0 }
  0x20   : > { %s9370_s7 = smov (%p39_p4, %s9368_s7), 0  ;;  %s9372_s8 = smov (!%p39_p4, %s41_s8), %s7404_s29 }
  0x21   : > { %s45_s5 = ssub.s32 %s7400_s28, %s9370_s7  ;;  %p87_p5 = scmp.ne.s32.totalorder %s7368_s20, %s7364_s19 }
  0x22   : > { %p43_p6 = scmp.ge.s32.totalorder %s9372_s8, 3  ;;  %s7563_s3 = sor.u32 %s46_s9, %s45_s5 }
  0x23   : > { %p48_p7 = scmp.eq.s32.totalorder %s7563_s3, 0  ;;  %p7568_p8 = por %p87_p5, %p58_p1 }
  0x24   : > { %s9374_s8 = smov (%p43_p6, %s9372_s8), 0  ;;  %p93_p9 = scmp.ne.s32.totalorder %s7364_s19, %s7360_s18 }
  0x25   : > { %p134_p10 = scmp.eq.s32.totalorder %s45_s5, 0  ;;  %p9225_p11 = scmp.eq.s32.totalorder %s9374_s8, 0 }
  0x26   : > { %s136_s9 = sadd.s32 1, %s7344_s14  ;;  %p7580_p12 = por %p93_p9, %p64_p2 }
  0x27   : > { %p146_p13 = scmp.ne.s32.totalorder %s7344_s14, %s7340_s13  ;;  %p147_p0 = scmp.eq.s32.totalorder %s7536_s4, 11 }
  0x28   : > { %s9261_s26 = scalar_select %p7580_p12, 1, 0 }
  0x29   : > { %s76_s24 = scalar_select %p9225_p11, %s9366_s6, 0 }
  0x2a   : > { %9262 = sst [smem:[#allocation25_spill]] %s9261_s26  ;;  %p152_p5 = scmp.ne.s32.totalorder %s7340_s13, %s7336_s12 }
  0x2b   : > { %s7590_s2 = scalar_select %p134_p10, %s7344_s14, %s136_s9  }
  0x2c   : > { %s77_s0 = ssub.s32 %s7554_s11, %s76_s24  ;;  %p7596_p6 = por %p147_p0, %p146_p13 }
  0x2d   : > { %9263 = sst [smem:[#allocation26_spill]] %s7590_s2  ;;  %p78_p4 = scmp.eq.s32.totalorder %s77_s0, 0 }
  0x2e   : > { %s9264_s18 = scalar_select %p7596_p6, 1, 0 }
  0x2f   : > { %s9266_s5 = sadd.s32 4294967294, %s7408_s30   ;;  %p9226_p10 = scmp.lt.s32.totalorder %s7408_s30, 12 }
  0x30   : > { %9265 = sst [smem:[#allocation27_spill]] %s9264_s18  ;;  %p153_p9 = scmp.eq.s32.totalorder %s9266_s5, 11 }
  0x31   : > { %s7603_s26 = scalar_select %p78_p4, %s7368_s20, %s80_s10  }
  0x32   : > { %p7605_p3 = por %p153_p9, %p152_p5  ;;  %s198_s24 = sand.u32 1, %s7408_s30  }
  0x33   : > { %9267 = sst [smem:[#allocation28_spill]] %s7603_s26  ;;  %s200_s0 = sand.u32 1, %s7368_s20  }
  0x34   : > { %s9268_s6 = scalar_select %p7605_p3, 1, 0 }
  0x35   : > { %s5108_s9 = sshll.u32 %s200_s0, 8  ;;  %s6424_s2 = sshll.u32 %s7554_s11, 8 }
  0x36   : > { %s9269_s1 = sld [smem:[#allocation48_spill]]  ;;  %s202_s5 = scalar_lea.vmem [#allocation8], %s5108_s9 }
  0x37   : > { %s212_s26 = sshll.u32 %s202_s5, 4  ;;  %p6950_p13 = pnand %p9226_p10, %p7568_p8  ;;  %s213_s26 = int_to_ptr.vmem [resolvable:$true] %s212_s26 }
  0x38   : > { %p5114_p0 = scmp.ge.s32.totalorder %s7408_s30, 1  ;;  %p244_p4 = scmp.lt.s32.totalorder %s7408_s30, 13 }
  0x39   : > { %s7410_s12 = smov 64   ;;  %s7411_s14 = smov 4  }
  0x3a   : > { %p7625_p5 = pnand %p5114_p0, %p244_p4  ;;  %p57_p9 = scmp.ne.s32.totalorder %s7380_s23, %s7376_s22 }
  0x3b   : > { %p63_p8 = scmp.ne.s32.totalorder %s7376_s22, %s7372_s21  ;;  %s173_s0 = sand.u32 1, %s7380_s23  }
  0x3c   : > { %s209_s18 = scalar_lea.hbm %s9269_s1, %s6424_s2  ;;  %s7622_s2 = scalar_lea.sflag [#allocation9], %s198_s24 }
  0x3d   : > { %s210_s10 = sshll.u32 %s209_s18, 4  ;;  %s50_s18 = sadd.s32 1, %s7380_s23  ;;  %s211_s10 = int_to_ptr.hbm [resolvable:$true] %s210_s10 }
  0x3e   : > { %6952 = dma.hbm_to_vmem [thread:$0]  (!%p6950_p13), %s211_s10, 4096, %s213_s26, %s7622_s2, %s7410_s12, %s7410_s12, %s7411_s14  }
  0x3f   : > { %s7633_s25 = scalar_select %p48_p7, %s7380_s23, %s50_s18  }
  0x40   : > { %s5105_s9 = sshll.u32 %s7396_s27, 2  ;;  %p59_p11 = por %p58_p1, %p57_p9 }
  0x41   : > { %9271 = sst [smem:[#allocation29_spill]] %s7633_s25  ;;  %p7645_p10 = por %p64_p2, %p63_p8 }
  0x42   : > { %s5103_s26 = sshll.u32 %s173_s0, 10  ;;  %s6423_s10 = sshll.u32 %s7400_s28, 9 }
  0x43   : > { %s183_s3 = sadd.s32 %s6423_s10, %s5105_s9  ;;  %s177_s5 = scalar_lea.vmem [#allocation5], %s5103_s26 }
  0x44   : > { %s188_s21 = sshll.u32 %s177_s5, 4  ;;  %s5107_s12 = sshll.u32 %s183_s3, 2  ;;  %s189_s21 = int_to_ptr.vmem [resolvable:$true] %s188_s21 }
  0x45   : > { %s9273_s1 = sld [smem:[#allocation47_spill]]  ;;  %p9274_p7 = scmp.lt.s32.totalorder %s7408_s30, 12 }
  0x46   : > { %s174_s9 = scalar_lea.sflag [#allocation6], %s173_s0  ;;  %s7412_s26 = smov 512  }
  0x47   : > { %p6947_p13 = pnand %p9274_p7, %p59_p11  ;;  %s7413_s10 = smov 256  }
  0x48   : > { %s7414_s5 = smov 16   ;;  %p9275_p0 = scmp.eq.s32.totalorder %s7404_s29, 0 }
  0x49   : > { %p9276_p4 = scmp.eq.s32.totalorder %s9374_s8, 0  ;;  %s110_s20 = sadd.s32 1, %s7356_s17 }
  0x4a   : > { %s104_s3 = scalar_select %p9275_p0, %s7400_s28, 0 }
  0x4b   : > { %s185_s27 = scalar_lea.hbm %s9273_s1, %s5107_s12  ;;  %p117_p9 = scmp.ne.s32.totalorder %s7356_s17, %s7352_s16 }
  0x4c   : > { %s186_s25 = sshll.u32 %s185_s27, 4  ;;  %p123_p8 = scmp.ne.s32.totalorder %s7352_s16, %s7348_s15  ;;  %s187_s25 = int_to_ptr.hbm [resolvable:$true] %s186_s25 }
  0x4d   : > { %6949 = dma.hbm_to_vmem [thread:$0]  (!%p6947_p13), %s187_s25, 16384, %s189_s21, %s174_s9, %s7412_s26, %s7413_s10, %s7414_s5  }
  0x4e   : > { %s106_s23 = scalar_select %p9276_p4, %s9370_s7, 0 }
  0x4f   : > { %p119_p7 = por %p117_p9, %p58_p1  ;;  %p7670_p3 = por %p123_p8, %p64_p2 }
  0x50   : > { %s107_s1 = ssub.s32 %s104_s3, %s106_s23  ;;  %s224_s0 = sand.u32 1, %s7356_s17  }
  0x51   : > { %p108_p11 = scmp.eq.s32.totalorder %s107_s1, 0  ;;  %s5111_s21 = sshll.u32 %s224_s0, 9 }
  0x52   : > { %s6425_s12 = sshll.u32 %s104_s3, 9  ;;  %s9278_s9 = sld [smem:[#allocation49_spill]] }
  0x53   : > { %s7676_s25 = scalar_select %p108_p11, %s7356_s17, %s110_s20  }
  0x54   : > { %s226_s15 = scalar_lea.vmem [#allocation10], %s5111_s21  ;;  %p9279_p1 = scmp.lt.s32.totalorder %s7408_s30, 12 }
  0x55   : > { %s236_s10 = sshll.u32 %s226_s15, 4  ;;  %s7415_s5 = smov 128   ;;  %s237_s10 = int_to_ptr.vmem [resolvable:$true] %s236_s10 }
  0x56   : > { %p6953_p13 = pnand %p9279_p1, %p119_p7  ;;  %s7416_s1 = smov 8  }
  0x57   : > { %248 = sbr.rel (%p7625_p5) target bundleno = 1892 (0x764), region = 32  ;;  %s250_s20 = sand.u32 (!%p7625_p5), 1, %s7376_s22  }
  0x58   : > { %s233_s26 = scalar_lea.hbm %s9278_s9, %s6425_s12  ;;  %s5115_s3 = sshll.u32 (!%p7625_p5), %s250_s20, 10 }
  0x59   : > { %s234_s23 = sshll.u32 %s233_s26, 4  ;;  %s251_s0 = scalar_lea.sflag (!%p7625_p5), [#allocation6], %s250_s20  ;;  %s235_s23 = int_to_ptr.hbm [resolvable:$true] %s234_s23 }
  0x5a   : > { %6955 = dma.hbm_to_vmem [thread:$0]  (!%p6953_p13), %s235_s23, 8192, %s237_s10, %s7622_s2, %s7415_s5, %s7415_s5, %s7416_s1  }
  0x5b   : > { %s7687_s14 = scalar_lea.vmem (!%p7625_p5), [#allocation5], %s5115_s3 }
  0x5c   : > { %7319 = dma.done.wait (%p7645_p10), %s251_s0, 16384  }
  0x5d   : > { %7321 = vsyncadd (%p7645_p10), %s251_s0, 4294950912  ;;  %s260_s12 = sand.u32 1, %s7536_s4   ;;  %s262_s2 = sand.u32 1, %s7364_s19  }
  0x5e   : > { %s5116_s18 = sshll.u32 %s262_s2, 8  ;;  %s261_s11 = scalar_lea.sflag [#allocation9], %s260_s12 }
  0x5f   : > { %s7695_s9 = scalar_lea.vmem [#allocation8], %s5116_s18 }
  0x60   : > { %7323 = dma.done.wait (%p7580_p12), %s261_s11, 4096  }
  0x61   : > { %7325 = vsyncadd (%p7580_p12), %s261_s11, 4294963200  ;;  %s272_s26 = sand.u32 1, %s7352_s16  }
  0x62   : > { %s5117_s23 = sshll.u32 %s272_s26, 9 }
  0x63   : > { %s7702_s24 = scalar_lea.vmem [#allocation10], %s5117_s23 }
  0x64   : > { %7327 = dma.done.wait (%p7670_p3), %s261_s11, 8192  }
  0x65   : > { %7329 = vsyncadd (%p7670_p3), %s261_s11, 4294959104  ;;  %s305_s4 = sand.u32 1, %s7340_s13   ;;  %s9281_s5 = sld [smem:[#allocation20_spill]] }
  0x66   : > { %s5118_s15 = sshll.u32 %s305_s4, 9 }
  0x67   : > { %s7711_s10 = scalar_lea.vmem [#allocation11], %s5118_s15 }
  0x6b   : > { %p5119_p2 = scmp.ne.s32.totalorder %s9281_s5, 0 }
  0x6d   : > { %320 = sbr.rel (%p5119_p2) target bundleno = 179 (0xb3), region = 48 }
  0x72   : > { %v7417_v0 = vmov 0.0  }
  0x73   : > { %321 = vst [vmem:[#allocation4 + $0xb0] sm:$0xff] %v7417_v0 }
  0x74   : > { %322 = vst [vmem:[#allocation4 + $0x1b0] sm:$0xff] %v7417_v0 }
  0x75   : > { %323 = vst [vmem:[#allocation4 + $0xd8] sm:$0xff] %v7417_v0 }
  0x76   : > { %324 = vst [vmem:[#allocation4 + $0x18] sm:$0xff] %v7417_v0 }
  0x77   : > { %325 = vst [vmem:[#allocation4 + $0x50] sm:$0xff] %v7417_v0 }
  0x78   : > { %326 = vst [vmem:[#allocation4 + $0x168] sm:$0xff] %v7417_v0 }
  0x79   : > { %327 = vst [vmem:[#allocation4 + $0x130] sm:$0xff] %v7417_v0 }
  0x7a   : > { %328 = vst [vmem:[#allocation4 + $0x48] sm:$0xff] %v7417_v0 }
  0x7b   : > { %329 = vst [vmem:[#allocation4 + $0x180] sm:$0xff] %v7417_v0 }
  0x7c   : > { %330 = vst [vmem:[#allocation4 + $0x110] sm:$0xff] %v7417_v0 }
  0x7d   : > { %331 = vst [vmem:[#allocation4 + $0x118] sm:$0xff] %v7417_v0 }
  0x7e   : > { %332 = vst [vmem:[#allocation4 + $0x98] sm:$0xff] %v7417_v0 }
  0x7f   : > { %333 = vst [vmem:[#allocation4 + $0x120] sm:$0xff] %v7417_v0 }
  0x80   : > { %334 = vst [vmem:[#allocation4 + $0x150] sm:$0xff] %v7417_v0 }
  0x81   : > { %335 = vst [vmem:[#allocation4 + $0x108] sm:$0xff] %v7417_v0 }
  0x82   : > { %336 = vst [vmem:[#allocation4 + $0x60] sm:$0xff] %v7417_v0 }
  0x83   : > { %337 = vst [vmem:[#allocation4 + $0xe0] sm:$0xff] %v7417_v0 }
  0x84   : > { %338 = vst [vmem:[#allocation4 + $0x188] sm:$0xff] %v7417_v0 }
  0x85   : > { %339 = vst [vmem:[#allocation4 + $0x138] sm:$0xff] %v7417_v0 }
  0x86   : > { %340 = vst [vmem:[#allocation4 + $0x140] sm:$0xff] %v7417_v0 }
  0x87   : > { %341 = vst [vmem:[#allocation4 + $0x80] sm:$0xff] %v7417_v0 }
  0x88   : > { %342 = vst [vmem:[#allocation4 + $0x1a8] sm:$0xff] %v7417_v0 }
  0x89   : > { %343 = vst [vmem:[#allocation4 + $0x1b8] sm:$0xff] %v7417_v0 }
  0x8a   : > { %344 = vst [vmem:[#allocation4 + $0x28] sm:$0xff] %v7417_v0 }
  0x8b   : > { %345 = vst [vmem:[#allocation4 + $0x1e8] sm:$0xff] %v7417_v0 }
  0x8c   : > { %346 = vst [vmem:[#allocation4 + $0xf8] sm:$0xff] %v7417_v0 }
  0x8d   : > { %347 = vst [vmem:[#allocation4 + $0x160] sm:$0xff] %v7417_v0 }
  0x8e   : > { %348 = vst [vmem:[#allocation4 + $0x30] sm:$0xff] %v7417_v0 }
  0x8f   : > { %349 = vst [vmem:[#allocation4 + $0x1e0] sm:$0xff] %v7417_v0 }
  0x90   : > { %350 = vst [vmem:[#allocation4] sm:$0xff] %v7417_v0 }
  0x91   : > { %351 = vst [vmem:[#allocation4 + $0xf0] sm:$0xff] %v7417_v0 }
  0x92   : > { %352 = vst [vmem:[#allocation4 + $0x8] sm:$0xff] %v7417_v0 }
  0x93   : > { %353 = vst [vmem:[#allocation4 + $0x148] sm:$0xff] %v7417_v0 }
  0x94   : > { %354 = vst [vmem:[#allocation4 + $0x1d0] sm:$0xff] %v7417_v0 }
  0x95   : > { %355 = vst [vmem:[#allocation4 + $0x100] sm:$0xff] %v7417_v0 }
  0x96   : > { %356 = vst [vmem:[#allocation4 + $0xc8] sm:$0xff] %v7417_v0 }
  0x97   : > { %357 = vst [vmem:[#allocation4 + $0x40] sm:$0xff] %v7417_v0 }
  0x98   : > { %358 = vst [vmem:[#allocation4 + $0x1f8] sm:$0xff] %v7417_v0 }
  0x99   : > { %359 = vst [vmem:[#allocation4 + $0x20] sm:$0xff] %v7417_v0 }
  0x9a   : > { %360 = vst [vmem:[#allocation4 + $0x128] sm:$0xff] %v7417_v0 }
  0x9b   : > { %361 = vst [vmem:[#allocation4 + $0x1a0] sm:$0xff] %v7417_v0 }
  0x9c   : > { %362 = vst [vmem:[#allocation4 + $0x1f0] sm:$0xff] %v7417_v0 }
  0x9d   : > { %363 = vst [vmem:[#allocation4 + $0xe8] sm:$0xff] %v7417_v0 }
  0x9e   : > { %364 = vst [vmem:[#allocation4 + $0x78] sm:$0xff] %v7417_v0 }
  0x9f   : > { %365 = vst [vmem:[#allocation4 + $0x70] sm:$0xff] %v7417_v0 }
  0xa0   : > { %366 = vst [vmem:[#allocation4 + $0x90] sm:$0xff] %v7417_v0 }
  0xa1   : > { %367 = vst [vmem:[#allocation4 + $0x1d8] sm:$0xff] %v7417_v0 }
  0xa2   : > { %368 = vst [vmem:[#allocation4 + $0xd0] sm:$0xff] %v7417_v0 }
  0xa3   : > { %369 = vst [vmem:[#allocation4 + $0xb8] sm:$0xff] %v7417_v0 }
  0xa4   : > { %370 = vst [vmem:[#allocation4 + $0x88] sm:$0xff] %v7417_v0 }
  0xa5   : > { %371 = vst [vmem:[#allocation4 + $0xa8] sm:$0xff] %v7417_v0 }
  0xa6   : > { %372 = vst [vmem:[#allocation4 + $0x1c8] sm:$0xff] %v7417_v0 }
  0xa7   : > { %373 = vst [vmem:[#allocation4 + $0x170] sm:$0xff] %v7417_v0 }
  0xa8   : > { %374 = vst [vmem:[#allocation4 + $0x178] sm:$0xff] %v7417_v0 }
  0xa9   : > { %375 = vst [vmem:[#allocation4 + $0x68] sm:$0xff] %v7417_v0 }
  0xaa   : > { %376 = vst [vmem:[#allocation4 + $0x190] sm:$0xff] %v7417_v0 }
  0xab   : > { %377 = vst [vmem:[#allocation4 + $0x198] sm:$0xff] %v7417_v0 }
  0xac   : > { %378 = vst [vmem:[#allocation4 + $0x38] sm:$0xff] %v7417_v0 }
  0xad   : > { %379 = vst [vmem:[#allocation4 + $0xc0] sm:$0xff] %v7417_v0 }
  0xae   : > { %380 = vst [vmem:[#allocation4 + $0x1c0] sm:$0xff] %v7417_v0 }
  0xaf   : > { %381 = vst [vmem:[#allocation4 + $0x158] sm:$0xff] %v7417_v0 }
  0xb0   : > { %382 = vst [vmem:[#allocation4 + $0x10] sm:$0xff] %v7417_v0 }
  0xb1   : > { %383 = vst [vmem:[#allocation4 + $0x58] sm:$0xff] %v7417_v0 }
  0xb2   : > { %384 = vst [vmem:[#allocation4 + $0xa0] sm:$0xff] %v7417_v0 }
  0xb3 PF: > { %s9282_s27 = sld [smem:[#allocation22_spill]] }
  0xb9   : > { %p5120_p3 = scmp.ne.s32.totalorder %s9282_s27, 0 }
  0xbb   : > { %388 = sbr.rel (%p5120_p3) target bundleno = 869 (0x365), region = 52 }
  0xc0   : > { %v6561_v1 = vld [vmem:[%s7695_s9 + $0x38] sm:$0xff]  ;;  %v6560_v5 = vld [vmem:[%s7695_s9 + $0x30] sm:$0xff]  ;;  %v6559_v9 = vld [vmem:[%s7695_s9 + $0x28] sm:$0xff] }
  0xc1   : > { %v6569_v2 = vld [vmem:[%s7695_s9 + $0x78] sm:$0xff]  ;;  %1477 = vmatpush.bf16.msra.mxu0 %v6561_v1  ;;  %v6568_v6 = vld [vmem:[%s7695_s9 + $0x70] sm:$0xff]  ;;  %v6567_v10 = vld [vmem:[%s7695_s9 + $0x68] sm:$0xff] }
  0xc2   : > { %v6577_v3 = vld [vmem:[%s7695_s9 + $0xb8] sm:$0xff]  ;;  %1646 = vmatpush.bf16.msra.mxu1 %v6569_v2  ;;  %v6576_v7 = vld [vmem:[%s7695_s9 + $0xb0] sm:$0xff]  ;;  %v6575_v11 = vld [vmem:[%s7695_s9 + $0xa8] sm:$0xff] }
  0xc3   : > { %v6585_v4 = vld [vmem:[%s7695_s9 + $0xf8] sm:$0xff]  ;;  %1815 = vmatpush.bf16.msra.mxu2 %v6577_v3  ;;  %v6584_v8 = vld [vmem:[%s7695_s9 + $0xf0] sm:$0xff]  ;;  %v6583_v12 = vld [vmem:[%s7695_s9 + $0xe8] sm:$0xff] }
  0xc4   : > { %1984 = vmatpush.bf16.msra.mxu3 %v6585_v4  ;;  %v6558_v13 = vld [vmem:[%s7695_s9 + $0x20] sm:$0xff]  ;;  %v6557_v17 = vld [vmem:[%s7695_s9 + $0x18] sm:$0xff]  ;;  %v6556_v21 = vld [vmem:[%s7695_s9 + $0x10] sm:$0xff] }
  0xc5   : > { %1478 = vmatpush.bf16.msra.mxu0 %v6560_v5  ;;  %v6566_v14 = vld [vmem:[%s7695_s9 + $0x60] sm:$0xff]  ;;  %v6565_v18 = vld [vmem:[%s7695_s9 + $0x58] sm:$0xff]  ;;  %v6564_v22 = vld [vmem:[%s7695_s9 + $0x50] sm:$0xff] }
  0xc6   : > { %1647 = vmatpush.bf16.msra.mxu1 %v6568_v6  ;;  %v6574_v15 = vld [vmem:[%s7695_s9 + $0xa0] sm:$0xff]  ;;  %v6573_v19 = vld [vmem:[%s7695_s9 + $0x98] sm:$0xff]  ;;  %v6572_v23 = vld [vmem:[%s7695_s9 + $0x90] sm:$0xff] }
  0xc7   : > { %1816 = vmatpush.bf16.msra.mxu2 %v6576_v7  ;;  %v6582_v16 = vld [vmem:[%s7695_s9 + $0xe0] sm:$0xff]  ;;  %v6581_v20 = vld [vmem:[%s7695_s9 + $0xd8] sm:$0xff]  ;;  %v6580_v24 = vld [vmem:[%s7695_s9 + $0xd0] sm:$0xff] }
  0xc8   : > { %1985 = vmatpush.bf16.msra.mxu3 %v6584_v8  ;;  %v6555_v25 = vld [vmem:[%s7695_s9 + $0x8] sm:$0xff]  ;;  %v6554_v29 = vld [vmem:[%s7695_s9] sm:$0xff]  ;;  %v6428_v34 = vld [vmem:[%s7687_s14 + $0xc] sm:$0xf0] }
  0xc9   : > { %1479 = vmatpush.bf16.msra.mxu0 %v6559_v9  ;;  %v6563_v26 = vld [vmem:[%s7695_s9 + $0x48] sm:$0xff]  ;;  %v6562_v30 = vld [vmem:[%s7695_s9 + $0x40] sm:$0xff]  ;;  %v5125_v36 = vld [vmem:[%s7687_s14 + $0x10] sm:$0xf0] }
  0xca   : > { %1648 = vmatpush.bf16.msra.mxu1 %v6567_v10  ;;  %v6571_v27 = vld [vmem:[%s7695_s9 + $0x88] sm:$0xff]  ;;  %v6570_v31 = vld [vmem:[%s7695_s9 + $0x80] sm:$0xff]  ;;  %v6429_v38 = vld [vmem:[%s7687_s14 + $0x14] sm:$0xf0] }
  0xcb   : > { %1817 = vmatpush.bf16.msra.mxu2 %v6575_v11  ;;  %v6579_v28 = vld [vmem:[%s7695_s9 + $0xc8] sm:$0xff]  ;;  %v6578_v32 = vld [vmem:[%s7695_s9 + $0xc0] sm:$0xff]  ;;  %v5133_v40 = vld [vmem:[%s7687_s14 + $0x18] sm:$0xf0] }
  0xcc   : > { %1986 = vmatpush.bf16.msra.mxu3 %v6583_v12  ;;  %v5123_v33 = vld [vmem:[%s7687_s14] sm:$0xf]  ;;  %v6426_v35 = vld [vmem:[%s7687_s14 + $0x4] sm:$0xf]  ;;  %v5131_v37 = vld [vmem:[%s7687_s14 + $0x8] sm:$0xf] }
  0xcd   : > { %1480 = vmatpush.bf16.msra.mxu0 %v6558_v13  ;;  %v6427_v39 = vld [vmem:[%s7687_s14 + $0xc] sm:$0xf]  ;;  %v5124_v41 = vor.u32 %v6428_v34, %v5123_v33  ;;  %v5128_v42 = vor.u32 %v6426_v35, %v5125_v36  ;;  %v5132_v43 = vor.u32 %v6429_v38, %v5131_v37  ;;  %v5139_v45 = vld [vmem:[%s7687_s14 + $0x20] sm:$0xf]  ;;  %v6432_v46 = vld [vmem:[%s7687_s14 + $0x2c] sm:$0xf0] }
  0xce   : > { %1649 = vmatpush.bf16.msra.mxu1 %v6566_v14  ;;  %v5136_v44 = vor.u32 %v6427_v39, %v5133_v40  ;;  %v6430_v47 = vld [vmem:[%s7687_s14 + $0x24] sm:$0xf]  ;;  %v5141_v48 = vld [vmem:[%s7687_s14 + $0x30] sm:$0xf0]  ;;  %v5147_v49 = vld [vmem:[%s7687_s14 + $0x28] sm:$0xf]  ;;  %v5140_v53 = vor.u32 %v6432_v46, %v5139_v45 }
  0xcf   : > { %1818 = vmatpush.bf16.msra.mxu2 %v6574_v15  ;;  %v6433_v50 = vld [vmem:[%s7687_s14 + $0x34] sm:$0xf0]  ;;  %v6431_v51 = vld [vmem:[%s7687_s14 + $0x2c] sm:$0xf]  ;;  %v5149_v52 = vld [vmem:[%s7687_s14 + $0x38] sm:$0xf0]  ;;  %v5144_v54 = vor.u32 %v6430_v47, %v5141_v48 }
  0xd0   : > { %1987 = vmatpush.bf16.msra.mxu3 %v6582_v16  ;;  %v5148_v55 = vor.u32 %v6433_v50, %v5147_v49  ;;  %v5152_v56 = vor.u32 %v6431_v51, %v5149_v52  ;;  %v5155_v57 = vld [vmem:[%s7687_s14 + $0x40] sm:$0xf]  ;;  %v6436_v58 = vld [vmem:[%s7687_s14 + $0x4c] sm:$0xf0]  ;;  %v6434_v59 = vld [vmem:[%s7687_s14 + $0x44] sm:$0xf] }
  0xd1   : > { %1481 = vmatpush.bf16.msra.mxu0 %v6557_v17  ;;  %v5157_v60 = vld [vmem:[%s7687_s14 + $0x50] sm:$0xf0]  ;;  %v5163_v61 = vld [vmem:[%s7687_s14 + $0x48] sm:$0xf]  ;;  %v6437_v62 = vld [vmem:[%s7687_s14 + $0x54] sm:$0xf0]  ;;  %v5156_v1 = vor.u32 %v6436_v58, %v5155_v57 }
  0xd2   : > { %1650 = vmatpush.bf16.msra.mxu1 %v6565_v18  ;;  %v6435_v63 = vld [vmem:[%s7687_s14 + $0x4c] sm:$0xf]  ;;  %v5165_v0 = vld [vmem:[%s7687_s14 + $0x58] sm:$0xf0]  ;;  %v5160_v2 = vor.u32 %v6434_v59, %v5157_v60  ;;  %v5164_v3 = vor.u32 %v6437_v62, %v5163_v61  ;;  %v5171_v5 = vld [vmem:[%s7687_s14 + $0x60] sm:$0xf] }
  0xd3   : > { %1819 = vmatpush.bf16.msra.mxu2 %v6573_v19  ;;  %v5168_v4 = vor.u32 %v6435_v63, %v5165_v0  ;;  %v6440_v6 = vld [vmem:[%s7687_s14 + $0x6c] sm:$0xf0]  ;;  %v6438_v7 = vld [vmem:[%s7687_s14 + $0x64] sm:$0xf]  ;;  %v5173_v8 = vld [vmem:[%s7687_s14 + $0x70] sm:$0xf0] }
  0xd4   : > { %1988 = vmatpush.bf16.msra.mxu3 %v6581_v20  ;;  %v5179_v9 = vld [vmem:[%s7687_s14 + $0x68] sm:$0xf]  ;;  %v6441_v10 = vld [vmem:[%s7687_s14 + $0x74] sm:$0xf0]  ;;  %v6439_v11 = vld [vmem:[%s7687_s14 + $0x6c] sm:$0xf]  ;;  %v5172_v13 = vor.u32 %v6440_v6, %v5171_v5  ;;  %v5176_v14 = vor.u32 %v6438_v7, %v5173_v8 }
  0xd5   : > { %1482 = vmatpush.bf16.msra.mxu0 %v6556_v21  ;;  %v5181_v12 = vld [vmem:[%s7687_s14 + $0x78] sm:$0xf0]  ;;  %v5180_v15 = vor.u32 %v6441_v10, %v5179_v9  ;;  %v5187_v17 = vld [vmem:[%s7687_s14 + $0x80] sm:$0xf]  ;;  %v6444_v18 = vld [vmem:[%s7687_s14 + $0x8c] sm:$0xf0] }
  0xd6   : > { %1651 = vmatpush.bf16.msra.mxu1 %v6564_v22  ;;  %v5184_v16 = vor.u32 %v6439_v11, %v5181_v12  ;;  %v6442_v19 = vld [vmem:[%s7687_s14 + $0x84] sm:$0xf]  ;;  %v5189_v20 = vld [vmem:[%s7687_s14 + $0x90] sm:$0xf0]  ;;  %v5195_v21 = vld [vmem:[%s7687_s14 + $0x88] sm:$0xf] }
  0xd7   : > { %1820 = vmatpush.bf16.msra.mxu2 %v6572_v23  ;;  %v6445_v22 = vld [vmem:[%s7687_s14 + $0x94] sm:$0xf0]  ;;  %v6443_v23 = vld [vmem:[%s7687_s14 + $0x8c] sm:$0xf]  ;;  %v5211_v33 = vld [vmem:[%s7687_s14 + $0xa8] sm:$0xf] }
  0xd8   : > { %1989 = vmatpush.bf16.msra.mxu3 %v6580_v24  ;;  %v5197_v24 = vld [vmem:[%s7687_s14 + $0x98] sm:$0xf0]  ;;  %v6449_v34 = vld [vmem:[%s7687_s14 + $0xb4] sm:$0xf0]  ;;  %v6447_v35 = vld [vmem:[%s7687_s14 + $0xac] sm:$0xf] }
  0xd9   : > { %1483 = vmatpush.bf16.msra.mxu0 %v6555_v25  ;;  %v5188_v25 = vor.u32 %v6444_v18, %v5187_v17  ;;  %v5213_v36 = vld [vmem:[%s7687_s14 + $0xb8] sm:$0xf0]  ;;  %v5212_v39 = vor.u32 %v6449_v34, %v5211_v33  ;;  %v5227_v45 = vld [vmem:[%s7687_s14 + $0xc8] sm:$0xf]  ;;  %v6453_v46 = vld [vmem:[%s7687_s14 + $0xd4] sm:$0xf0] }
  0xda   : > { %1652 = vmatpush.bf16.msra.mxu1 %v6563_v26  ;;  %v5192_v26 = vor.u32 %v6442_v19, %v5189_v20  ;;  %v5216_v40 = vor.u32 %v6447_v35, %v5213_v36  ;;  %v6451_v47 = vld [vmem:[%s7687_s14 + $0xcc] sm:$0xf]  ;;  %v5229_v48 = vld [vmem:[%s7687_s14 + $0xd8] sm:$0xf0]  ;;  %v5228_v51 = vor.u32 %v6453_v46, %v5227_v45  ;;  %v5243_v57 = vld [vmem:[%s7687_s14 + $0xe8] sm:$0xf] }
  0xdb   : > { %1821 = vmatpush.bf16.msra.mxu2 %v6571_v27  ;;  %v5196_v27 = vor.u32 %v6445_v22, %v5195_v21  ;;  %v5232_v52 = vor.u32 %v6451_v47, %v5229_v48  ;;  %v6457_v58 = vld [vmem:[%s7687_s14 + $0xf4] sm:$0xf0]  ;;  %v6455_v59 = vld [vmem:[%s7687_s14 + $0xec] sm:$0xf]  ;;  %v5245_v60 = vld [vmem:[%s7687_s14 + $0xf8] sm:$0xf0] }
  0xdc   : > { %1990 = vmatpush.bf16.msra.mxu3 %v6579_v28  ;;  %v5200_v28 = vor.u32 %v6443_v23, %v5197_v24  ;;  %v5244_v63 = vor.u32 %v6457_v58, %v5243_v57  ;;  %v5248_v0 = vor.u32 %v6455_v59, %v5245_v60  ;;  %v5259_v5 = vld [vmem:[%s7687_s14 + $0x108] sm:$0xf]  ;;  %v6461_v6 = vld [vmem:[%s7687_s14 + $0x114] sm:$0xf0]  ;;  %v6459_v7 = vld [vmem:[%s7687_s14 + $0x10c] sm:$0xf] }
  0xdd   : > { %1484 = vmatpush.bf16.msra.mxu0 %v6554_v29  ;;  %v5203_v29 = vld [vmem:[%s7687_s14 + $0xa0] sm:$0xf]  ;;  %v5261_v8 = vld [vmem:[%s7687_s14 + $0x118] sm:$0xf0]  ;;  %v389_v21 = vld [vmem:[#allocation4 + $0xb0] sm:$0xff] }
  0xde   : > { %1653 = vmatpush.bf16.msra.mxu1 %v6562_v30  ;;  %v6448_v30 = vld [vmem:[%s7687_s14 + $0xac] sm:$0xf0]  ;;  %v5267_v23 = vld [vmem:[%s7687_s14 + $0x120] sm:$0xf]  ;;  %v5285_v57 = vld [vmem:[%s7687_s14 + $0x150] sm:$0xf0] }
  0xdf   : > { %1822 = vmatpush.bf16.msra.mxu2 %v6570_v31  ;;  %v6446_v31 = vld [vmem:[%s7687_s14 + $0xa4] sm:$0xf]  ;;  %v5204_v37 = vor.u32 %v6448_v30, %v5203_v29  ;;  %v6464_v24 = vld [vmem:[%s7687_s14 + $0x12c] sm:$0xf0]  ;;  %v6465_v29 = vld [vmem:[%s7687_s14 + $0x134] sm:$0xf0] }
  0xe0   : > { %1991 = vmatpush.bf16.msra.mxu3 %v6578_v32  ;;  %1485 = vmatmul.bf16.vlgmr.msra.gmra.mxu0 %v5124_v41  ;;  %v5205_v32 = vld [vmem:[%s7687_s14 + $0xb0] sm:$0xf0]  ;;  %v5219_v41 = vld [vmem:[%s7687_s14 + $0xc0] sm:$0xf]  ;;  %v6463_v30 = vld [vmem:[%s7687_s14 + $0x12c] sm:$0xf]  ;;  %v5268_v35 = vor.u32 %v6464_v24, %v5267_v23 }
  0xe1   : > { %1654 = vmatmul.bf16.vlgmr.msra.gmra.mxu1 %v5128_v42  ;;  %v5208_v38 = vor.u32 %v6446_v31, %v5205_v32  ;;  %v6452_v42 = vld [vmem:[%s7687_s14 + $0xcc] sm:$0xf0]  ;;  %v5277_v31 = vld [vmem:[%s7687_s14 + $0x138] sm:$0xf0]  ;;  %v5291_v58 = vld [vmem:[%s7687_s14 + $0x148] sm:$0xf] }
  0xe2   : > { %1823 = vmatmul.bf16.vlgmr.msra.gmra.mxu2 %v5132_v43  ;;  %v6450_v43 = vld [vmem:[%s7687_s14 + $0xc4] sm:$0xf]  ;;  %v5220_v49 = vor.u32 %v6452_v42, %v5219_v41  ;;  %v5280_v41 = vor.u32 %v6463_v30, %v5277_v31  ;;  %v390_v42 = vld [vmem:[#allocation4 + $0x1b0] sm:$0xff]  ;;  %v6469_v59 = vld [vmem:[%s7687_s14 + $0x154] sm:$0xf0] }
  0xe3   : > { %1992 = vmatmul.bf16.vlgmr.msra.gmra.mxu3 %v5136_v44  ;;  %v5221_v44 = vld [vmem:[%s7687_s14 + $0xd0] sm:$0xf0]  ;;  %v6467_v60 = vld [vmem:[%s7687_s14 + $0x14c] sm:$0xf]  ;;  %v5307_v24 = vld [vmem:[%s7687_s14 + $0x168] sm:$0xf] }
  0xe4   : > { %v5224_v50 = vor.u32 %v6450_v43, %v5221_v44  ;;  %v5301_v23 = vld [vmem:[%s7687_s14 + $0x170] sm:$0xf0] }
  0xf0   : > { %1490 = vmatmul.bf16.gmra.mxu0 %v5140_v53  ;;  %v5235_v53 = vld [vmem:[%s7687_s14 + $0xe0] sm:$0xf] }
  0xf1   : > { %1659 = vmatmul.bf16.gmra.mxu1 %v5144_v54  ;;  %v6456_v54 = vld [vmem:[%s7687_s14 + $0xec] sm:$0xf0] }
  0xf2   : > { %1828 = vmatmul.bf16.gmra.mxu2 %v5148_v55  ;;  %v6454_v55 = vld [vmem:[%s7687_s14 + $0xe4] sm:$0xf]  ;;  %v5236_v61 = vor.u32 %v6456_v54, %v5235_v53  ;;  %v5283_v53 = vld [vmem:[%s7687_s14 + $0x140] sm:$0xf]  ;;  %v6468_v54 = vld [vmem:[%s7687_s14 + $0x14c] sm:$0xf0] }
  0xf3   : > { %1997 = vmatmul.bf16.gmra.mxu3 %v5152_v56  ;;  %v5237_v56 = vld [vmem:[%s7687_s14 + $0xf0] sm:$0xf0] }
  0xf4   : > { %v5240_v62 = vor.u32 %v6454_v55, %v5237_v56  ;;  %v6466_v56 = vld [vmem:[%s7687_s14 + $0x144] sm:$0xf] }
 0x100   : > { %1495 = vmatmul.bf16.gmra.mxu0 %v5156_v1  ;;  %v5251_v1 = vld [vmem:[%s7687_s14 + $0x100] sm:$0xf] }
 0x101   : > { %1664 = vmatmul.bf16.gmra.mxu1 %v5160_v2  ;;  %v6460_v2 = vld [vmem:[%s7687_s14 + $0x10c] sm:$0xf0] }
 0x102   : > { %1833 = vmatmul.bf16.gmra.mxu2 %v5164_v3  ;;  %v6458_v3 = vld [vmem:[%s7687_s14 + $0x104] sm:$0xf]  ;;  %v5252_v9 = vor.u32 %v6460_v2, %v5251_v1  ;;  %v5284_v1 = vor.u32 %v6468_v54, %v5283_v53  ;;  %v5288_v2 = vor.u32 %v6466_v56, %v5285_v57  ;;  %v5317_v53 = vld [vmem:[%s7687_s14 + $0x190] sm:$0xf0]  ;;  %v5323_v54 = vld [vmem:[%s7687_s14 + $0x188] sm:$0xf] }
 0x103   : > { %2002 = vmatmul.bf16.gmra.mxu3 %v5168_v4  ;;  %v5253_v4 = vld [vmem:[%s7687_s14 + $0x110] sm:$0xf0]  ;;  %v6475_v56 = vld [vmem:[%s7687_s14 + $0x18c] sm:$0xf]  ;;  %v5325_v57 = vld [vmem:[%s7687_s14 + $0x198] sm:$0xf0] }
 0x104   : > { %v5256_v10 = vor.u32 %v6458_v3, %v5253_v4 }
 0x110   : > { %1500 = vmatmul.bf16.gmra.mxu0 %v5172_v13  ;;  %v5260_v13 = vor.u32 %v6461_v6, %v5259_v5  ;;  %v5292_v6 = vor.u32 %v6469_v59, %v5291_v58 }
 0x111   : > { %1669 = vmatmul.bf16.gmra.mxu1 %v5176_v14  ;;  %v5264_v14 = vor.u32 %v6459_v7, %v5261_v8  ;;  %v392_v8 = vld [vmem:[#allocation4 + $0x18] sm:$0xff] }
 0x112   : > { %1838 = vmatmul.bf16.gmra.mxu2 %v5180_v15 }
 0x113   : > { %2007 = vmatmul.bf16.gmra.mxu3 %v5184_v16 }
 0x120   : > { %1505 = vmatmul.bf16.gmra.mxu0 %v5188_v25 }
 0x121   : > { %1674 = vmatmul.bf16.gmra.mxu1 %v5192_v26  ;;  %v6462_v26 = vld [vmem:[%s7687_s14 + $0x124] sm:$0xf] }
 0x122   : > { %1843 = vmatmul.bf16.gmra.mxu2 %v5196_v27  ;;  %v5269_v27 = vld [vmem:[%s7687_s14 + $0x130] sm:$0xf0] }
 0x123   : > { %2012 = vmatmul.bf16.gmra.mxu3 %v5200_v28  ;;  %v5275_v28 = vld [vmem:[%s7687_s14 + $0x128] sm:$0xf]  ;;  %v5272_v36 = vor.u32 %v6462_v26, %v5269_v27  ;;  %v6471_v26 = vld [vmem:[%s7687_s14 + $0x16c] sm:$0xf]  ;;  %v5309_v27 = vld [vmem:[%s7687_s14 + $0x178] sm:$0xf0] }
 0x130   : > { %1510 = vmatmul.bf16.gmra.mxu0 %v5204_v37 }
 0x131   : > { %1679 = vmatmul.bf16.gmra.mxu1 %v5208_v38 }
 0x132   : > { %1848 = vmatmul.bf16.gmra.mxu2 %v5212_v39 }
 0x133   : > { %2017 = vmatmul.bf16.gmra.mxu3 %v5216_v40  ;;  %v5276_v40 = vor.u32 %v6465_v29, %v5275_v28 }
 0x140   : > { %1515 = vmatmul.bf16.gmra.mxu0 %v5220_v49 }
 0x141   : > { %1684 = vmatmul.bf16.gmra.mxu1 %v5224_v50 }
 0x142   : > { %1853 = vmatmul.bf16.gmra.mxu2 %v5228_v51  ;;  %v391_v51 = vld [vmem:[#allocation4 + $0xd8] sm:$0xff] }
 0x143   : > { %2022 = vmatmul.bf16.gmra.mxu3 %v5232_v52 }
 0x150   : > { %1520 = vmatmul.bf16.gmra.mxu0 %v5236_v61  ;;  %v5293_v61 = vld [vmem:[%s7687_s14 + $0x158] sm:$0xf0] }
 0x151   : > { %1689 = vmatmul.bf16.gmra.mxu1 %v5240_v62  ;;  %v5296_v7 = vor.u32 %v6467_v60, %v5293_v61 }
 0x152   : > { %1858 = vmatmul.bf16.gmra.mxu2 %v5244_v63 }
 0x153   : > { %2027 = vmatmul.bf16.gmra.mxu3 %v5248_v0 }
 0x15d   : > { %v1486_v11 = vpop.f32.mrf.mxu0 }
 0x15e   : > { %v1655_v12 = vpop.f32.mrf.mxu1 }
 0x15f   : > { %v1656_v15 = vadd.f32 %v1655_v12, %v1486_v11 }
 0x160   : > { %1525 = vmatmul.bf16.gmra.mxu0 %v5252_v9 }
 0x161   : > { %1694 = vmatmul.bf16.gmra.mxu1 %v5256_v10 }
 0x162   : > { %1863 = vmatmul.bf16.gmra.mxu2 %v5260_v13 }
 0x163   : > { %2032 = vmatmul.bf16.gmra.mxu3 %v5264_v14 }
 0x165   : > { %v1824_v16 = vpop.f32.mrf.mxu2  ;;  %v1488_v19 = vpop.f32.mrf.mxu0 }
 0x166   : > { %v1993_v17 = vpop.f32.mrf.mxu3  ;;  %v1825_v18 = vadd.f32 %v1824_v16, %v1656_v15  ;;  %v1657_v20 = vpop.f32.mrf.mxu1 }
 0x167   : > { %v1658_v32 = vadd.f32 %v1657_v20, %v1488_v19  ;;  %v5299_v19 = vld [vmem:[%s7687_s14 + $0x160] sm:$0xf]  ;;  %v6472_v20 = vld [vmem:[%s7687_s14 + $0x16c] sm:$0xf0] }
 0x168   : > { %v1994_v22 = vadd.f32 %v1993_v17, %v1825_v18  ;;  %v393_v17 = vld [vmem:[#allocation4 + $0x50] sm:$0xff]  ;;  %v5300_v31 = vor.u32 %v6472_v20, %v5299_v19  ;;  %v5339_v20 = vld [vmem:[%s7687_s14 + $0x1a8] sm:$0xf] }
 0x169   : > { %v5333_v19 = vld [vmem:[%s7687_s14 + $0x1b0] sm:$0xf0] }
 0x16a   : > { %v2153_v25 = vadd.f32 %v1994_v22, %v389_v21  ;;  %v6470_v22 = vld [vmem:[%s7687_s14 + $0x164] sm:$0xf] }
 0x16c   : > { %2217 = vst [vmem:[#allocation4 + $0xb0] sm:$0xff] %v2153_v25  ;;  %v6473_v25 = vld [vmem:[%s7687_s14 + $0x174] sm:$0xf0] }
 0x16d   : > { %v1826_v33 = vpop.f32.mrf.mxu2  ;;  %v1491_v38 = vpop.f32.mrf.mxu0 }
 0x16e   : > { %v1995_v34 = vpop.f32.mrf.mxu3  ;;  %v1827_v37 = vadd.f32 %v1826_v33, %v1658_v32  ;;  %v1660_v39 = vpop.f32.mrf.mxu1  ;;  %v5304_v32 = vor.u32 %v6470_v22, %v5301_v23  ;;  %v6479_v22 = vld [vmem:[%s7687_s14 + $0x1ac] sm:$0xf]  ;;  %v5341_v23 = vld [vmem:[%s7687_s14 + $0x1b8] sm:$0xf0] }
 0x16f   : > { %v1661_v45 = vadd.f32 %v1660_v39, %v1491_v38  ;;  %v394_v38 = vld [vmem:[#allocation4 + $0x168] sm:$0xff] }
 0x170   : > { %v1996_v43 = vadd.f32 %v1995_v34, %v1827_v37  ;;  %1530 = vmatmul.bf16.gmra.mxu0 %v5268_v35  ;;  %v5312_v37 = vor.u32 %v6471_v26, %v5309_v27 }
 0x171   : > { %1699 = vmatmul.bf16.gmra.mxu1 %v5272_v36  ;;  %v5308_v36 = vor.u32 %v6473_v25, %v5307_v24 }
 0x172   : > { %v2154_v44 = vadd.f32 %v1996_v43, %v390_v42  ;;  %1868 = vmatmul.bf16.gmra.mxu2 %v5276_v40 }
 0x173   : > { %2037 = vmatmul.bf16.gmra.mxu3 %v5280_v41 }
 0x174   : > { %2218 = vst [vmem:[#allocation4 + $0x1b0] sm:$0xff] %v2154_v44 }
 0x175   : > { %v1829_v46 = vpop.f32.mrf.mxu2  ;;  %v1493_v49 = vpop.f32.mrf.mxu0 }
 0x176   : > { %v1998_v47 = vpop.f32.mrf.mxu3  ;;  %v1830_v48 = vadd.f32 %v1829_v46, %v1661_v45  ;;  %v1662_v50 = vpop.f32.mrf.mxu1 }
 0x177   : > { %v1663_v62 = vadd.f32 %v1662_v50, %v1493_v49  ;;  %v5315_v49 = vld [vmem:[%s7687_s14 + $0x180] sm:$0xf]  ;;  %v6476_v50 = vld [vmem:[%s7687_s14 + $0x18c] sm:$0xf0] }
 0x178   : > { %v1999_v52 = vadd.f32 %v1998_v47, %v1830_v48  ;;  %v395_v47 = vld [vmem:[#allocation4 + $0x130] sm:$0xff]  ;;  %v5316_v61 = vor.u32 %v6476_v50, %v5315_v49  ;;  %v5355_v50 = vld [vmem:[%s7687_s14 + $0x1c8] sm:$0xf] }
 0x179   : > { %v5349_v49 = vld [vmem:[%s7687_s14 + $0x1d0] sm:$0xf0] }
 0x17a   : > { %v2155_v55 = vadd.f32 %v1999_v52, %v391_v51  ;;  %v6474_v52 = vld [vmem:[%s7687_s14 + $0x184] sm:$0xf] }
 0x17c   : > { %2219 = vst [vmem:[#allocation4 + $0xd8] sm:$0xff] %v2155_v55  ;;  %v6477_v55 = vld [vmem:[%s7687_s14 + $0x194] sm:$0xf0] }
 0x17d   : > { %v1831_v63 = vpop.f32.mrf.mxu2  ;;  %v1496_v4 = vpop.f32.mrf.mxu0 }
 0x17e   : > { %v2000_v0 = vpop.f32.mrf.mxu3  ;;  %v1832_v3 = vadd.f32 %v1831_v63, %v1663_v62  ;;  %v1665_v5 = vpop.f32.mrf.mxu1  ;;  %v5320_v62 = vor.u32 %v6474_v52, %v5317_v53  ;;  %v6483_v52 = vld [vmem:[%s7687_s14 + $0x1cc] sm:$0xf]  ;;  %v5357_v53 = vld [vmem:[%s7687_s14 + $0x1d8] sm:$0xf0] }
 0x17f   : > { %v1666_v11 = vadd.f32 %v1665_v5, %v1496_v4  ;;  %v396_v4 = vld [vmem:[#allocation4 + $0x48] sm:$0xff] }
 0x180   : > { %v2001_v9 = vadd.f32 %v2000_v0, %v1832_v3  ;;  %1535 = vmatmul.bf16.gmra.mxu0 %v5284_v1  ;;  %v5328_v3 = vor.u32 %v6475_v56, %v5325_v57 }
 0x181   : > { %1704 = vmatmul.bf16.gmra.mxu1 %v5288_v2  ;;  %v5324_v2 = vor.u32 %v6477_v55, %v5323_v54 }
 0x182   : > { %v2156_v10 = vadd.f32 %v2001_v9, %v392_v8  ;;  %1873 = vmatmul.bf16.gmra.mxu2 %v5292_v6 }
 0x183   : > { %2042 = vmatmul.bf16.gmra.mxu3 %v5296_v7 }
 0x184   : > { %2220 = vst [vmem:[#allocation4 + $0x18] sm:$0xff] %v2156_v10 }
 0x185   : > { %v1834_v12 = vpop.f32.mrf.mxu2  ;;  %v1498_v15 = vpop.f32.mrf.mxu0 }
 0x186   : > { %v2003_v13 = vpop.f32.mrf.mxu3  ;;  %v1835_v14 = vadd.f32 %v1834_v12, %v1666_v11  ;;  %v1667_v16 = vpop.f32.mrf.mxu1 }
 0x187   : > { %v1668_v28 = vadd.f32 %v1667_v16, %v1498_v15  ;;  %v5331_v15 = vld [vmem:[%s7687_s14 + $0x1a0] sm:$0xf]  ;;  %v6480_v16 = vld [vmem:[%s7687_s14 + $0x1ac] sm:$0xf0] }
 0x188   : > { %v2004_v18 = vadd.f32 %v2003_v13, %v1835_v14  ;;  %v397_v13 = vld [vmem:[#allocation4 + $0x180] sm:$0xff]  ;;  %v5332_v27 = vor.u32 %v6480_v16, %v5331_v15  ;;  %v5365_v15 = vld [vmem:[%s7687_s14 + $0x1f0] sm:$0xf0]  ;;  %v5371_v16 = vld [vmem:[%s7687_s14 + $0x1e8] sm:$0xf] }
 0x18a   : > { %v2157_v21 = vadd.f32 %v2004_v18, %v393_v17  ;;  %v6478_v18 = vld [vmem:[%s7687_s14 + $0x1a4] sm:$0xf] }
 0x18c   : > { %2221 = vst [vmem:[#allocation4 + $0x50] sm:$0xff] %v2157_v21  ;;  %v6481_v21 = vld [vmem:[%s7687_s14 + $0x1b4] sm:$0xf0] }
 0x18d   : > { %v1836_v29 = vpop.f32.mrf.mxu2  ;;  %v1501_v34 = vpop.f32.mrf.mxu0 }
 0x18e   : > { %v2005_v30 = vpop.f32.mrf.mxu3  ;;  %v1837_v33 = vadd.f32 %v1836_v29, %v1668_v28  ;;  %v1670_v35 = vpop.f32.mrf.mxu1  ;;  %v5336_v28 = vor.u32 %v6478_v18, %v5333_v19  ;;  %v6487_v18 = vld [vmem:[%s7687_s14 + $0x1ec] sm:$0xf]  ;;  %v5373_v19 = vld [vmem:[%s7687_s14 + $0x1f8] sm:$0xf0] }
 0x18f   : > { %v1671_v41 = vadd.f32 %v1670_v35, %v1501_v34  ;;  %v398_v34 = vld [vmem:[#allocation4 + $0x110] sm:$0xff] }
 0x190   : > { %v2006_v39 = vadd.f32 %v2005_v30, %v1837_v33  ;;  %1540 = vmatmul.bf16.gmra.mxu0 %v5300_v31  ;;  %v5344_v33 = vor.u32 %v6479_v22, %v5341_v23 }
 0x191   : > { %1709 = vmatmul.bf16.gmra.mxu1 %v5304_v32  ;;  %v5340_v32 = vor.u32 %v6481_v21, %v5339_v20 }
 0x192   : > { %v2158_v40 = vadd.f32 %v2006_v39, %v394_v38  ;;  %1878 = vmatmul.bf16.gmra.mxu2 %v5308_v36 }
 0x193   : > { %2047 = vmatmul.bf16.gmra.mxu3 %v5312_v37 }
 0x194   : > { %2222 = vst [vmem:[#allocation4 + $0x168] sm:$0xff] %v2158_v40 }
 0x195   : > { %v1839_v42 = vpop.f32.mrf.mxu2  ;;  %v1503_v45 = vpop.f32.mrf.mxu0 }
 0x196   : > { %v2008_v43 = vpop.f32.mrf.mxu3  ;;  %v1840_v44 = vadd.f32 %v1839_v42, %v1671_v41  ;;  %v1672_v46 = vpop.f32.mrf.mxu1 }
 0x197   : > { %v1673_v58 = vadd.f32 %v1672_v46, %v1503_v45  ;;  %v5347_v45 = vld [vmem:[%s7687_s14 + $0x1c0] sm:$0xf]  ;;  %v6484_v46 = vld [vmem:[%s7687_s14 + $0x1cc] sm:$0xf0] }
 0x198   : > { %v2009_v48 = vadd.f32 %v2008_v43, %v1840_v44  ;;  %v399_v43 = vld [vmem:[#allocation4 + $0x118] sm:$0xff]  ;;  %v5348_v57 = vor.u32 %v6484_v46, %v5347_v45  ;;  %v5381_v45 = vld [vmem:[%s7687_s14 + $0x210] sm:$0xf0]  ;;  %v5387_v46 = vld [vmem:[%s7687_s14 + $0x208] sm:$0xf] }
 0x19a   : > { %v2159_v51 = vadd.f32 %v2009_v48, %v395_v47  ;;  %v6482_v48 = vld [vmem:[%s7687_s14 + $0x1c4] sm:$0xf] }
 0x19c   : > { %2223 = vst [vmem:[#allocation4 + $0x130] sm:$0xff] %v2159_v51  ;;  %v6485_v51 = vld [vmem:[%s7687_s14 + $0x1d4] sm:$0xf0] }
 0x19d   : > { %v1841_v59 = vpop.f32.mrf.mxu2  ;;  %v1506_v0 = vpop.f32.mrf.mxu0 }
 0x19e   : > { %v2010_v60 = vpop.f32.mrf.mxu3  ;;  %v1842_v63 = vadd.f32 %v1841_v59, %v1673_v58  ;;  %v1675_v1 = vpop.f32.mrf.mxu1  ;;  %v5352_v58 = vor.u32 %v6482_v48, %v5349_v49  ;;  %v6491_v48 = vld [vmem:[%s7687_s14 + $0x20c] sm:$0xf]  ;;  %v5389_v49 = vld [vmem:[%s7687_s14 + $0x218] sm:$0xf0] }
 0x19f   : > { %v1676_v7 = vadd.f32 %v1675_v1, %v1506_v0  ;;  %v400_v0 = vld [vmem:[#allocation4 + $0x98] sm:$0xff] }
 0x1a0   : > { %v2011_v5 = vadd.f32 %v2010_v60, %v1842_v63  ;;  %1545 = vmatmul.bf16.gmra.mxu0 %v5316_v61  ;;  %v5360_v63 = vor.u32 %v6483_v52, %v5357_v53 }
 0x1a1   : > { %1714 = vmatmul.bf16.gmra.mxu1 %v5320_v62  ;;  %v5356_v62 = vor.u32 %v6485_v51, %v5355_v50 }
 0x1a2   : > { %v2160_v6 = vadd.f32 %v2011_v5, %v396_v4  ;;  %1883 = vmatmul.bf16.gmra.mxu2 %v5324_v2 }
 0x1a3   : > { %2052 = vmatmul.bf16.gmra.mxu3 %v5328_v3 }
 0x1a4   : > { %2224 = vst [vmem:[#allocation4 + $0x48] sm:$0xff] %v2160_v6 }
 0x1a5   : > { %v1844_v8 = vpop.f32.mrf.mxu2  ;;  %v1508_v11 = vpop.f32.mrf.mxu0 }
 0x1a6   : > { %v2013_v9 = vpop.f32.mrf.mxu3  ;;  %v1845_v10 = vadd.f32 %v1844_v8, %v1676_v7  ;;  %v1677_v12 = vpop.f32.mrf.mxu1 }
 0x1a7   : > { %v1678_v24 = vadd.f32 %v1677_v12, %v1508_v11  ;;  %v5363_v11 = vld [vmem:[%s7687_s14 + $0x1e0] sm:$0xf]  ;;  %v6488_v12 = vld [vmem:[%s7687_s14 + $0x1ec] sm:$0xf0] }
 0x1a8   : > { %v2014_v14 = vadd.f32 %v2013_v9, %v1845_v10  ;;  %v401_v9 = vld [vmem:[#allocation4 + $0x120] sm:$0xff]  ;;  %v5364_v23 = vor.u32 %v6488_v12, %v5363_v11  ;;  %v5397_v11 = vld [vmem:[%s7687_s14 + $0x230] sm:$0xf0]  ;;  %v5403_v12 = vld [vmem:[%s7687_s14 + $0x228] sm:$0xf] }
 0x1aa   : > { %v2161_v17 = vadd.f32 %v2014_v14, %v397_v13  ;;  %v6486_v14 = vld [vmem:[%s7687_s14 + $0x1e4] sm:$0xf] }
 0x1ac   : > { %2225 = vst [vmem:[#allocation4 + $0x180] sm:$0xff] %v2161_v17  ;;  %v6489_v17 = vld [vmem:[%s7687_s14 + $0x1f4] sm:$0xf0] }
 0x1ad   : > { %v1846_v25 = vpop.f32.mrf.mxu2  ;;  %v1511_v30 = vpop.f32.mrf.mxu0 }
 0x1ae   : > { %v2015_v26 = vpop.f32.mrf.mxu3  ;;  %v1847_v29 = vadd.f32 %v1846_v25, %v1678_v24  ;;  %v1680_v31 = vpop.f32.mrf.mxu1  ;;  %v5368_v24 = vor.u32 %v6486_v14, %v5365_v15  ;;  %v6495_v14 = vld [vmem:[%s7687_s14 + $0x22c] sm:$0xf]  ;;  %v5405_v15 = vld [vmem:[%s7687_s14 + $0x238] sm:$0xf0] }
 0x1af   : > { %v1681_v37 = vadd.f32 %v1680_v31, %v1511_v30  ;;  %v402_v30 = vld [vmem:[#allocation4 + $0x150] sm:$0xff] }
 0x1b0   : > { %v2016_v35 = vadd.f32 %v2015_v26, %v1847_v29  ;;  %1550 = vmatmul.bf16.gmra.mxu0 %v5332_v27  ;;  %v5376_v29 = vor.u32 %v6487_v18, %v5373_v19 }
 0x1b1   : > { %1719 = vmatmul.bf16.gmra.mxu1 %v5336_v28  ;;  %v5372_v28 = vor.u32 %v6489_v17, %v5371_v16 }
 0x1b2   : > { %v2162_v36 = vadd.f32 %v2016_v35, %v398_v34  ;;  %1888 = vmatmul.bf16.gmra.mxu2 %v5340_v32 }
 0x1b3   : > { %2057 = vmatmul.bf16.gmra.mxu3 %v5344_v33 }
 0x1b4   : > { %2226 = vst [vmem:[#allocation4 + $0x110] sm:$0xff] %v2162_v36 }
 0x1b5   : > { %v1849_v38 = vpop.f32.mrf.mxu2  ;;  %v1513_v41 = vpop.f32.mrf.mxu0 }
 0x1b6   : > { %v2018_v39 = vpop.f32.mrf.mxu3  ;;  %v1850_v40 = vadd.f32 %v1849_v38, %v1681_v37  ;;  %v1682_v42 = vpop.f32.mrf.mxu1 }
 0x1b7   : > { %v1683_v54 = vadd.f32 %v1682_v42, %v1513_v41  ;;  %v5379_v41 = vld [vmem:[%s7687_s14 + $0x200] sm:$0xf]  ;;  %v6492_v42 = vld [vmem:[%s7687_s14 + $0x20c] sm:$0xf0] }
 0x1b8   : > { %v2019_v44 = vadd.f32 %v2018_v39, %v1850_v40  ;;  %v403_v39 = vld [vmem:[#allocation4 + $0x108] sm:$0xff]  ;;  %v5380_v53 = vor.u32 %v6492_v42, %v5379_v41  ;;  %v5413_v41 = vld [vmem:[%s7687_s14 + $0x250] sm:$0xf0] }
 0x1b9   : > { %v5419_v42 = vld [vmem:[%s7687_s14 + $0x248] sm:$0xf] }
 0x1ba   : > { %v2163_v47 = vadd.f32 %v2019_v44, %v399_v43  ;;  %v6490_v44 = vld [vmem:[%s7687_s14 + $0x204] sm:$0xf] }
 0x1bc   : > { %2227 = vst [vmem:[#allocation4 + $0x118] sm:$0xff] %v2163_v47  ;;  %v6493_v47 = vld [vmem:[%s7687_s14 + $0x214] sm:$0xf0] }
 0x1bd   : > { %v1851_v55 = vpop.f32.mrf.mxu2  ;;  %v1516_v60 = vpop.f32.mrf.mxu0 }
 0x1be   : > { %v2020_v56 = vpop.f32.mrf.mxu3  ;;  %v1852_v59 = vadd.f32 %v1851_v55, %v1683_v54  ;;  %v1685_v61 = vpop.f32.mrf.mxu1  ;;  %v5384_v54 = vor.u32 %v6490_v44, %v5381_v45  ;;  %v6499_v44 = vld [vmem:[%s7687_s14 + $0x24c] sm:$0xf]  ;;  %v5421_v45 = vld [vmem:[%s7687_s14 + $0x258] sm:$0xf0] }
 0x1bf   : > { %v1686_v3 = vadd.f32 %v1685_v61, %v1516_v60  ;;  %v404_v60 = vld [vmem:[#allocation4 + $0x60] sm:$0xff] }
 0x1c0   : > { %v2021_v1 = vadd.f32 %v2020_v56, %v1852_v59  ;;  %1555 = vmatmul.bf16.gmra.mxu0 %v5348_v57  ;;  %v5392_v59 = vor.u32 %v6491_v48, %v5389_v49 }
 0x1c1   : > { %1724 = vmatmul.bf16.gmra.mxu1 %v5352_v58  ;;  %v5388_v58 = vor.u32 %v6493_v47, %v5387_v46 }
 0x1c2   : > { %v2164_v2 = vadd.f32 %v2021_v1, %v400_v0  ;;  %1893 = vmatmul.bf16.gmra.mxu2 %v5356_v62 }
 0x1c3   : > { %2062 = vmatmul.bf16.gmra.mxu3 %v5360_v63 }
 0x1c4   : > { %2228 = vst [vmem:[#allocation4 + $0x98] sm:$0xff] %v2164_v2 }
 0x1c5   : > { %v1854_v4 = vpop.f32.mrf.mxu2  ;;  %v1518_v7 = vpop.f32.mrf.mxu0 }
 0x1c6   : > { %v2023_v5 = vpop.f32.mrf.mxu3  ;;  %v1855_v6 = vadd.f32 %v1854_v4, %v1686_v3  ;;  %v1687_v8 = vpop.f32.mrf.mxu1 }
 0x1c7   : > { %v1688_v20 = vadd.f32 %v1687_v8, %v1518_v7  ;;  %v5395_v7 = vld [vmem:[%s7687_s14 + $0x220] sm:$0xf]  ;;  %v6496_v8 = vld [vmem:[%s7687_s14 + $0x22c] sm:$0xf0] }
 0x1c8   : > { %v2024_v10 = vadd.f32 %v2023_v5, %v1855_v6  ;;  %v405_v5 = vld [vmem:[#allocation4 + $0xe0] sm:$0xff]  ;;  %v5396_v19 = vor.u32 %v6496_v8, %v5395_v7  ;;  %v5429_v7 = vld [vmem:[%s7687_s14 + $0x270] sm:$0xf0]  ;;  %v5435_v8 = vld [vmem:[%s7687_s14 + $0x268] sm:$0xf] }
 0x1ca   : > { %v2165_v13 = vadd.f32 %v2024_v10, %v401_v9  ;;  %v6494_v10 = vld [vmem:[%s7687_s14 + $0x224] sm:$0xf] }
 0x1cc   : > { %2229 = vst [vmem:[#allocation4 + $0x120] sm:$0xff] %v2165_v13  ;;  %v6497_v13 = vld [vmem:[%s7687_s14 + $0x234] sm:$0xf0] }
 0x1cd   : > { %v1856_v21 = vpop.f32.mrf.mxu2  ;;  %v1521_v26 = vpop.f32.mrf.mxu0 }
 0x1ce   : > { %v2025_v22 = vpop.f32.mrf.mxu3  ;;  %v1857_v25 = vadd.f32 %v1856_v21, %v1688_v20  ;;  %v1690_v27 = vpop.f32.mrf.mxu1  ;;  %v5400_v20 = vor.u32 %v6494_v10, %v5397_v11  ;;  %v6503_v10 = vld [vmem:[%s7687_s14 + $0x26c] sm:$0xf]  ;;  %v5437_v11 = vld [vmem:[%s7687_s14 + $0x278] sm:$0xf0] }
 0x1cf   : > { %v1691_v33 = vadd.f32 %v1690_v27, %v1521_v26  ;;  %v406_v26 = vld [vmem:[#allocation4 + $0x188] sm:$0xff] }
 0x1d0   : > { %v2026_v31 = vadd.f32 %v2025_v22, %v1857_v25  ;;  %1560 = vmatmul.bf16.gmra.mxu0 %v5364_v23  ;;  %v5408_v25 = vor.u32 %v6495_v14, %v5405_v15 }
 0x1d1   : > { %1729 = vmatmul.bf16.gmra.mxu1 %v5368_v24  ;;  %v5404_v24 = vor.u32 %v6497_v13, %v5403_v12 }
 0x1d2   : > { %v2166_v32 = vadd.f32 %v2026_v31, %v402_v30  ;;  %1898 = vmatmul.bf16.gmra.mxu2 %v5372_v28 }
 0x1d3   : > { %2067 = vmatmul.bf16.gmra.mxu3 %v5376_v29 }
 0x1d4   : > { %2230 = vst [vmem:[#allocation4 + $0x150] sm:$0xff] %v2166_v32 }
 0x1d5   : > { %v1859_v34 = vpop.f32.mrf.mxu2  ;;  %v1523_v37 = vpop.f32.mrf.mxu0 }
 0x1d6   : > { %v2028_v35 = vpop.f32.mrf.mxu3  ;;  %v1860_v36 = vadd.f32 %v1859_v34, %v1691_v33  ;;  %v1692_v38 = vpop.f32.mrf.mxu1 }
 0x1d7   : > { %v1693_v50 = vadd.f32 %v1692_v38, %v1523_v37  ;;  %v5411_v37 = vld [vmem:[%s7687_s14 + $0x240] sm:$0xf]  ;;  %v6500_v38 = vld [vmem:[%s7687_s14 + $0x24c] sm:$0xf0] }
 0x1d8   : > { %v2029_v40 = vadd.f32 %v2028_v35, %v1860_v36  ;;  %v407_v35 = vld [vmem:[#allocation4 + $0x138] sm:$0xff]  ;;  %v5412_v49 = vor.u32 %v6500_v38, %v5411_v37  ;;  %v5445_v37 = vld [vmem:[%s7687_s14 + $0x290] sm:$0xf0]  ;;  %v5451_v38 = vld [vmem:[%s7687_s14 + $0x288] sm:$0xf] }
 0x1da   : > { %v2167_v43 = vadd.f32 %v2029_v40, %v403_v39  ;;  %v6498_v40 = vld [vmem:[%s7687_s14 + $0x244] sm:$0xf] }
 0x1dc   : > { %2231 = vst [vmem:[#allocation4 + $0x108] sm:$0xff] %v2167_v43  ;;  %v6501_v43 = vld [vmem:[%s7687_s14 + $0x254] sm:$0xf0] }
 0x1dd   : > { %v1861_v51 = vpop.f32.mrf.mxu2  ;;  %v1526_v56 = vpop.f32.mrf.mxu0 }
 0x1de   : > { %v2030_v52 = vpop.f32.mrf.mxu3  ;;  %v1862_v55 = vadd.f32 %v1861_v51, %v1693_v50  ;;  %v1695_v57 = vpop.f32.mrf.mxu1  ;;  %v5416_v50 = vor.u32 %v6498_v40, %v5413_v41  ;;  %v6507_v40 = vld [vmem:[%s7687_s14 + $0x28c] sm:$0xf]  ;;  %v5453_v41 = vld [vmem:[%s7687_s14 + $0x298] sm:$0xf0] }
 0x1df   : > { %v1696_v63 = vadd.f32 %v1695_v57, %v1526_v56  ;;  %v408_v56 = vld [vmem:[#allocation4 + $0x140] sm:$0xff] }
 0x1e0   : > { %v2031_v61 = vadd.f32 %v2030_v52, %v1862_v55  ;;  %1565 = vmatmul.bf16.gmra.mxu0 %v5380_v53  ;;  %v5424_v55 = vor.u32 %v6499_v44, %v5421_v45 }
 0x1e1   : > { %1734 = vmatmul.bf16.gmra.mxu1 %v5384_v54  ;;  %v5420_v54 = vor.u32 %v6501_v43, %v5419_v42 }
 0x1e2   : > { %v2168_v62 = vadd.f32 %v2031_v61, %v404_v60  ;;  %1903 = vmatmul.bf16.gmra.mxu2 %v5388_v58 }
 0x1e3   : > { %2072 = vmatmul.bf16.gmra.mxu3 %v5392_v59 }
 0x1e4   : > { %2232 = vst [vmem:[#allocation4 + $0x60] sm:$0xff] %v2168_v62 }
 0x1e5   : > { %v1864_v0 = vpop.f32.mrf.mxu2  ;;  %v1528_v3 = vpop.f32.mrf.mxu0 }
 0x1e6   : > { %v2033_v1 = vpop.f32.mrf.mxu3  ;;  %v1865_v2 = vadd.f32 %v1864_v0, %v1696_v63  ;;  %v1697_v4 = vpop.f32.mrf.mxu1 }
 0x1e7   : > { %v1698_v16 = vadd.f32 %v1697_v4, %v1528_v3  ;;  %v5427_v3 = vld [vmem:[%s7687_s14 + $0x260] sm:$0xf]  ;;  %v6504_v4 = vld [vmem:[%s7687_s14 + $0x26c] sm:$0xf0] }
 0x1e8   : > { %v2034_v6 = vadd.f32 %v2033_v1, %v1865_v2  ;;  %v409_v1 = vld [vmem:[#allocation4 + $0x80] sm:$0xff]  ;;  %v5428_v15 = vor.u32 %v6504_v4, %v5427_v3  ;;  %v5461_v3 = vld [vmem:[%s7687_s14 + $0x2b0] sm:$0xf0]  ;;  %v5467_v4 = vld [vmem:[%s7687_s14 + $0x2a8] sm:$0xf] }
 0x1ea   : > { %v2169_v9 = vadd.f32 %v2034_v6, %v405_v5  ;;  %v6502_v6 = vld [vmem:[%s7687_s14 + $0x264] sm:$0xf] }
 0x1ec   : > { %2233 = vst [vmem:[#allocation4 + $0xe0] sm:$0xff] %v2169_v9  ;;  %v6505_v9 = vld [vmem:[%s7687_s14 + $0x274] sm:$0xf0] }
 0x1ed   : > { %v1866_v17 = vpop.f32.mrf.mxu2  ;;  %v1531_v22 = vpop.f32.mrf.mxu0 }
 0x1ee   : > { %v2035_v18 = vpop.f32.mrf.mxu3  ;;  %v1867_v21 = vadd.f32 %v1866_v17, %v1698_v16  ;;  %v1700_v23 = vpop.f32.mrf.mxu1  ;;  %v5432_v16 = vor.u32 %v6502_v6, %v5429_v7  ;;  %v6511_v6 = vld [vmem:[%s7687_s14 + $0x2ac] sm:$0xf]  ;;  %v5469_v7 = vld [vmem:[%s7687_s14 + $0x2b8] sm:$0xf0] }
 0x1ef   : > { %v1701_v29 = vadd.f32 %v1700_v23, %v1531_v22  ;;  %v410_v22 = vld [vmem:[#allocation4 + $0x1a8] sm:$0xff] }
 0x1f0   : > { %v2036_v27 = vadd.f32 %v2035_v18, %v1867_v21  ;;  %1570 = vmatmul.bf16.gmra.mxu0 %v5396_v19  ;;  %v5440_v21 = vor.u32 %v6503_v10, %v5437_v11 }
 0x1f1   : > { %1739 = vmatmul.bf16.gmra.mxu1 %v5400_v20  ;;  %v5436_v20 = vor.u32 %v6505_v9, %v5435_v8 }
 0x1f2   : > { %v2170_v28 = vadd.f32 %v2036_v27, %v406_v26  ;;  %1908 = vmatmul.bf16.gmra.mxu2 %v5404_v24 }
 0x1f3   : > { %2077 = vmatmul.bf16.gmra.mxu3 %v5408_v25 }
 0x1f4   : > { %2234 = vst [vmem:[#allocation4 + $0x188] sm:$0xff] %v2170_v28 }
 0x1f5   : > { %v1869_v30 = vpop.f32.mrf.mxu2  ;;  %v1533_v33 = vpop.f32.mrf.mxu0 }
 0x1f6   : > { %v2038_v31 = vpop.f32.mrf.mxu3  ;;  %v1870_v32 = vadd.f32 %v1869_v30, %v1701_v29  ;;  %v1702_v34 = vpop.f32.mrf.mxu1 }
 0x1f7   : > { %v1703_v46 = vadd.f32 %v1702_v34, %v1533_v33  ;;  %v5443_v33 = vld [vmem:[%s7687_s14 + $0x280] sm:$0xf]  ;;  %v6508_v34 = vld [vmem:[%s7687_s14 + $0x28c] sm:$0xf0] }
 0x1f8   : > { %v2039_v36 = vadd.f32 %v2038_v31, %v1870_v32  ;;  %v411_v31 = vld [vmem:[#allocation4 + $0x1b8] sm:$0xff]  ;;  %v5444_v45 = vor.u32 %v6508_v34, %v5443_v33  ;;  %v5477_v33 = vld [vmem:[%s7687_s14 + $0x2d0] sm:$0xf0]  ;;  %v5483_v34 = vld [vmem:[%s7687_s14 + $0x2c8] sm:$0xf] }
 0x1fa   : > { %v2171_v39 = vadd.f32 %v2039_v36, %v407_v35  ;;  %v6506_v36 = vld [vmem:[%s7687_s14 + $0x284] sm:$0xf] }
 0x1fc   : > { %2235 = vst [vmem:[#allocation4 + $0x138] sm:$0xff] %v2171_v39  ;;  %v6509_v39 = vld [vmem:[%s7687_s14 + $0x294] sm:$0xf0] }
 0x1fd   : > { %v1871_v47 = vpop.f32.mrf.mxu2  ;;  %v1536_v52 = vpop.f32.mrf.mxu0 }
 0x1fe   : > { %v2040_v48 = vpop.f32.mrf.mxu3  ;;  %v1872_v51 = vadd.f32 %v1871_v47, %v1703_v46  ;;  %v1705_v53 = vpop.f32.mrf.mxu1  ;;  %v5448_v46 = vor.u32 %v6506_v36, %v5445_v37  ;;  %v6515_v36 = vld [vmem:[%s7687_s14 + $0x2cc] sm:$0xf]  ;;  %v5485_v37 = vld [vmem:[%s7687_s14 + $0x2d8] sm:$0xf0] }
 0x1ff   : > { %v1706_v59 = vadd.f32 %v1705_v53, %v1536_v52  ;;  %v412_v52 = vld [vmem:[#allocation4 + $0x28] sm:$0xff] }
 0x200   : > { %v2041_v57 = vadd.f32 %v2040_v48, %v1872_v51  ;;  %1575 = vmatmul.bf16.gmra.mxu0 %v5412_v49  ;;  %v5456_v51 = vor.u32 %v6507_v40, %v5453_v41 }
 0x201   : > { %1744 = vmatmul.bf16.gmra.mxu1 %v5416_v50  ;;  %v5452_v50 = vor.u32 %v6509_v39, %v5451_v38 }
 0x202   : > { %v2172_v58 = vadd.f32 %v2041_v57, %v408_v56  ;;  %1913 = vmatmul.bf16.gmra.mxu2 %v5420_v54 }
 0x203   : > { %2082 = vmatmul.bf16.gmra.mxu3 %v5424_v55 }
 0x204   : > { %2236 = vst [vmem:[#allocation4 + $0x140] sm:$0xff] %v2172_v58 }
 0x205   : > { %v1874_v60 = vpop.f32.mrf.mxu2  ;;  %v1538_v63 = vpop.f32.mrf.mxu0 }
 0x206   : > { %v2043_v61 = vpop.f32.mrf.mxu3  ;;  %v1875_v62 = vadd.f32 %v1874_v60, %v1706_v59  ;;  %v1707_v0 = vpop.f32.mrf.mxu1 }
 0x207   : > { %v1708_v12 = vadd.f32 %v1707_v0, %v1538_v63  ;;  %v5459_v63 = vld [vmem:[%s7687_s14 + $0x2a0] sm:$0xf]  ;;  %v6512_v0 = vld [vmem:[%s7687_s14 + $0x2ac] sm:$0xf0] }
 0x208   : > { %v2044_v2 = vadd.f32 %v2043_v61, %v1875_v62  ;;  %v413_v61 = vld [vmem:[#allocation4 + $0x1e8] sm:$0xff]  ;;  %v5460_v11 = vor.u32 %v6512_v0, %v5459_v63  ;;  %v5493_v63 = vld [vmem:[%s7687_s14 + $0x2f0] sm:$0xf0] }
 0x209   : > { %v5499_v0 = vld [vmem:[%s7687_s14 + $0x2e8] sm:$0xf] }
 0x20a   : > { %v2173_v5 = vadd.f32 %v2044_v2, %v409_v1  ;;  %v6510_v2 = vld [vmem:[%s7687_s14 + $0x2a4] sm:$0xf] }
 0x20c   : > { %2237 = vst [vmem:[#allocation4 + $0x80] sm:$0xff] %v2173_v5  ;;  %v6513_v5 = vld [vmem:[%s7687_s14 + $0x2b4] sm:$0xf0] }
 0x20d   : > { %v1876_v13 = vpop.f32.mrf.mxu2  ;;  %v1541_v18 = vpop.f32.mrf.mxu0 }
 0x20e   : > { %v2045_v14 = vpop.f32.mrf.mxu3  ;;  %v1877_v17 = vadd.f32 %v1876_v13, %v1708_v12  ;;  %v1710_v19 = vpop.f32.mrf.mxu1  ;;  %v5464_v12 = vor.u32 %v6510_v2, %v5461_v3  ;;  %v6519_v2 = vld [vmem:[%s7687_s14 + $0x2ec] sm:$0xf]  ;;  %v5501_v3 = vld [vmem:[%s7687_s14 + $0x2f8] sm:$0xf0] }
 0x20f   : > { %v1711_v25 = vadd.f32 %v1710_v19, %v1541_v18  ;;  %v414_v18 = vld [vmem:[#allocation4 + $0xf8] sm:$0xff] }
 0x210   : > { %v2046_v23 = vadd.f32 %v2045_v14, %v1877_v17  ;;  %1580 = vmatmul.bf16.gmra.mxu0 %v5428_v15  ;;  %v5472_v17 = vor.u32 %v6511_v6, %v5469_v7 }
 0x211   : > { %1749 = vmatmul.bf16.gmra.mxu1 %v5432_v16  ;;  %v5468_v16 = vor.u32 %v6513_v5, %v5467_v4 }
 0x212   : > { %v2174_v24 = vadd.f32 %v2046_v23, %v410_v22  ;;  %1918 = vmatmul.bf16.gmra.mxu2 %v5436_v20 }
 0x213   : > { %2087 = vmatmul.bf16.gmra.mxu3 %v5440_v21 }
 0x214   : > { %2238 = vst [vmem:[#allocation4 + $0x1a8] sm:$0xff] %v2174_v24 }
 0x215   : > { %v1879_v26 = vpop.f32.mrf.mxu2  ;;  %v1543_v29 = vpop.f32.mrf.mxu0 }
 0x216   : > { %v2048_v27 = vpop.f32.mrf.mxu3  ;;  %v1880_v28 = vadd.f32 %v1879_v26, %v1711_v25  ;;  %v1712_v30 = vpop.f32.mrf.mxu1 }
 0x217   : > { %v1713_v42 = vadd.f32 %v1712_v30, %v1543_v29  ;;  %v5475_v29 = vld [vmem:[%s7687_s14 + $0x2c0] sm:$0xf]  ;;  %v6516_v30 = vld [vmem:[%s7687_s14 + $0x2cc] sm:$0xf0] }
 0x218   : > { %v2049_v32 = vadd.f32 %v2048_v27, %v1880_v28  ;;  %v415_v27 = vld [vmem:[#allocation4 + $0x160] sm:$0xff]  ;;  %v5476_v41 = vor.u32 %v6516_v30, %v5475_v29  ;;  %v5509_v29 = vld [vmem:[%s7687_s14 + $0x310] sm:$0xf0]  ;;  %v5515_v30 = vld [vmem:[%s7687_s14 + $0x308] sm:$0xf] }
 0x21a   : > { %v2175_v35 = vadd.f32 %v2049_v32, %v411_v31  ;;  %v6514_v32 = vld [vmem:[%s7687_s14 + $0x2c4] sm:$0xf] }
 0x21c   : > { %2239 = vst [vmem:[#allocation4 + $0x1b8] sm:$0xff] %v2175_v35  ;;  %v6517_v35 = vld [vmem:[%s7687_s14 + $0x2d4] sm:$0xf0] }
 0x21d   : > { %v1881_v43 = vpop.f32.mrf.mxu2  ;;  %v1546_v48 = vpop.f32.mrf.mxu0 }
 0x21e   : > { %v2050_v44 = vpop.f32.mrf.mxu3  ;;  %v1882_v47 = vadd.f32 %v1881_v43, %v1713_v42  ;;  %v1715_v49 = vpop.f32.mrf.mxu1  ;;  %v5480_v42 = vor.u32 %v6514_v32, %v5477_v33  ;;  %v6523_v32 = vld [vmem:[%s7687_s14 + $0x30c] sm:$0xf]  ;;  %v5517_v33 = vld [vmem:[%s7687_s14 + $0x318] sm:$0xf0] }
 0x21f   : > { %v1716_v55 = vadd.f32 %v1715_v49, %v1546_v48  ;;  %v416_v48 = vld [vmem:[#allocation4 + $0x30] sm:$0xff] }
 0x220   : > { %v2051_v53 = vadd.f32 %v2050_v44, %v1882_v47  ;;  %1585 = vmatmul.bf16.gmra.mxu0 %v5444_v45  ;;  %v5488_v47 = vor.u32 %v6515_v36, %v5485_v37 }
 0x221   : > { %1754 = vmatmul.bf16.gmra.mxu1 %v5448_v46  ;;  %v5484_v46 = vor.u32 %v6517_v35, %v5483_v34 }
 0x222   : > { %v2176_v54 = vadd.f32 %v2051_v53, %v412_v52  ;;  %1923 = vmatmul.bf16.gmra.mxu2 %v5452_v50 }
 0x223   : > { %2092 = vmatmul.bf16.gmra.mxu3 %v5456_v51 }
 0x224   : > { %2240 = vst [vmem:[#allocation4 + $0x28] sm:$0xff] %v2176_v54 }
 0x225   : > { %v1884_v56 = vpop.f32.mrf.mxu2  ;;  %v1548_v59 = vpop.f32.mrf.mxu0 }
 0x226   : > { %v2053_v57 = vpop.f32.mrf.mxu3  ;;  %v1885_v58 = vadd.f32 %v1884_v56, %v1716_v55  ;;  %v1717_v60 = vpop.f32.mrf.mxu1 }
 0x227   : > { %v1718_v8 = vadd.f32 %v1717_v60, %v1548_v59  ;;  %v5491_v59 = vld [vmem:[%s7687_s14 + $0x2e0] sm:$0xf]  ;;  %v6520_v60 = vld [vmem:[%s7687_s14 + $0x2ec] sm:$0xf0] }
 0x228   : > { %v2054_v62 = vadd.f32 %v2053_v57, %v1885_v58  ;;  %v417_v57 = vld [vmem:[#allocation4 + $0x1e0] sm:$0xff]  ;;  %v5492_v7 = vor.u32 %v6520_v60, %v5491_v59  ;;  %v5525_v59 = vld [vmem:[%s7687_s14 + $0x330] sm:$0xf0]  ;;  %v5531_v60 = vld [vmem:[%s7687_s14 + $0x328] sm:$0xf] }
 0x22a   : > { %v2177_v1 = vadd.f32 %v2054_v62, %v413_v61  ;;  %v6518_v62 = vld [vmem:[%s7687_s14 + $0x2e4] sm:$0xf] }
 0x22c   : > { %2241 = vst [vmem:[#allocation4 + $0x1e8] sm:$0xff] %v2177_v1  ;;  %v6521_v1 = vld [vmem:[%s7687_s14 + $0x2f4] sm:$0xf0] }
 0x22d   : > { %v1886_v9 = vpop.f32.mrf.mxu2  ;;  %v1551_v14 = vpop.f32.mrf.mxu0 }
 0x22e   : > { %v2055_v10 = vpop.f32.mrf.mxu3  ;;  %v1887_v13 = vadd.f32 %v1886_v9, %v1718_v8  ;;  %v1720_v15 = vpop.f32.mrf.mxu1  ;;  %v5496_v8 = vor.u32 %v6518_v62, %v5493_v63  ;;  %v6527_v62 = vld [vmem:[%s7687_s14 + $0x32c] sm:$0xf]  ;;  %v5533_v63 = vld [vmem:[%s7687_s14 + $0x338] sm:$0xf0] }
 0x22f   : > { %v1721_v21 = vadd.f32 %v1720_v15, %v1551_v14  ;;  %v418_v14 = vld [vmem:[#allocation4] sm:$0xff] }
 0x230   : > { %v2056_v19 = vadd.f32 %v2055_v10, %v1887_v13  ;;  %1590 = vmatmul.bf16.gmra.mxu0 %v5460_v11  ;;  %v5504_v13 = vor.u32 %v6519_v2, %v5501_v3 }
 0x231   : > { %1759 = vmatmul.bf16.gmra.mxu1 %v5464_v12  ;;  %v5500_v12 = vor.u32 %v6521_v1, %v5499_v0 }
 0x232   : > { %v2178_v20 = vadd.f32 %v2056_v19, %v414_v18  ;;  %1928 = vmatmul.bf16.gmra.mxu2 %v5468_v16 }
 0x233   : > { %2097 = vmatmul.bf16.gmra.mxu3 %v5472_v17 }
 0x234   : > { %2242 = vst [vmem:[#allocation4 + $0xf8] sm:$0xff] %v2178_v20 }
 0x235   : > { %v1889_v22 = vpop.f32.mrf.mxu2  ;;  %v1553_v25 = vpop.f32.mrf.mxu0 }
 0x236   : > { %v2058_v23 = vpop.f32.mrf.mxu3  ;;  %v1890_v24 = vadd.f32 %v1889_v22, %v1721_v21  ;;  %v1722_v26 = vpop.f32.mrf.mxu1 }
 0x237   : > { %v1723_v38 = vadd.f32 %v1722_v26, %v1553_v25  ;;  %v5507_v25 = vld [vmem:[%s7687_s14 + $0x300] sm:$0xf]  ;;  %v6524_v26 = vld [vmem:[%s7687_s14 + $0x30c] sm:$0xf0] }
 0x238   : > { %v2059_v28 = vadd.f32 %v2058_v23, %v1890_v24  ;;  %v419_v23 = vld [vmem:[#allocation4 + $0xf0] sm:$0xff]  ;;  %v5508_v37 = vor.u32 %v6524_v26, %v5507_v25  ;;  %v5547_v26 = vld [vmem:[%s7687_s14 + $0x348] sm:$0xf] }
 0x239   : > { %v5541_v25 = vld [vmem:[%s7687_s14 + $0x350] sm:$0xf0] }
 0x23a   : > { %v2179_v31 = vadd.f32 %v2059_v28, %v415_v27  ;;  %v6522_v28 = vld [vmem:[%s7687_s14 + $0x304] sm:$0xf] }
 0x23c   : > { %2243 = vst [vmem:[#allocation4 + $0x160] sm:$0xff] %v2179_v31  ;;  %v6525_v31 = vld [vmem:[%s7687_s14 + $0x314] sm:$0xf0] }
 0x23d   : > { %v1891_v39 = vpop.f32.mrf.mxu2  ;;  %v1556_v44 = vpop.f32.mrf.mxu0 }
 0x23e   : > { %v2060_v40 = vpop.f32.mrf.mxu3  ;;  %v1892_v43 = vadd.f32 %v1891_v39, %v1723_v38  ;;  %v1725_v45 = vpop.f32.mrf.mxu1  ;;  %v5512_v38 = vor.u32 %v6522_v28, %v5509_v29  ;;  %v6531_v28 = vld [vmem:[%s7687_s14 + $0x34c] sm:$0xf]  ;;  %v5549_v29 = vld [vmem:[%s7687_s14 + $0x358] sm:$0xf0] }
 0x23f   : > { %v1726_v51 = vadd.f32 %v1725_v45, %v1556_v44  ;;  %v420_v44 = vld [vmem:[#allocation4 + $0x8] sm:$0xff] }
 0x240   : > { %v2061_v49 = vadd.f32 %v2060_v40, %v1892_v43  ;;  %1595 = vmatmul.bf16.gmra.mxu0 %v5476_v41  ;;  %v5520_v43 = vor.u32 %v6523_v32, %v5517_v33 }
 0x241   : > { %1764 = vmatmul.bf16.gmra.mxu1 %v5480_v42  ;;  %v5516_v42 = vor.u32 %v6525_v31, %v5515_v30 }
 0x242   : > { %v2180_v50 = vadd.f32 %v2061_v49, %v416_v48  ;;  %1933 = vmatmul.bf16.gmra.mxu2 %v5484_v46 }
 0x243   : > { %2102 = vmatmul.bf16.gmra.mxu3 %v5488_v47 }
 0x244   : > { %2244 = vst [vmem:[#allocation4 + $0x30] sm:$0xff] %v2180_v50 }
 0x245   : > { %v1894_v52 = vpop.f32.mrf.mxu2  ;;  %v1558_v55 = vpop.f32.mrf.mxu0 }
 0x246   : > { %v2063_v53 = vpop.f32.mrf.mxu3  ;;  %v1895_v54 = vadd.f32 %v1894_v52, %v1726_v51  ;;  %v1727_v56 = vpop.f32.mrf.mxu1 }
 0x247   : > { %v1728_v4 = vadd.f32 %v1727_v56, %v1558_v55  ;;  %v5523_v55 = vld [vmem:[%s7687_s14 + $0x320] sm:$0xf]  ;;  %v6528_v56 = vld [vmem:[%s7687_s14 + $0x32c] sm:$0xf0] }
 0x248   : > { %v2064_v58 = vadd.f32 %v2063_v53, %v1895_v54  ;;  %v421_v53 = vld [vmem:[#allocation4 + $0x148] sm:$0xff]  ;;  %v5524_v3 = vor.u32 %v6528_v56, %v5523_v55  ;;  %v5557_v55 = vld [vmem:[%s7687_s14 + $0x370] sm:$0xf0] }
 0x249   : > { %v5563_v56 = vld [vmem:[%s7687_s14 + $0x368] sm:$0xf] }
 0x24a   : > { %v2181_v61 = vadd.f32 %v2064_v58, %v417_v57  ;;  %v6526_v58 = vld [vmem:[%s7687_s14 + $0x324] sm:$0xf] }
 0x24c   : > { %2245 = vst [vmem:[#allocation4 + $0x1e0] sm:$0xff] %v2181_v61  ;;  %v6529_v61 = vld [vmem:[%s7687_s14 + $0x334] sm:$0xf0] }
 0x24d   : > { %v1896_v5 = vpop.f32.mrf.mxu2  ;;  %v1561_v10 = vpop.f32.mrf.mxu0 }
 0x24e   : > { %v2065_v6 = vpop.f32.mrf.mxu3  ;;  %v1897_v9 = vadd.f32 %v1896_v5, %v1728_v4  ;;  %v1730_v11 = vpop.f32.mrf.mxu1  ;;  %v5528_v4 = vor.u32 %v6526_v58, %v5525_v59  ;;  %v6535_v58 = vld [vmem:[%s7687_s14 + $0x36c] sm:$0xf]  ;;  %v5565_v59 = vld [vmem:[%s7687_s14 + $0x378] sm:$0xf0] }
 0x24f   : > { %v1731_v17 = vadd.f32 %v1730_v11, %v1561_v10  ;;  %v422_v10 = vld [vmem:[#allocation4 + $0x1d0] sm:$0xff] }
 0x250   : > { %v2066_v15 = vadd.f32 %v2065_v6, %v1897_v9  ;;  %1600 = vmatmul.bf16.gmra.mxu0 %v5492_v7  ;;  %v5536_v9 = vor.u32 %v6527_v62, %v5533_v63 }
 0x251   : > { %1769 = vmatmul.bf16.gmra.mxu1 %v5496_v8  ;;  %v5532_v8 = vor.u32 %v6529_v61, %v5531_v60 }
 0x252   : > { %v2182_v16 = vadd.f32 %v2066_v15, %v418_v14  ;;  %1938 = vmatmul.bf16.gmra.mxu2 %v5500_v12 }
 0x253   : > { %2107 = vmatmul.bf16.gmra.mxu3 %v5504_v13 }
 0x254   : > { %2246 = vst [vmem:[#allocation4] sm:$0xff] %v2182_v16 }
 0x255   : > { %v1899_v18 = vpop.f32.mrf.mxu2  ;;  %v1563_v21 = vpop.f32.mrf.mxu0 }
 0x256   : > { %v2068_v19 = vpop.f32.mrf.mxu3  ;;  %v1900_v20 = vadd.f32 %v1899_v18, %v1731_v17  ;;  %v1732_v22 = vpop.f32.mrf.mxu1 }
 0x257   : > { %v1733_v34 = vadd.f32 %v1732_v22, %v1563_v21  ;;  %v5539_v21 = vld [vmem:[%s7687_s14 + $0x340] sm:$0xf]  ;;  %v6532_v22 = vld [vmem:[%s7687_s14 + $0x34c] sm:$0xf0] }
 0x258   : > { %v2069_v24 = vadd.f32 %v2068_v19, %v1900_v20  ;;  %v423_v19 = vld [vmem:[#allocation4 + $0x100] sm:$0xff]  ;;  %v5540_v33 = vor.u32 %v6532_v22, %v5539_v21  ;;  %v5573_v21 = vld [vmem:[%s7687_s14 + $0x390] sm:$0xf0]  ;;  %v5579_v22 = vld [vmem:[%s7687_s14 + $0x388] sm:$0xf] }
 0x25a   : > { %v2183_v27 = vadd.f32 %v2069_v24, %v419_v23  ;;  %v6530_v24 = vld [vmem:[%s7687_s14 + $0x344] sm:$0xf] }
 0x25c   : > { %2247 = vst [vmem:[#allocation4 + $0xf0] sm:$0xff] %v2183_v27  ;;  %v6533_v27 = vld [vmem:[%s7687_s14 + $0x354] sm:$0xf0] }
 0x25d   : > { %v1901_v35 = vpop.f32.mrf.mxu2  ;;  %v1566_v40 = vpop.f32.mrf.mxu0 }
 0x25e   : > { %v2070_v36 = vpop.f32.mrf.mxu3  ;;  %v1902_v39 = vadd.f32 %v1901_v35, %v1733_v34  ;;  %v1735_v41 = vpop.f32.mrf.mxu1  ;;  %v5544_v34 = vor.u32 %v6530_v24, %v5541_v25  ;;  %v6539_v24 = vld [vmem:[%s7687_s14 + $0x38c] sm:$0xf]  ;;  %v5581_v25 = vld [vmem:[%s7687_s14 + $0x398] sm:$0xf0] }
 0x25f   : > { %v1736_v47 = vadd.f32 %v1735_v41, %v1566_v40  ;;  %v424_v40 = vld [vmem:[#allocation4 + $0xc8] sm:$0xff] }
 0x260   : > { %v2071_v45 = vadd.f32 %v2070_v36, %v1902_v39  ;;  %1605 = vmatmul.bf16.gmra.mxu0 %v5508_v37  ;;  %v5552_v39 = vor.u32 %v6531_v28, %v5549_v29 }
 0x261   : > { %1774 = vmatmul.bf16.gmra.mxu1 %v5512_v38  ;;  %v5548_v38 = vor.u32 %v6533_v27, %v5547_v26 }
 0x262   : > { %v2184_v46 = vadd.f32 %v2071_v45, %v420_v44  ;;  %1943 = vmatmul.bf16.gmra.mxu2 %v5516_v42 }
 0x263   : > { %2112 = vmatmul.bf16.gmra.mxu3 %v5520_v43 }
 0x264   : > { %2248 = vst [vmem:[#allocation4 + $0x8] sm:$0xff] %v2184_v46 }
 0x265   : > { %v1904_v48 = vpop.f32.mrf.mxu2  ;;  %v1568_v51 = vpop.f32.mrf.mxu0 }
 0x266   : > { %v2073_v49 = vpop.f32.mrf.mxu3  ;;  %v1905_v50 = vadd.f32 %v1904_v48, %v1736_v47  ;;  %v1737_v52 = vpop.f32.mrf.mxu1 }
 0x267   : > { %v1738_v0 = vadd.f32 %v1737_v52, %v1568_v51  ;;  %v5555_v51 = vld [vmem:[%s7687_s14 + $0x360] sm:$0xf]  ;;  %v6536_v52 = vld [vmem:[%s7687_s14 + $0x36c] sm:$0xf0] }
 0x268   : > { %v2074_v54 = vadd.f32 %v2073_v49, %v1905_v50  ;;  %v425_v49 = vld [vmem:[#allocation4 + $0x40] sm:$0xff]  ;;  %v5556_v63 = vor.u32 %v6536_v52, %v5555_v51  ;;  %v5589_v51 = vld [vmem:[%s7687_s14 + $0x3b0] sm:$0xf0]  ;;  %v5595_v52 = vld [vmem:[%s7687_s14 + $0x3a8] sm:$0xf] }
 0x26a   : > { %v2185_v57 = vadd.f32 %v2074_v54, %v421_v53  ;;  %v6534_v54 = vld [vmem:[%s7687_s14 + $0x364] sm:$0xf] }
 0x26c   : > { %2249 = vst [vmem:[#allocation4 + $0x148] sm:$0xff] %v2185_v57  ;;  %v6537_v57 = vld [vmem:[%s7687_s14 + $0x374] sm:$0xf0] }
 0x26d   : > { %v1906_v1 = vpop.f32.mrf.mxu2  ;;  %v1571_v6 = vpop.f32.mrf.mxu0 }
 0x26e   : > { %v2075_v2 = vpop.f32.mrf.mxu3  ;;  %v1907_v5 = vadd.f32 %v1906_v1, %v1738_v0  ;;  %v1740_v7 = vpop.f32.mrf.mxu1  ;;  %v5560_v0 = vor.u32 %v6534_v54, %v5557_v55  ;;  %v6543_v54 = vld [vmem:[%s7687_s14 + $0x3ac] sm:$0xf]  ;;  %v5597_v55 = vld [vmem:[%s7687_s14 + $0x3b8] sm:$0xf0] }
 0x26f   : > { %v1741_v13 = vadd.f32 %v1740_v7, %v1571_v6  ;;  %v426_v6 = vld [vmem:[#allocation4 + $0x1f8] sm:$0xff] }
 0x270   : > { %v2076_v11 = vadd.f32 %v2075_v2, %v1907_v5  ;;  %1610 = vmatmul.bf16.gmra.mxu0 %v5524_v3  ;;  %v5568_v5 = vor.u32 %v6535_v58, %v5565_v59 }
 0x271   : > { %1779 = vmatmul.bf16.gmra.mxu1 %v5528_v4  ;;  %v5564_v4 = vor.u32 %v6537_v57, %v5563_v56 }
 0x272   : > { %v2186_v12 = vadd.f32 %v2076_v11, %v422_v10  ;;  %1948 = vmatmul.bf16.gmra.mxu2 %v5532_v8 }
 0x273   : > { %2117 = vmatmul.bf16.gmra.mxu3 %v5536_v9 }
 0x274   : > { %2250 = vst [vmem:[#allocation4 + $0x1d0] sm:$0xff] %v2186_v12 }
 0x275   : > { %v1909_v14 = vpop.f32.mrf.mxu2  ;;  %v1573_v17 = vpop.f32.mrf.mxu0 }
 0x276   : > { %v2078_v15 = vpop.f32.mrf.mxu3  ;;  %v1910_v16 = vadd.f32 %v1909_v14, %v1741_v13  ;;  %v1742_v18 = vpop.f32.mrf.mxu1 }
 0x277   : > { %v1743_v30 = vadd.f32 %v1742_v18, %v1573_v17  ;;  %v5571_v17 = vld [vmem:[%s7687_s14 + $0x380] sm:$0xf]  ;;  %v6540_v18 = vld [vmem:[%s7687_s14 + $0x38c] sm:$0xf0] }
 0x278   : > { %v2079_v20 = vadd.f32 %v2078_v15, %v1910_v16  ;;  %v427_v15 = vld [vmem:[#allocation4 + $0x20] sm:$0xff]  ;;  %v5572_v29 = vor.u32 %v6540_v18, %v5571_v17  ;;  %v5605_v17 = vld [vmem:[%s7687_s14 + $0x3d0] sm:$0xf0]  ;;  %v5611_v18 = vld [vmem:[%s7687_s14 + $0x3c8] sm:$0xf] }
 0x27a   : > { %v2187_v23 = vadd.f32 %v2079_v20, %v423_v19  ;;  %v6538_v20 = vld [vmem:[%s7687_s14 + $0x384] sm:$0xf] }
 0x27c   : > { %2251 = vst [vmem:[#allocation4 + $0x100] sm:$0xff] %v2187_v23  ;;  %v6541_v23 = vld [vmem:[%s7687_s14 + $0x394] sm:$0xf0] }
 0x27d   : > { %v1911_v31 = vpop.f32.mrf.mxu2  ;;  %v1576_v36 = vpop.f32.mrf.mxu0 }
 0x27e   : > { %v2080_v32 = vpop.f32.mrf.mxu3  ;;  %v1912_v35 = vadd.f32 %v1911_v31, %v1743_v30  ;;  %v1745_v37 = vpop.f32.mrf.mxu1  ;;  %v5576_v30 = vor.u32 %v6538_v20, %v5573_v21  ;;  %v6547_v20 = vld [vmem:[%s7687_s14 + $0x3cc] sm:$0xf]  ;;  %v5613_v21 = vld [vmem:[%s7687_s14 + $0x3d8] sm:$0xf0] }
 0x27f   : > { %v1746_v43 = vadd.f32 %v1745_v37, %v1576_v36  ;;  %v428_v36 = vld [vmem:[#allocation4 + $0x128] sm:$0xff] }
 0x280   : > { %v2081_v41 = vadd.f32 %v2080_v32, %v1912_v35  ;;  %1615 = vmatmul.bf16.gmra.mxu0 %v5540_v33  ;;  %v5584_v35 = vor.u32 %v6539_v24, %v5581_v25 }
 0x281   : > { %1784 = vmatmul.bf16.gmra.mxu1 %v5544_v34  ;;  %v5580_v34 = vor.u32 %v6541_v23, %v5579_v22 }
 0x282   : > { %v2188_v42 = vadd.f32 %v2081_v41, %v424_v40  ;;  %1953 = vmatmul.bf16.gmra.mxu2 %v5548_v38 }
 0x283   : > { %2122 = vmatmul.bf16.gmra.mxu3 %v5552_v39 }
 0x284   : > { %2252 = vst [vmem:[#allocation4 + $0xc8] sm:$0xff] %v2188_v42 }
 0x285   : > { %v1914_v44 = vpop.f32.mrf.mxu2  ;;  %v1578_v47 = vpop.f32.mrf.mxu0 }
 0x286   : > { %v2083_v45 = vpop.f32.mrf.mxu3  ;;  %v1915_v46 = vadd.f32 %v1914_v44, %v1746_v43  ;;  %v1747_v48 = vpop.f32.mrf.mxu1 }
 0x287   : > { %v1748_v60 = vadd.f32 %v1747_v48, %v1578_v47  ;;  %v5587_v47 = vld [vmem:[%s7687_s14 + $0x3a0] sm:$0xf]  ;;  %v6544_v48 = vld [vmem:[%s7687_s14 + $0x3ac] sm:$0xf0] }
 0x288   : > { %v2084_v50 = vadd.f32 %v2083_v45, %v1915_v46  ;;  %v429_v45 = vld [vmem:[#allocation4 + $0x1a0] sm:$0xff]  ;;  %v5588_v59 = vor.u32 %v6544_v48, %v5587_v47  ;;  %v5621_v47 = vld [vmem:[%s7687_s14 + $0x3f0] sm:$0xf0]  ;;  %v5627_v48 = vld [vmem:[%s7687_s14 + $0x3e8] sm:$0xf] }
 0x28a   : > { %v2189_v53 = vadd.f32 %v2084_v50, %v425_v49  ;;  %v6542_v50 = vld [vmem:[%s7687_s14 + $0x3a4] sm:$0xf] }
 0x28c   : > { %2253 = vst [vmem:[#allocation4 + $0x40] sm:$0xff] %v2189_v53  ;;  %v6545_v53 = vld [vmem:[%s7687_s14 + $0x3b4] sm:$0xf0] }
 0x28d   : > { %v1916_v61 = vpop.f32.mrf.mxu2  ;;  %v1581_v2 = vpop.f32.mrf.mxu0 }
 0x28e   : > { %v2085_v62 = vpop.f32.mrf.mxu3  ;;  %v1917_v1 = vadd.f32 %v1916_v61, %v1748_v60  ;;  %v1750_v3 = vpop.f32.mrf.mxu1  ;;  %v5592_v60 = vor.u32 %v6542_v50, %v5589_v51  ;;  %v6551_v50 = vld [vmem:[%s7687_s14 + $0x3ec] sm:$0xf]  ;;  %v5629_v51 = vld [vmem:[%s7687_s14 + $0x3f8] sm:$0xf0] }
 0x28f   : > { %v1751_v9 = vadd.f32 %v1750_v3, %v1581_v2  ;;  %v430_v2 = vld [vmem:[#allocation4 + $0x1f0] sm:$0xff] }
 0x290   : > { %v2086_v7 = vadd.f32 %v2085_v62, %v1917_v1  ;;  %1620 = vmatmul.bf16.gmra.mxu0 %v5556_v63  ;;  %v5600_v1 = vor.u32 %v6543_v54, %v5597_v55 }
 0x291   : > { %1789 = vmatmul.bf16.gmra.mxu1 %v5560_v0  ;;  %v5596_v0 = vor.u32 %v6545_v53, %v5595_v52 }
 0x292   : > { %v2190_v8 = vadd.f32 %v2086_v7, %v426_v6  ;;  %1958 = vmatmul.bf16.gmra.mxu2 %v5564_v4 }
 0x293   : > { %2127 = vmatmul.bf16.gmra.mxu3 %v5568_v5 }
 0x294   : > { %2254 = vst [vmem:[#allocation4 + $0x1f8] sm:$0xff] %v2190_v8 }
 0x295   : > { %v1919_v10 = vpop.f32.mrf.mxu2  ;;  %v1583_v13 = vpop.f32.mrf.mxu0 }
 0x296   : > { %v2088_v11 = vpop.f32.mrf.mxu3  ;;  %v1920_v12 = vadd.f32 %v1919_v10, %v1751_v9  ;;  %v1752_v14 = vpop.f32.mrf.mxu1 }
 0x297   : > { %v1753_v26 = vadd.f32 %v1752_v14, %v1583_v13  ;;  %v5603_v13 = vld [vmem:[%s7687_s14 + $0x3c0] sm:$0xf]  ;;  %v6548_v14 = vld [vmem:[%s7687_s14 + $0x3cc] sm:$0xf0] }
 0x298   : > { %v2089_v16 = vadd.f32 %v2088_v11, %v1920_v12  ;;  %v431_v11 = vld [vmem:[#allocation4 + $0xe8] sm:$0xff]  ;;  %v5604_v25 = vor.u32 %v6548_v14, %v5603_v13 }
 0x29a   : > { %v2191_v19 = vadd.f32 %v2089_v16, %v427_v15  ;;  %v6546_v16 = vld [vmem:[%s7687_s14 + $0x3c4] sm:$0xf] }
 0x29c   : > { %2255 = vst [vmem:[#allocation4 + $0x20] sm:$0xff] %v2191_v19  ;;  %v6549_v19 = vld [vmem:[%s7687_s14 + $0x3d4] sm:$0xf0] }
 0x29d   : > { %v1921_v27 = vpop.f32.mrf.mxu2  ;;  %v1586_v32 = vpop.f32.mrf.mxu0 }
 0x29e   : > { %v2090_v28 = vpop.f32.mrf.mxu3  ;;  %v1922_v31 = vadd.f32 %v1921_v27, %v1753_v26  ;;  %v1755_v33 = vpop.f32.mrf.mxu1  ;;  %v5608_v26 = vor.u32 %v6546_v16, %v5605_v17  ;;  %v436_v16 = vld [vmem:[#allocation4 + $0xd0] sm:$0xff] }
 0x29f   : > { %v1756_v39 = vadd.f32 %v1755_v33, %v1586_v32  ;;  %v432_v32 = vld [vmem:[#allocation4 + $0x78] sm:$0xff] }
 0x2a0   : > { %v2091_v37 = vadd.f32 %v2090_v28, %v1922_v31  ;;  %1625 = vmatmul.bf16.gmra.mxu0 %v5572_v29  ;;  %v5616_v31 = vor.u32 %v6547_v20, %v5613_v21 }
 0x2a1   : > { %1794 = vmatmul.bf16.gmra.mxu1 %v5576_v30  ;;  %v5612_v30 = vor.u32 %v6549_v19, %v5611_v18 }
 0x2a2   : > { %v2192_v38 = vadd.f32 %v2091_v37, %v428_v36  ;;  %1963 = vmatmul.bf16.gmra.mxu2 %v5580_v34 }
 0x2a3   : > { %2132 = vmatmul.bf16.gmra.mxu3 %v5584_v35 }
 0x2a4   : > { %2256 = vst [vmem:[#allocation4 + $0x128] sm:$0xff] %v2192_v38 }
 0x2a5   : > { %v1924_v40 = vpop.f32.mrf.mxu2  ;;  %v1588_v43 = vpop.f32.mrf.mxu0 }
 0x2a6   : > { %v2093_v41 = vpop.f32.mrf.mxu3  ;;  %v1925_v42 = vadd.f32 %v1924_v40, %v1756_v39  ;;  %v1757_v44 = vpop.f32.mrf.mxu1 }
 0x2a7   : > { %v1758_v56 = vadd.f32 %v1757_v44, %v1588_v43  ;;  %v5619_v43 = vld [vmem:[%s7687_s14 + $0x3e0] sm:$0xf]  ;;  %v6552_v44 = vld [vmem:[%s7687_s14 + $0x3ec] sm:$0xf0] }
 0x2a8   : > { %v2094_v46 = vadd.f32 %v2093_v41, %v1925_v42  ;;  %v433_v41 = vld [vmem:[#allocation4 + $0x70] sm:$0xff]  ;;  %v5620_v55 = vor.u32 %v6552_v44, %v5619_v43  ;;  %v439_v43 = vld [vmem:[#allocation4 + $0xa8] sm:$0xff] }
 0x2aa   : > { %v2193_v49 = vadd.f32 %v2094_v46, %v429_v45  ;;  %v6550_v46 = vld [vmem:[%s7687_s14 + $0x3e4] sm:$0xf] }
 0x2ac   : > { %2257 = vst [vmem:[#allocation4 + $0x1a0] sm:$0xff] %v2193_v49  ;;  %v6553_v49 = vld [vmem:[%s7687_s14 + $0x3f4] sm:$0xf0] }
 0x2ad   : > { %v1926_v57 = vpop.f32.mrf.mxu2  ;;  %v1591_v62 = vpop.f32.mrf.mxu0 }
 0x2ae   : > { %v2095_v58 = vpop.f32.mrf.mxu3  ;;  %v1927_v61 = vadd.f32 %v1926_v57, %v1758_v56  ;;  %v1760_v63 = vpop.f32.mrf.mxu1  ;;  %v5624_v56 = vor.u32 %v6550_v46, %v5621_v47 }
 0x2af   : > { %v1761_v5 = vadd.f32 %v1760_v63, %v1591_v62  ;;  %v434_v62 = vld [vmem:[#allocation4 + $0x90] sm:$0xff] }
 0x2b0   : > { %v2096_v3 = vadd.f32 %v2095_v58, %v1927_v61  ;;  %1630 = vmatmul.bf16.gmra.mxu0 %v5588_v59  ;;  %v5632_v61 = vor.u32 %v6551_v50, %v5629_v51 }
 0x2b1   : > { %1799 = vmatmul.bf16.gmra.mxu1 %v5592_v60  ;;  %v5628_v60 = vor.u32 %v6553_v49, %v5627_v48 }
 0x2b2   : > { %v2194_v4 = vadd.f32 %v2096_v3, %v430_v2  ;;  %1968 = vmatmul.bf16.gmra.mxu2 %v5596_v0 }
 0x2b3   : > { %2137 = vmatmul.bf16.gmra.mxu3 %v5600_v1 }
 0x2b4   : > { %2258 = vst [vmem:[#allocation4 + $0x1f0] sm:$0xff] %v2194_v4 }
 0x2b5   : > { %v1929_v6 = vpop.f32.mrf.mxu2  ;;  %v1593_v9 = vpop.f32.mrf.mxu0 }
 0x2b6   : > { %v2098_v7 = vpop.f32.mrf.mxu3  ;;  %v1930_v8 = vadd.f32 %v1929_v6, %v1761_v5  ;;  %v1762_v10 = vpop.f32.mrf.mxu1 }
 0x2b7   : > { %v1763_v22 = vadd.f32 %v1762_v10, %v1593_v9 }
 0x2b8   : > { %v2099_v12 = vadd.f32 %v2098_v7, %v1930_v8  ;;  %v435_v7 = vld [vmem:[#allocation4 + $0x1d8] sm:$0xff] }
 0x2ba   : > { %v2195_v15 = vadd.f32 %v2099_v12, %v431_v11 }
 0x2bc   : > { %2259 = vst [vmem:[#allocation4 + $0xe8] sm:$0xff] %v2195_v15 }
 0x2bd   : > { %v1931_v23 = vpop.f32.mrf.mxu2  ;;  %v1596_v28 = vpop.f32.mrf.mxu0 }
 0x2be   : > { %v2100_v24 = vpop.f32.mrf.mxu3  ;;  %v1932_v27 = vadd.f32 %v1931_v23, %v1763_v22  ;;  %v1765_v29 = vpop.f32.mrf.mxu1 }
 0x2bf   : > { %v1766_v35 = vadd.f32 %v1765_v29, %v1596_v28 }
 0x2c0   : > { %v2101_v33 = vadd.f32 %v2100_v24, %v1932_v27  ;;  %1635 = vmatmul.bf16.gmra.mxu0 %v5604_v25  ;;  %v437_v25 = vld [vmem:[#allocation4 + $0xb8] sm:$0xff] }
 0x2c1   : > { %1804 = vmatmul.bf16.gmra.mxu1 %v5608_v26 }
 0x2c2   : > { %v2196_v34 = vadd.f32 %v2101_v33, %v432_v32  ;;  %1973 = vmatmul.bf16.gmra.mxu2 %v5612_v30 }
 0x2c3   : > { %2142 = vmatmul.bf16.gmra.mxu3 %v5616_v31 }
 0x2c4   : > { %2260 = vst [vmem:[#allocation4 + $0x78] sm:$0xff] %v2196_v34  ;;  %v438_v34 = vld [vmem:[#allocation4 + $0x88] sm:$0xff] }
 0x2c5   : > { %v1934_v36 = vpop.f32.mrf.mxu2  ;;  %v1598_v39 = vpop.f32.mrf.mxu0 }
 0x2c6   : > { %v2103_v37 = vpop.f32.mrf.mxu3  ;;  %v1935_v38 = vadd.f32 %v1934_v36, %v1766_v35  ;;  %v1767_v40 = vpop.f32.mrf.mxu1 }
 0x2c7   : > { %v1768_v52 = vadd.f32 %v1767_v40, %v1598_v39 }
 0x2c8   : > { %v2104_v42 = vadd.f32 %v2103_v37, %v1935_v38 }
 0x2ca   : > { %v2197_v45 = vadd.f32 %v2104_v42, %v433_v41 }
 0x2cc   : > { %2261 = vst [vmem:[#allocation4 + $0x70] sm:$0xff] %v2197_v45 }
 0x2cd   : > { %v1936_v53 = vpop.f32.mrf.mxu2  ;;  %v1601_v58 = vpop.f32.mrf.mxu0 }
 0x2ce   : > { %v2105_v54 = vpop.f32.mrf.mxu3  ;;  %v1937_v57 = vadd.f32 %v1936_v53, %v1768_v52  ;;  %v1770_v59 = vpop.f32.mrf.mxu1  ;;  %v440_v52 = vld [vmem:[#allocation4 + $0x1c8] sm:$0xff] }
 0x2cf   : > { %v1771_v1 = vadd.f32 %v1770_v59, %v1601_v58 }
 0x2d0   : > { %v2106_v63 = vadd.f32 %v2105_v54, %v1937_v57  ;;  %1640 = vmatmul.bf16.gmra.mxu0 %v5620_v55 }
 0x2d1   : > { %1809 = vmatmul.bf16.gmra.mxu1 %v5624_v56 }
 0x2d2   : > { %v2198_v0 = vadd.f32 %v2106_v63, %v434_v62  ;;  %1978 = vmatmul.bf16.gmra.mxu2 %v5628_v60 }
 0x2d3   : > { %2147 = vmatmul.bf16.gmra.mxu3 %v5632_v61  ;;  %v441_v61 = vld [vmem:[#allocation4 + $0x170] sm:$0xff] }
 0x2d4   : > { %2262 = vst [vmem:[#allocation4 + $0x90] sm:$0xff] %v2198_v0 }
 0x2d5   : > { %v1939_v2 = vpop.f32.mrf.mxu2  ;;  %v1603_v5 = vpop.f32.mrf.mxu0 }
 0x2d6   : > { %v2108_v3 = vpop.f32.mrf.mxu3  ;;  %v1940_v4 = vadd.f32 %v1939_v2, %v1771_v1  ;;  %v1772_v6 = vpop.f32.mrf.mxu1 }
 0x2d7   : > { %v1773_v10 = vadd.f32 %v1772_v6, %v1603_v5  ;;  %v442_v6 = vld [vmem:[#allocation4 + $0x178] sm:$0xff] }
 0x2d8   : > { %v2109_v8 = vadd.f32 %v2108_v3, %v1940_v4 }
 0x2da   : > { %v2199_v9 = vadd.f32 %v2109_v8, %v435_v7 }
 0x2dc   : > { %2263 = vst [vmem:[#allocation4 + $0x1d8] sm:$0xff] %v2199_v9 }
 0x2dd   : > { %v1941_v11 = vpop.f32.mrf.mxu2  ;;  %v1606_v14 = vpop.f32.mrf.mxu0 }
 0x2de   : > { %v2110_v12 = vpop.f32.mrf.mxu3  ;;  %v1942_v13 = vadd.f32 %v1941_v11, %v1773_v10  ;;  %v1775_v15 = vpop.f32.mrf.mxu1 }
 0x2df   : > { %v1776_v19 = vadd.f32 %v1775_v15, %v1606_v14  ;;  %v443_v15 = vld [vmem:[#allocation4 + $0x68] sm:$0xff] }
 0x2e0   : > { %v2111_v17 = vadd.f32 %v2110_v12, %v1942_v13 }
 0x2e2   : > { %v2200_v18 = vadd.f32 %v2111_v17, %v436_v16 }
 0x2e4   : > { %2264 = vst [vmem:[#allocation4 + $0xd0] sm:$0xff] %v2200_v18 }
 0x2e5   : > { %v1944_v20 = vpop.f32.mrf.mxu2  ;;  %v1608_v23 = vpop.f32.mrf.mxu0 }
 0x2e6   : > { %v2113_v21 = vpop.f32.mrf.mxu3  ;;  %v1945_v22 = vadd.f32 %v1944_v20, %v1776_v19  ;;  %v1777_v24 = vpop.f32.mrf.mxu1 }
 0x2e7   : > { %v1778_v28 = vadd.f32 %v1777_v24, %v1608_v23  ;;  %v444_v24 = vld [vmem:[#allocation4 + $0x190] sm:$0xff] }
 0x2e8   : > { %v2114_v26 = vadd.f32 %v2113_v21, %v1945_v22 }
 0x2ea   : > { %v2201_v27 = vadd.f32 %v2114_v26, %v437_v25 }
 0x2ec   : > { %2265 = vst [vmem:[#allocation4 + $0xb8] sm:$0xff] %v2201_v27 }
 0x2ed   : > { %v1946_v29 = vpop.f32.mrf.mxu2  ;;  %v1611_v32 = vpop.f32.mrf.mxu0 }
 0x2ee   : > { %v2115_v30 = vpop.f32.mrf.mxu3  ;;  %v1947_v31 = vadd.f32 %v1946_v29, %v1778_v28  ;;  %v1780_v33 = vpop.f32.mrf.mxu1 }
 0x2ef   : > { %v1781_v37 = vadd.f32 %v1780_v33, %v1611_v32  ;;  %v445_v33 = vld [vmem:[#allocation4 + $0x198] sm:$0xff] }
 0x2f0   : > { %v2116_v35 = vadd.f32 %v2115_v30, %v1947_v31 }
 0x2f2   : > { %v2202_v36 = vadd.f32 %v2116_v35, %v438_v34 }
 0x2f4   : > { %2266 = vst [vmem:[#allocation4 + $0x88] sm:$0xff] %v2202_v36 }
 0x2f5   : > { %v1949_v38 = vpop.f32.mrf.mxu2  ;;  %v1613_v41 = vpop.f32.mrf.mxu0 }
 0x2f6   : > { %v2118_v39 = vpop.f32.mrf.mxu3  ;;  %v1950_v40 = vadd.f32 %v1949_v38, %v1781_v37  ;;  %v1782_v42 = vpop.f32.mrf.mxu1 }
 0x2f7   : > { %v1783_v46 = vadd.f32 %v1782_v42, %v1613_v41  ;;  %v446_v42 = vld [vmem:[#allocation4 + $0x38] sm:$0xff] }
 0x2f8   : > { %v2119_v44 = vadd.f32 %v2118_v39, %v1950_v40 }
 0x2fa   : > { %v2203_v45 = vadd.f32 %v2119_v44, %v439_v43 }
 0x2fc   : > { %2267 = vst [vmem:[#allocation4 + $0xa8] sm:$0xff] %v2203_v45 }
 0x2fd   : > { %v1951_v47 = vpop.f32.mrf.mxu2  ;;  %v1616_v50 = vpop.f32.mrf.mxu0 }
 0x2fe   : > { %v2120_v48 = vpop.f32.mrf.mxu3  ;;  %v1952_v49 = vadd.f32 %v1951_v47, %v1783_v46  ;;  %v1785_v51 = vpop.f32.mrf.mxu1 }
 0x2ff   : > { %v1786_v55 = vadd.f32 %v1785_v51, %v1616_v50  ;;  %v447_v51 = vld [vmem:[#allocation4 + $0xc0] sm:$0xff] }
 0x300   : > { %v2121_v53 = vadd.f32 %v2120_v48, %v1952_v49 }
 0x302   : > { %v2204_v54 = vadd.f32 %v2121_v53, %v440_v52 }
 0x304   : > { %2268 = vst [vmem:[#allocation4 + $0x1c8] sm:$0xff] %v2204_v54 }
 0x305   : > { %v1954_v56 = vpop.f32.mrf.mxu2  ;;  %v1618_v59 = vpop.f32.mrf.mxu0 }
 0x306   : > { %v2123_v57 = vpop.f32.mrf.mxu3  ;;  %v1955_v58 = vadd.f32 %v1954_v56, %v1786_v55  ;;  %v1787_v60 = vpop.f32.mrf.mxu1 }
 0x307   : > { %v1788_v0 = vadd.f32 %v1787_v60, %v1618_v59  ;;  %v448_v60 = vld [vmem:[#allocation4 + $0x1c0] sm:$0xff] }
 0x308   : > { %v2124_v62 = vadd.f32 %v2123_v57, %v1955_v58 }
 0x30a   : > { %v2205_v63 = vadd.f32 %v2124_v62, %v441_v61 }
 0x30c   : > { %2269 = vst [vmem:[#allocation4 + $0x170] sm:$0xff] %v2205_v63 }
 0x30d   : > { %v1956_v1 = vpop.f32.mrf.mxu2  ;;  %v1621_v4 = vpop.f32.mrf.mxu0 }
 0x30e   : > { %v2125_v2 = vpop.f32.mrf.mxu3  ;;  %v1957_v3 = vadd.f32 %v1956_v1, %v1788_v0  ;;  %v1790_v5 = vpop.f32.mrf.mxu1 }
 0x30f   : > { %v1791_v9 = vadd.f32 %v1790_v5, %v1621_v4  ;;  %v449_v5 = vld [vmem:[#allocation4 + $0x158] sm:$0xff] }
 0x310   : > { %v2126_v7 = vadd.f32 %v2125_v2, %v1957_v3 }
 0x312   : > { %v2206_v8 = vadd.f32 %v2126_v7, %v442_v6 }
 0x314   : > { %2270 = vst [vmem:[#allocation4 + $0x178] sm:$0xff] %v2206_v8 }
 0x315   : > { %v1959_v10 = vpop.f32.mrf.mxu2  ;;  %v1623_v13 = vpop.f32.mrf.mxu0 }
 0x316   : > { %v2128_v11 = vpop.f32.mrf.mxu3  ;;  %v1960_v12 = vadd.f32 %v1959_v10, %v1791_v9  ;;  %v1792_v14 = vpop.f32.mrf.mxu1 }
 0x317   : > { %v1793_v18 = vadd.f32 %v1792_v14, %v1623_v13 }
 0x318   : > { %v2129_v16 = vadd.f32 %v2128_v11, %v1960_v12  ;;  %v450_v12 = vld [vmem:[#allocation4 + $0x10] sm:$0xff] }
 0x31a   : > { %v2207_v17 = vadd.f32 %v2129_v16, %v443_v15 }
 0x31c   : > { %2271 = vst [vmem:[#allocation4 + $0x68] sm:$0xff] %v2207_v17 }
 0x31d   : > { %v1961_v19 = vpop.f32.mrf.mxu2  ;;  %v1626_v22 = vpop.f32.mrf.mxu0 }
 0x31e   : > { %v2130_v20 = vpop.f32.mrf.mxu3  ;;  %v1962_v21 = vadd.f32 %v1961_v19, %v1793_v18  ;;  %v1795_v23 = vpop.f32.mrf.mxu1 }
 0x31f   : > { %v1796_v27 = vadd.f32 %v1795_v23, %v1626_v22 }
 0x320   : > { %v2131_v25 = vadd.f32 %v2130_v20, %v1962_v21  ;;  %v451_v21 = vld [vmem:[#allocation4 + $0x58] sm:$0xff] }
 0x322   : > { %v2208_v26 = vadd.f32 %v2131_v25, %v444_v24 }
 0x324   : > { %2272 = vst [vmem:[#allocation4 + $0x190] sm:$0xff] %v2208_v26 }
 0x325   : > { %v1964_v28 = vpop.f32.mrf.mxu2  ;;  %v1628_v31 = vpop.f32.mrf.mxu0 }
 0x326   : > { %v2133_v29 = vpop.f32.mrf.mxu3  ;;  %v1965_v30 = vadd.f32 %v1964_v28, %v1796_v27  ;;  %v1797_v32 = vpop.f32.mrf.mxu1 }
 0x327   : > { %v1798_v36 = vadd.f32 %v1797_v32, %v1628_v31 }
 0x328   : > { %v2134_v34 = vadd.f32 %v2133_v29, %v1965_v30  ;;  %v452_v29 = vld [vmem:[#allocation4 + $0xa0] sm:$0xff] }
 0x32a   : > { %v2209_v35 = vadd.f32 %v2134_v34, %v445_v33 }
 0x32c   : > { %2273 = vst [vmem:[#allocation4 + $0x198] sm:$0xff] %v2209_v35 }
 0x32d   : > { %v1966_v37 = vpop.f32.mrf.mxu2  ;;  %v1631_v40 = vpop.f32.mrf.mxu0 }
 0x32e   : > { %v2135_v38 = vpop.f32.mrf.mxu3  ;;  %v1967_v39 = vadd.f32 %v1966_v37, %v1798_v36  ;;  %v1800_v41 = vpop.f32.mrf.mxu1 }
 0x32f   : > { %v1801_v45 = vadd.f32 %v1800_v41, %v1631_v40 }
 0x330   : > { %v2136_v43 = vadd.f32 %v2135_v38, %v1967_v39 }
 0x332   : > { %v2210_v44 = vadd.f32 %v2136_v43, %v446_v42 }
 0x334   : > { %2274 = vst [vmem:[#allocation4 + $0x38] sm:$0xff] %v2210_v44 }
 0x335   : > { %v1969_v46 = vpop.f32.mrf.mxu2  ;;  %v1633_v49 = vpop.f32.mrf.mxu0 }
 0x336   : > { %v2138_v47 = vpop.f32.mrf.mxu3  ;;  %v1970_v48 = vadd.f32 %v1969_v46, %v1801_v45  ;;  %v1802_v50 = vpop.f32.mrf.mxu1 }
 0x337   : > { %v1803_v54 = vadd.f32 %v1802_v50, %v1633_v49 }
 0x338   : > { %v2139_v52 = vadd.f32 %v2138_v47, %v1970_v48 }
 0x33a   : > { %v2211_v53 = vadd.f32 %v2139_v52, %v447_v51 }
 0x33c   : > { %2275 = vst [vmem:[#allocation4 + $0xc0] sm:$0xff] %v2211_v53 }
 0x33d   : > { %v1971_v55 = vpop.f32.mrf.mxu2  ;;  %v1636_v58 = vpop.f32.mrf.mxu0 }
 0x33e   : > { %v2140_v56 = vpop.f32.mrf.mxu3  ;;  %v1972_v57 = vadd.f32 %v1971_v55, %v1803_v54  ;;  %v1805_v59 = vpop.f32.mrf.mxu1 }
 0x33f   : > { %v1806_v63 = vadd.f32 %v1805_v59, %v1636_v58 }
 0x340   : > { %v2141_v61 = vadd.f32 %v2140_v56, %v1972_v57 }
 0x342   : > { %v2212_v62 = vadd.f32 %v2141_v61, %v448_v60 }
 0x344   : > { %2276 = vst [vmem:[#allocation4 + $0x1c0] sm:$0xff] %v2212_v62 }
 0x345   : > { %v1974_v0 = vpop.f32.mrf.mxu2  ;;  %v1638_v3 = vpop.f32.mrf.mxu0 }
 0x346   : > { %v2143_v1 = vpop.f32.mrf.mxu3  ;;  %v1975_v2 = vadd.f32 %v1974_v0, %v1806_v63  ;;  %v1807_v4 = vpop.f32.mrf.mxu1 }
 0x347   : > { %v1808_v8 = vadd.f32 %v1807_v4, %v1638_v3 }
 0x348   : > { %v2144_v6 = vadd.f32 %v2143_v1, %v1975_v2 }
 0x34a   : > { %v2213_v7 = vadd.f32 %v2144_v6, %v449_v5 }
 0x34c   : > { %2277 = vst [vmem:[#allocation4 + $0x158] sm:$0xff] %v2213_v7 }
 0x34d   : > { %v1976_v9 = vpop.f32.mrf.mxu2  ;;  %v1641_v13 = vpop.f32.mrf.mxu0 }
 0x34e   : > { %v2145_v10 = vpop.f32.mrf.mxu3  ;;  %v1977_v11 = vadd.f32 %v1976_v9, %v1808_v8  ;;  %v1810_v14 = vpop.f32.mrf.mxu1 }
 0x34f   : > { %v1811_v17 = vadd.f32 %v1810_v14, %v1641_v13 }
 0x350   : > { %v2146_v15 = vadd.f32 %v2145_v10, %v1977_v11 }
 0x352   : > { %v2214_v16 = vadd.f32 %v2146_v15, %v450_v12 }
 0x354   : > { %2278 = vst [vmem:[#allocation4 + $0x10] sm:$0xff] %v2214_v16 }
 0x355   : > { %v1979_v18 = vpop.f32.mrf.mxu2  ;;  %v1643_v23 = vpop.f32.mrf.mxu0 }
 0x356   : > { %v2148_v19 = vpop.f32.mrf.mxu3  ;;  %v1980_v20 = vadd.f32 %v1979_v18, %v1811_v17  ;;  %v1812_v24 = vpop.f32.mrf.mxu1 }
 0x357   : > { %v1813_v26 = vadd.f32 %v1812_v24, %v1643_v23 }
 0x358   : > { %v2149_v22 = vadd.f32 %v2148_v19, %v1980_v20 }
 0x35a   : > { %v2215_v25 = vadd.f32 %v2149_v22, %v451_v21 }
 0x35c   : > { %2279 = vst [vmem:[#allocation4 + $0x58] sm:$0xff] %v2215_v25 }
 0x35d   : > { %v1981_v27 = vpop.f32.mrf.mxu2 }
 0x35e   : > { %v1982_v28 = vadd.f32 %v1981_v27, %v1813_v26  ;;  %v2150_v30 = vpop.f32.mrf.mxu3 }
 0x360   : > { %v2151_v31 = vadd.f32 %v2150_v30, %v1982_v28 }
 0x362   : > { %v2216_v32 = vadd.f32 %v2151_v31, %v452_v29 }
 0x364   : > { %2280 = vst [vmem:[#allocation4 + $0xa0] sm:$0xff] %v2216_v32 }
 0x365 PF: > { %s9283_s1 = sld [smem:[#allocation22_spill]] }
 0x36b   : > { %p5761_p12 = scmp.le.s32.totalorder %s9283_s1, 0 }
 0x36c   : > { %s9284_s20 = sld [smem:[#allocation22_spill]] (!%p5761_p12) }
 0x36d   : > { %2284 = sbr.rel (%p5761_p12) target bundleno = 1572 (0x624), region = 56  ;;  %s9285_s3 = sld [smem:[#allocation20_spill]] (!%p5761_p12) }
 0x372   : > { %p2285_p10 = scmp.lt.s32.totalorder %s9284_s20, 0  ;;  %s2286_s0 = ssub.s32 0, %s9284_s20  ;;  %v5770_v62 = vld [vmem:[%s7687_s14] sm:$0xf]  ;;  %v6588_v63 = vld [vmem:[%s7687_s14 + $0xc] sm:$0xf0] }
 0x373   : > { %s5762_s21 = smin.u32 %s9284_s20, %s2286_s0  ;;  %s5766_s11 = sshll.u32 %s9285_s3, 9  ;;  %v6586_v3 = vld [vmem:[%s7687_s14 + $0x4] sm:$0xf]  ;;  %v5772_v4 = vld [vmem:[%s7687_s14 + $0x10] sm:$0xf0]  ;;  %v5771_v9 = vor.u32 %v6588_v63, %v5770_v62 }
 0x374   : > { %s2288_s12 = sand.u32 1, %s5762_s21   ;;  %v5778_v5 = vld [vmem:[%s7687_s14 + $0x8] sm:$0xf]  ;;  %v6589_v6 = vld [vmem:[%s7687_s14 + $0x14] sm:$0xf0]  ;;  %v5775_v10 = vor.u32 %v6586_v3, %v5772_v4 }
 0x375   : > { %s2289_s2 = ssub.s32 0, %s2288_s12  ;;  %v6587_v7 = vld [vmem:[%s7687_s14 + $0xc] sm:$0xf]  ;;  %v5780_v8 = vld [vmem:[%s7687_s14 + $0x18] sm:$0xf0]  ;;  %v5779_v11 = vor.u32 %v6589_v6, %v5778_v5 }
 0x376   : > { %s9376_s2 = smov (!%p2285_p10, %s2289_s2), %s2288_s12  ;;  %v5783_v12 = vor.u32 %v6587_v7, %v5780_v8  ;;  %v5786_v13 = vld [vmem:[%s7687_s14 + $0x20] sm:$0xf]  ;;  %v6592_v14 = vld [vmem:[%s7687_s14 + $0x2c] sm:$0xf0]  ;;  %v6590_v15 = vld [vmem:[%s7687_s14 + $0x24] sm:$0xf] }
 0x377   : > { %p5764_p5 = scmp.lt.s32.totalorder %s9376_s2, 0  ;;  %s2295_s18 = sadd.s32 2, %s9376_s2  ;;  %v5788_v16 = vld [vmem:[%s7687_s14 + $0x30] sm:$0xf0]  ;;  %v5794_v17 = vld [vmem:[%s7687_s14 + $0x28] sm:$0xf]  ;;  %v5787_v21 = vor.u32 %v6592_v14, %v5786_v13 }
 0x378   : > { %v6593_v18 = vld [vmem:[%s7687_s14 + $0x34] sm:$0xf0]  ;;  %v6591_v19 = vld [vmem:[%s7687_s14 + $0x2c] sm:$0xf]  ;;  %v5796_v20 = vld [vmem:[%s7687_s14 + $0x38] sm:$0xf0]  ;;  %v5791_v22 = vor.u32 %v6590_v15, %v5788_v16 }
 0x379   : > { %s9378_s18 = smov (!%p5764_p5, %s2295_s18), %s9376_s2  ;;  %v5795_v23 = vor.u32 %v6593_v18, %v5794_v17  ;;  %v5799_v24 = vor.u32 %v6591_v19, %v5796_v20  ;;  %v5802_v25 = vld [vmem:[%s7687_s14 + $0x40] sm:$0xf]  ;;  %v6596_v26 = vld [vmem:[%s7687_s14 + $0x4c] sm:$0xf0]  ;;  %v6594_v27 = vld [vmem:[%s7687_s14 + $0x44] sm:$0xf] }
 0x37a   : > { %s5765_s9 = sshll.u32 %s9378_s18, 10  ;;  %v5804_v28 = vld [vmem:[%s7687_s14 + $0x50] sm:$0xf0]  ;;  %v5810_v29 = vld [vmem:[%s7687_s14 + $0x48] sm:$0xf] }
 0x37b   : > { %s2299_s26 = sadd.s32 %s5766_s11, %s5765_s9  ;;  %v6597_v30 = vld [vmem:[%s7687_s14 + $0x54] sm:$0xf0]  ;;  %v6595_v31 = vld [vmem:[%s7687_s14 + $0x4c] sm:$0xf]  ;;  %v5812_v32 = vld [vmem:[%s7687_s14 + $0x58] sm:$0xf0] }
 0x37c   : > { %s2492_s23 = sshra.s32 %s2299_s26, 3  ;;  %v6608_v62 = vld [vmem:[%s7687_s14 + $0xac] sm:$0xf0]  ;;  %v6606_v63 = vld [vmem:[%s7687_s14 + $0xa4] sm:$0xf] }
 0x37d   : > { %s5767_s15 = sshll.u32 %s2492_s23, 2  ;;  %v6607_v3 = vld [vmem:[%s7687_s14 + $0xac] sm:$0xf]  ;;  %v5860_v4 = vld [vmem:[%s7687_s14 + $0xb8] sm:$0xf0] }
 0x37e   : > { %s8076_s5 = scalar_lea.vmem [#allocation2], %s5767_s15  ;;  %v5863_v8 = vor.u32 %v6607_v3, %v5860_v4  ;;  %v5874_v13 = vld [vmem:[%s7687_s14 + $0xc8] sm:$0xf]  ;;  %v6613_v14 = vld [vmem:[%s7687_s14 + $0xd4] sm:$0xf0] }
 0x37f   : > { %v6721_v33 = vld [vmem:[%s8076_s5 + $0x38] sm:$0xff]  ;;  %v6720_v37 = vld [vmem:[%s8076_s5 + $0x30] sm:$0xff]  ;;  %v6719_v41 = vld [vmem:[%s8076_s5 + $0x28] sm:$0xff]  ;;  %v5875_v19 = vor.u32 %v6613_v14, %v5874_v13 }
 0x380   : > { %v6729_v34 = vld [vmem:[%s8076_s5 + $0x78] sm:$0xff]  ;;  %3392 = vmatpush.bf16.msra.mxu0 %v6721_v33  ;;  %v6728_v38 = vld [vmem:[%s8076_s5 + $0x70] sm:$0xff]  ;;  %v6727_v42 = vld [vmem:[%s8076_s5 + $0x68] sm:$0xff]  ;;  %v5803_v33 = vor.u32 %v6596_v26, %v5802_v25 }
 0x381   : > { %v6737_v35 = vld [vmem:[%s8076_s5 + $0xb8] sm:$0xff]  ;;  %3561 = vmatpush.bf16.msra.mxu1 %v6729_v34  ;;  %v6736_v39 = vld [vmem:[%s8076_s5 + $0xb0] sm:$0xff]  ;;  %v6735_v43 = vld [vmem:[%s8076_s5 + $0xa8] sm:$0xff]  ;;  %v5807_v34 = vor.u32 %v6594_v27, %v5804_v28 }
 0x382   : > { %v6745_v36 = vld [vmem:[%s8076_s5 + $0xf8] sm:$0xff]  ;;  %3730 = vmatpush.bf16.msra.mxu2 %v6737_v35  ;;  %v6744_v40 = vld [vmem:[%s8076_s5 + $0xf0] sm:$0xff]  ;;  %v6743_v44 = vld [vmem:[%s8076_s5 + $0xe8] sm:$0xff]  ;;  %v5811_v35 = vor.u32 %v6597_v30, %v5810_v29 }
 0x383   : > { %3899 = vmatpush.bf16.msra.mxu3 %v6745_v36  ;;  %v6718_v45 = vld [vmem:[%s8076_s5 + $0x20] sm:$0xff]  ;;  %v6717_v49 = vld [vmem:[%s8076_s5 + $0x18] sm:$0xff]  ;;  %v6716_v53 = vld [vmem:[%s8076_s5 + $0x10] sm:$0xff]  ;;  %v5815_v36 = vor.u32 %v6595_v31, %v5812_v32 }
 0x384   : > { %3393 = vmatpush.bf16.msra.mxu0 %v6720_v37  ;;  %v6726_v46 = vld [vmem:[%s8076_s5 + $0x60] sm:$0xff]  ;;  %v6725_v50 = vld [vmem:[%s8076_s5 + $0x58] sm:$0xff]  ;;  %v6724_v54 = vld [vmem:[%s8076_s5 + $0x50] sm:$0xff] }
 0x385   : > { %3562 = vmatpush.bf16.msra.mxu1 %v6728_v38  ;;  %v6734_v47 = vld [vmem:[%s8076_s5 + $0xa0] sm:$0xff]  ;;  %v6733_v51 = vld [vmem:[%s8076_s5 + $0x98] sm:$0xff]  ;;  %v6732_v55 = vld [vmem:[%s8076_s5 + $0x90] sm:$0xff] }
 0x386   : > { %3731 = vmatpush.bf16.msra.mxu2 %v6736_v39  ;;  %v6742_v48 = vld [vmem:[%s8076_s5 + $0xe0] sm:$0xff]  ;;  %v6741_v52 = vld [vmem:[%s8076_s5 + $0xd8] sm:$0xff]  ;;  %v6740_v56 = vld [vmem:[%s8076_s5 + $0xd0] sm:$0xff] }
 0x387   : > { %3900 = vmatpush.bf16.msra.mxu3 %v6744_v40  ;;  %v6715_v57 = vld [vmem:[%s8076_s5 + $0x8] sm:$0xff]  ;;  %v6714_v61 = vld [vmem:[%s8076_s5] sm:$0xff]  ;;  %v6600_v38 = vld [vmem:[%s7687_s14 + $0x6c] sm:$0xf0] }
 0x388   : > { %3394 = vmatpush.bf16.msra.mxu0 %v6719_v41  ;;  %v6723_v58 = vld [vmem:[%s8076_s5 + $0x48] sm:$0xff]  ;;  %v6722_v0 = vld [vmem:[%s8076_s5 + $0x40] sm:$0xff]  ;;  %v5820_v40 = vld [vmem:[%s7687_s14 + $0x70] sm:$0xf0] }
 0x389   : > { %3563 = vmatpush.bf16.msra.mxu1 %v6727_v42  ;;  %v6731_v59 = vld [vmem:[%s8076_s5 + $0x88] sm:$0xff]  ;;  %v6730_v1 = vld [vmem:[%s8076_s5 + $0x80] sm:$0xff]  ;;  %v6601_v42 = vld [vmem:[%s7687_s14 + $0x74] sm:$0xf0] }
 0x38a   : > { %3732 = vmatpush.bf16.msra.mxu2 %v6735_v43  ;;  %v6739_v60 = vld [vmem:[%s8076_s5 + $0xc8] sm:$0xff]  ;;  %v6738_v2 = vld [vmem:[%s8076_s5 + $0xc0] sm:$0xff]  ;;  %v5876_v16 = vld [vmem:[%s7687_s14 + $0xd8] sm:$0xf0] }
 0x38b   : > { %3901 = vmatpush.bf16.msra.mxu3 %v6743_v44  ;;  %v5818_v37 = vld [vmem:[%s7687_s14 + $0x60] sm:$0xf]  ;;  %v6598_v39 = vld [vmem:[%s7687_s14 + $0x64] sm:$0xf]  ;;  %v5826_v41 = vld [vmem:[%s7687_s14 + $0x68] sm:$0xf] }
 0x38c   : > { %3395 = vmatpush.bf16.msra.mxu0 %v6718_v45  ;;  %v6599_v43 = vld [vmem:[%s7687_s14 + $0x6c] sm:$0xf]  ;;  %v5828_v44 = vld [vmem:[%s7687_s14 + $0x78] sm:$0xf0]  ;;  %v5819_v45 = vor.u32 %v6600_v38, %v5818_v37  ;;  %v5890_v25 = vld [vmem:[%s7687_s14 + $0xe8] sm:$0xf] }
 0x38d   : > { %3564 = vmatpush.bf16.msra.mxu1 %v6726_v46  ;;  %v5823_v46 = vor.u32 %v6598_v39, %v5820_v40  ;;  %v6611_v15 = vld [vmem:[%s7687_s14 + $0xcc] sm:$0xf]  ;;  %v6617_v26 = vld [vmem:[%s7687_s14 + $0xf4] sm:$0xf0]  ;;  %v5892_v28 = vld [vmem:[%s7687_s14 + $0xf8] sm:$0xf0] }
 0x38e   : > { %3733 = vmatpush.bf16.msra.mxu2 %v6734_v47  ;;  %v5827_v47 = vor.u32 %v6601_v42, %v5826_v41  ;;  %v5879_v20 = vor.u32 %v6611_v15, %v5876_v16  ;;  %v6615_v27 = vld [vmem:[%s7687_s14 + $0xec] sm:$0xf]  ;;  %v5891_v31 = vor.u32 %v6617_v26, %v5890_v25  ;;  %v5906_v37 = vld [vmem:[%s7687_s14 + $0x108] sm:$0xf]  ;;  %v6621_v38 = vld [vmem:[%s7687_s14 + $0x114] sm:$0xf0] }
 0x38f   : > { %3902 = vmatpush.bf16.msra.mxu3 %v6742_v48  ;;  %v5831_v48 = vor.u32 %v6599_v43, %v5828_v44  ;;  %v5895_v32 = vor.u32 %v6615_v27, %v5892_v28  ;;  %v6619_v39 = vld [vmem:[%s7687_s14 + $0x10c] sm:$0xf]  ;;  %v5908_v40 = vld [vmem:[%s7687_s14 + $0x118] sm:$0xf0]  ;;  %v5932_v25 = vld [vmem:[%s7687_s14 + $0x150] sm:$0xf0] }
 0x390   : > { %3396 = vmatpush.bf16.msra.mxu0 %v6717_v49  ;;  %v5834_v49 = vld [vmem:[%s7687_s14 + $0x80] sm:$0xf]  ;;  %v5938_v26 = vld [vmem:[%s7687_s14 + $0x148] sm:$0xf]  ;;  %v6629_v27 = vld [vmem:[%s7687_s14 + $0x154] sm:$0xf0] }
 0x391   : > { %3565 = vmatpush.bf16.msra.mxu1 %v6725_v50  ;;  %v6604_v50 = vld [vmem:[%s7687_s14 + $0x8c] sm:$0xf0]  ;;  %v6627_v28 = vld [vmem:[%s7687_s14 + $0x14c] sm:$0xf] }
 0x392   : > { %3734 = vmatpush.bf16.msra.mxu2 %v6733_v51  ;;  %v6602_v51 = vld [vmem:[%s7687_s14 + $0x84] sm:$0xf] }
 0x393   : > { %3903 = vmatpush.bf16.msra.mxu3 %v6741_v52  ;;  %v5836_v52 = vld [vmem:[%s7687_s14 + $0x90] sm:$0xf0] }
 0x394   : > { %3397 = vmatpush.bf16.msra.mxu0 %v6716_v53  ;;  %v5842_v53 = vld [vmem:[%s7687_s14 + $0x88] sm:$0xf] }
 0x395   : > { %3566 = vmatpush.bf16.msra.mxu1 %v6724_v54  ;;  %v6605_v54 = vld [vmem:[%s7687_s14 + $0x94] sm:$0xf0] }
 0x396   : > { %3735 = vmatpush.bf16.msra.mxu2 %v6732_v55  ;;  %v6603_v55 = vld [vmem:[%s7687_s14 + $0x8c] sm:$0xf] }
 0x397   : > { %3904 = vmatpush.bf16.msra.mxu3 %v6740_v56  ;;  %v5844_v56 = vld [vmem:[%s7687_s14 + $0x98] sm:$0xf0] }
 0x398   : > { %3398 = vmatpush.bf16.msra.mxu0 %v6715_v57  ;;  %v5835_v57 = vor.u32 %v6604_v50, %v5834_v49 }
 0x399   : > { %3567 = vmatpush.bf16.msra.mxu1 %v6723_v58  ;;  %v5839_v58 = vor.u32 %v6602_v51, %v5836_v52 }
 0x39a   : > { %3736 = vmatpush.bf16.msra.mxu2 %v6731_v59  ;;  %v5843_v59 = vor.u32 %v6605_v54, %v5842_v53  ;;  %v2300_v53 = vld [vmem:[#allocation4 + $0xb0] sm:$0xff] }
 0x39b   : > { %3905 = vmatpush.bf16.msra.mxu3 %v6739_v60  ;;  %v5847_v60 = vor.u32 %v6603_v55, %v5844_v56  ;;  %v5914_v55 = vld [vmem:[%s7687_s14 + $0x120] sm:$0xf]  ;;  %v6624_v56 = vld [vmem:[%s7687_s14 + $0x12c] sm:$0xf0] }
 0x39c   : > { %3399 = vmatpush.bf16.msra.mxu0 %v6714_v61  ;;  %v5850_v61 = vld [vmem:[%s7687_s14 + $0xa0] sm:$0xf]  ;;  %v5915_v3 = vor.u32 %v6624_v56, %v5914_v55  ;;  %v5948_v55 = vld [vmem:[%s7687_s14 + $0x170] sm:$0xf0]  ;;  %v5954_v56 = vld [vmem:[%s7687_s14 + $0x168] sm:$0xf] }
 0x39d   : > { %3568 = vmatpush.bf16.msra.mxu1 %v6722_v0  ;;  %v5852_v0 = vld [vmem:[%s7687_s14 + $0xb0] sm:$0xf0]  ;;  %v5851_v5 = vor.u32 %v6608_v62, %v5850_v61  ;;  %v6625_v61 = vld [vmem:[%s7687_s14 + $0x134] sm:$0xf0]  ;;  %v6623_v62 = vld [vmem:[%s7687_s14 + $0x12c] sm:$0xf] }
 0x39e   : > { %3737 = vmatpush.bf16.msra.mxu2 %v6730_v1  ;;  %v5858_v1 = vld [vmem:[%s7687_s14 + $0xa8] sm:$0xf]  ;;  %v5855_v6 = vor.u32 %v6606_v63, %v5852_v0  ;;  %v5924_v63 = vld [vmem:[%s7687_s14 + $0x138] sm:$0xf0] }
 0x39f   : > { %3906 = vmatpush.bf16.msra.mxu3 %v6738_v2  ;;  %3400 = vmatmul.bf16.vlgmr.msra.gmra.mxu0 %v5771_v9  ;;  %v6609_v2 = vld [vmem:[%s7687_s14 + $0xb4] sm:$0xf0]  ;;  %v5866_v9 = vld [vmem:[%s7687_s14 + $0xc0] sm:$0xf] }
 0x3a0   : > { %3569 = vmatmul.bf16.vlgmr.msra.gmra.mxu1 %v5775_v10  ;;  %v5859_v7 = vor.u32 %v6609_v2, %v5858_v1  ;;  %v6612_v10 = vld [vmem:[%s7687_s14 + $0xcc] sm:$0xf0] }
 0x3a1   : > { %3738 = vmatmul.bf16.vlgmr.msra.gmra.mxu2 %v5779_v11  ;;  %v6610_v11 = vld [vmem:[%s7687_s14 + $0xc4] sm:$0xf]  ;;  %v5867_v17 = vor.u32 %v6612_v10, %v5866_v9  ;;  %v5927_v9 = vor.u32 %v6623_v62, %v5924_v63  ;;  %v2301_v10 = vld [vmem:[#allocation4 + $0x1b0] sm:$0xff] }
 0x3a2   : > { %3907 = vmatmul.bf16.vlgmr.msra.gmra.mxu3 %v5783_v12  ;;  %v5868_v12 = vld [vmem:[%s7687_s14 + $0xd0] sm:$0xf0] }
 0x3a3   : > { %v5871_v18 = vor.u32 %v6610_v11, %v5868_v12 }
 0x3af   : > { %3405 = vmatmul.bf16.gmra.mxu0 %v5787_v21  ;;  %v5882_v21 = vld [vmem:[%s7687_s14 + $0xe0] sm:$0xf] }
 0x3b0   : > { %3574 = vmatmul.bf16.gmra.mxu1 %v5791_v22  ;;  %v6616_v22 = vld [vmem:[%s7687_s14 + $0xec] sm:$0xf0] }
 0x3b1   : > { %3743 = vmatmul.bf16.gmra.mxu2 %v5795_v23  ;;  %v6614_v23 = vld [vmem:[%s7687_s14 + $0xe4] sm:$0xf]  ;;  %v5883_v29 = vor.u32 %v6616_v22, %v5882_v21  ;;  %v5930_v21 = vld [vmem:[%s7687_s14 + $0x140] sm:$0xf]  ;;  %v6628_v22 = vld [vmem:[%s7687_s14 + $0x14c] sm:$0xf0] }
 0x3b2   : > { %3912 = vmatmul.bf16.gmra.mxu3 %v5799_v24  ;;  %v5884_v24 = vld [vmem:[%s7687_s14 + $0xf0] sm:$0xf0] }
 0x3b3   : > { %v5887_v30 = vor.u32 %v6614_v23, %v5884_v24  ;;  %v6626_v24 = vld [vmem:[%s7687_s14 + $0x144] sm:$0xf] }
 0x3bf   : > { %3410 = vmatmul.bf16.gmra.mxu0 %v5803_v33  ;;  %v5898_v33 = vld [vmem:[%s7687_s14 + $0x100] sm:$0xf] }
 0x3c0   : > { %3579 = vmatmul.bf16.gmra.mxu1 %v5807_v34  ;;  %v6620_v34 = vld [vmem:[%s7687_s14 + $0x10c] sm:$0xf0] }
 0x3c1   : > { %3748 = vmatmul.bf16.gmra.mxu2 %v5811_v35  ;;  %v6618_v35 = vld [vmem:[%s7687_s14 + $0x104] sm:$0xf]  ;;  %v5899_v41 = vor.u32 %v6620_v34, %v5898_v33  ;;  %v5931_v33 = vor.u32 %v6628_v22, %v5930_v21  ;;  %v5935_v34 = vor.u32 %v6626_v24, %v5932_v25  ;;  %v5964_v21 = vld [vmem:[%s7687_s14 + $0x190] sm:$0xf0]  ;;  %v5970_v22 = vld [vmem:[%s7687_s14 + $0x188] sm:$0xf] }
 0x3c2   : > { %3917 = vmatmul.bf16.gmra.mxu3 %v5815_v36  ;;  %v5900_v36 = vld [vmem:[%s7687_s14 + $0x110] sm:$0xf0]  ;;  %v6635_v24 = vld [vmem:[%s7687_s14 + $0x18c] sm:$0xf]  ;;  %v5972_v25 = vld [vmem:[%s7687_s14 + $0x198] sm:$0xf0] }
 0x3c3   : > { %v5903_v42 = vor.u32 %v6618_v35, %v5900_v36 }
 0x3cf   : > { %3415 = vmatmul.bf16.gmra.mxu0 %v5819_v45  ;;  %v5907_v45 = vor.u32 %v6621_v38, %v5906_v37  ;;  %v5939_v38 = vor.u32 %v6629_v27, %v5938_v26 }
 0x3d0   : > { %3584 = vmatmul.bf16.gmra.mxu1 %v5823_v46  ;;  %v5911_v46 = vor.u32 %v6619_v39, %v5908_v40  ;;  %v2303_v40 = vld [vmem:[#allocation4 + $0x18] sm:$0xff] }
 0x3d1   : > { %3753 = vmatmul.bf16.gmra.mxu2 %v5827_v47 }
 0x3d2   : > { %3922 = vmatmul.bf16.gmra.mxu3 %v5831_v48 }
 0x3df   : > { %3420 = vmatmul.bf16.gmra.mxu0 %v5835_v57 }
 0x3e0   : > { %3589 = vmatmul.bf16.gmra.mxu1 %v5839_v58  ;;  %v6622_v58 = vld [vmem:[%s7687_s14 + $0x124] sm:$0xf] }
 0x3e1   : > { %3758 = vmatmul.bf16.gmra.mxu2 %v5843_v59  ;;  %v5916_v59 = vld [vmem:[%s7687_s14 + $0x130] sm:$0xf0] }
 0x3e2   : > { %3927 = vmatmul.bf16.gmra.mxu3 %v5847_v60  ;;  %v5922_v60 = vld [vmem:[%s7687_s14 + $0x128] sm:$0xf]  ;;  %v5919_v4 = vor.u32 %v6622_v58, %v5916_v59  ;;  %v6631_v58 = vld [vmem:[%s7687_s14 + $0x16c] sm:$0xf]  ;;  %v5956_v59 = vld [vmem:[%s7687_s14 + $0x178] sm:$0xf0] }
 0x3ef   : > { %3425 = vmatmul.bf16.gmra.mxu0 %v5851_v5 }
 0x3f0   : > { %3594 = vmatmul.bf16.gmra.mxu1 %v5855_v6 }
 0x3f1   : > { %3763 = vmatmul.bf16.gmra.mxu2 %v5859_v7 }
 0x3f2   : > { %3932 = vmatmul.bf16.gmra.mxu3 %v5863_v8  ;;  %v5923_v8 = vor.u32 %v6625_v61, %v5922_v60 }
 0x3ff   : > { %3430 = vmatmul.bf16.gmra.mxu0 %v5867_v17 }
 0x400   : > { %3599 = vmatmul.bf16.gmra.mxu1 %v5871_v18 }
 0x401   : > { %3768 = vmatmul.bf16.gmra.mxu2 %v5875_v19  ;;  %v2302_v19 = vld [vmem:[#allocation4 + $0xd8] sm:$0xff] }
 0x402   : > { %3937 = vmatmul.bf16.gmra.mxu3 %v5879_v20 }
 0x40f   : > { %3435 = vmatmul.bf16.gmra.mxu0 %v5883_v29  ;;  %v5940_v29 = vld [vmem:[%s7687_s14 + $0x158] sm:$0xf0] }
 0x410   : > { %3604 = vmatmul.bf16.gmra.mxu1 %v5887_v30  ;;  %v5943_v39 = vor.u32 %v6627_v28, %v5940_v29 }
 0x411   : > { %3773 = vmatmul.bf16.gmra.mxu2 %v5891_v31 }
 0x412   : > { %3942 = vmatmul.bf16.gmra.mxu3 %v5895_v32 }
 0x41c   : > { %v3401_v43 = vpop.f32.mrf.mxu0 }
 0x41d   : > { %v3570_v44 = vpop.f32.mrf.mxu1 }
 0x41e   : > { %v3571_v47 = vadd.f32 %v3570_v44, %v3401_v43 }
 0x41f   : > { %3440 = vmatmul.bf16.gmra.mxu0 %v5899_v41 }
 0x420   : > { %3609 = vmatmul.bf16.gmra.mxu1 %v5903_v42 }
 0x421   : > { %3778 = vmatmul.bf16.gmra.mxu2 %v5907_v45 }
 0x422   : > { %3947 = vmatmul.bf16.gmra.mxu3 %v5911_v46 }
 0x424   : > { %v3739_v48 = vpop.f32.mrf.mxu2  ;;  %v3403_v51 = vpop.f32.mrf.mxu0 }
 0x425   : > { %v3908_v49 = vpop.f32.mrf.mxu3  ;;  %v3740_v50 = vadd.f32 %v3739_v48, %v3571_v47  ;;  %v3572_v52 = vpop.f32.mrf.mxu1 }
 0x426   : > { %v3573_v0 = vadd.f32 %v3572_v52, %v3403_v51  ;;  %v5946_v51 = vld [vmem:[%s7687_s14 + $0x160] sm:$0xf]  ;;  %v6632_v52 = vld [vmem:[%s7687_s14 + $0x16c] sm:$0xf0] }
 0x427   : > { %v3909_v54 = vadd.f32 %v3908_v49, %v3740_v50  ;;  %v2304_v49 = vld [vmem:[#allocation4 + $0x50] sm:$0xff]  ;;  %v5947_v63 = vor.u32 %v6632_v52, %v5946_v51  ;;  %v5986_v52 = vld [vmem:[%s7687_s14 + $0x1a8] sm:$0xf] }
 0x428   : > { %v5980_v51 = vld [vmem:[%s7687_s14 + $0x1b0] sm:$0xf0] }
 0x429   : > { %v4068_v57 = vadd.f32 %v3909_v54, %v2300_v53  ;;  %v6630_v54 = vld [vmem:[%s7687_s14 + $0x164] sm:$0xf] }
 0x42b   : > { %4132 = vst [vmem:[#allocation4 + $0xb0] sm:$0xff] %v4068_v57  ;;  %v6633_v57 = vld [vmem:[%s7687_s14 + $0x174] sm:$0xf0] }
 0x42c   : > { %v3741_v1 = vpop.f32.mrf.mxu2  ;;  %v3406_v6 = vpop.f32.mrf.mxu0 }
 0x42d   : > { %v3910_v2 = vpop.f32.mrf.mxu3  ;;  %v3742_v5 = vadd.f32 %v3741_v1, %v3573_v0  ;;  %v3575_v7 = vpop.f32.mrf.mxu1  ;;  %v5951_v0 = vor.u32 %v6630_v54, %v5948_v55  ;;  %v6639_v54 = vld [vmem:[%s7687_s14 + $0x1ac] sm:$0xf]  ;;  %v5988_v55 = vld [vmem:[%s7687_s14 + $0x1b8] sm:$0xf0] }
 0x42e   : > { %v3576_v13 = vadd.f32 %v3575_v7, %v3406_v6  ;;  %v2305_v6 = vld [vmem:[#allocation4 + $0x168] sm:$0xff] }
 0x42f   : > { %v3911_v11 = vadd.f32 %v3910_v2, %v3742_v5  ;;  %3445 = vmatmul.bf16.gmra.mxu0 %v5915_v3  ;;  %v5959_v5 = vor.u32 %v6631_v58, %v5956_v59 }
 0x430   : > { %3614 = vmatmul.bf16.gmra.mxu1 %v5919_v4  ;;  %v5955_v4 = vor.u32 %v6633_v57, %v5954_v56 }
 0x431   : > { %v4069_v12 = vadd.f32 %v3911_v11, %v2301_v10  ;;  %3783 = vmatmul.bf16.gmra.mxu2 %v5923_v8 }
 0x432   : > { %3952 = vmatmul.bf16.gmra.mxu3 %v5927_v9 }
 0x433   : > { %4133 = vst [vmem:[#allocation4 + $0x1b0] sm:$0xff] %v4069_v12 }
 0x434   : > { %v3744_v14 = vpop.f32.mrf.mxu2  ;;  %v3408_v17 = vpop.f32.mrf.mxu0 }
 0x435   : > { %v3913_v15 = vpop.f32.mrf.mxu3  ;;  %v3745_v16 = vadd.f32 %v3744_v14, %v3576_v13  ;;  %v3577_v18 = vpop.f32.mrf.mxu1 }
 0x436   : > { %v3578_v30 = vadd.f32 %v3577_v18, %v3408_v17  ;;  %v5962_v17 = vld [vmem:[%s7687_s14 + $0x180] sm:$0xf]  ;;  %v6636_v18 = vld [vmem:[%s7687_s14 + $0x18c] sm:$0xf0] }
 0x437   : > { %v3914_v20 = vadd.f32 %v3913_v15, %v3745_v16  ;;  %v2306_v15 = vld [vmem:[#allocation4 + $0x130] sm:$0xff]  ;;  %v5963_v29 = vor.u32 %v6636_v18, %v5962_v17  ;;  %v6002_v18 = vld [vmem:[%s7687_s14 + $0x1c8] sm:$0xf] }
 0x438   : > { %v5996_v17 = vld [vmem:[%s7687_s14 + $0x1d0] sm:$0xf0] }
 0x439   : > { %v4070_v23 = vadd.f32 %v3914_v20, %v2302_v19  ;;  %v6634_v20 = vld [vmem:[%s7687_s14 + $0x184] sm:$0xf] }
 0x43b   : > { %4134 = vst [vmem:[#allocation4 + $0xd8] sm:$0xff] %v4070_v23  ;;  %v6637_v23 = vld [vmem:[%s7687_s14 + $0x194] sm:$0xf0] }
 0x43c   : > { %v3746_v31 = vpop.f32.mrf.mxu2  ;;  %v3411_v36 = vpop.f32.mrf.mxu0 }
 0x43d   : > { %v3915_v32 = vpop.f32.mrf.mxu3  ;;  %v3747_v35 = vadd.f32 %v3746_v31, %v3578_v30  ;;  %v3580_v37 = vpop.f32.mrf.mxu1  ;;  %v5967_v30 = vor.u32 %v6634_v20, %v5964_v21  ;;  %v6643_v20 = vld [vmem:[%s7687_s14 + $0x1cc] sm:$0xf]  ;;  %v6004_v21 = vld [vmem:[%s7687_s14 + $0x1d8] sm:$0xf0] }
 0x43e   : > { %v3581_v43 = vadd.f32 %v3580_v37, %v3411_v36  ;;  %v2307_v36 = vld [vmem:[#allocation4 + $0x48] sm:$0xff] }
 0x43f   : > { %v3916_v41 = vadd.f32 %v3915_v32, %v3747_v35  ;;  %3450 = vmatmul.bf16.gmra.mxu0 %v5931_v33  ;;  %v5975_v35 = vor.u32 %v6635_v24, %v5972_v25 }
 0x440   : > { %3619 = vmatmul.bf16.gmra.mxu1 %v5935_v34  ;;  %v5971_v34 = vor.u32 %v6637_v23, %v5970_v22 }
 0x441   : > { %v4071_v42 = vadd.f32 %v3916_v41, %v2303_v40  ;;  %3788 = vmatmul.bf16.gmra.mxu2 %v5939_v38 }
 0x442   : > { %3957 = vmatmul.bf16.gmra.mxu3 %v5943_v39 }
 0x443   : > { %4135 = vst [vmem:[#allocation4 + $0x18] sm:$0xff] %v4071_v42 }
 0x444   : > { %v3749_v44 = vpop.f32.mrf.mxu2  ;;  %v3413_v47 = vpop.f32.mrf.mxu0 }
 0x445   : > { %v3918_v45 = vpop.f32.mrf.mxu3  ;;  %v3750_v46 = vadd.f32 %v3749_v44, %v3581_v43  ;;  %v3582_v48 = vpop.f32.mrf.mxu1 }
 0x446   : > { %v3583_v60 = vadd.f32 %v3582_v48, %v3413_v47  ;;  %v5978_v47 = vld [vmem:[%s7687_s14 + $0x1a0] sm:$0xf]  ;;  %v6640_v48 = vld [vmem:[%s7687_s14 + $0x1ac] sm:$0xf0] }
 0x447   : > { %v3919_v50 = vadd.f32 %v3918_v45, %v3750_v46  ;;  %v2308_v45 = vld [vmem:[#allocation4 + $0x180] sm:$0xff]  ;;  %v5979_v59 = vor.u32 %v6640_v48, %v5978_v47  ;;  %v6012_v47 = vld [vmem:[%s7687_s14 + $0x1f0] sm:$0xf0]  ;;  %v6018_v48 = vld [vmem:[%s7687_s14 + $0x1e8] sm:$0xf] }
 0x449   : > { %v4072_v53 = vadd.f32 %v3919_v50, %v2304_v49  ;;  %v6638_v50 = vld [vmem:[%s7687_s14 + $0x1a4] sm:$0xf] }
 0x44b   : > { %4136 = vst [vmem:[#allocation4 + $0x50] sm:$0xff] %v4072_v53  ;;  %v6641_v53 = vld [vmem:[%s7687_s14 + $0x1b4] sm:$0xf0] }
 0x44c   : > { %v3751_v61 = vpop.f32.mrf.mxu2  ;;  %v3416_v2 = vpop.f32.mrf.mxu0 }
 0x44d   : > { %v3920_v62 = vpop.f32.mrf.mxu3  ;;  %v3752_v1 = vadd.f32 %v3751_v61, %v3583_v60  ;;  %v3585_v3 = vpop.f32.mrf.mxu1  ;;  %v5983_v60 = vor.u32 %v6638_v50, %v5980_v51  ;;  %v6647_v50 = vld [vmem:[%s7687_s14 + $0x1ec] sm:$0xf]  ;;  %v6020_v51 = vld [vmem:[%s7687_s14 + $0x1f8] sm:$0xf0] }
 0x44e   : > { %v3586_v9 = vadd.f32 %v3585_v3, %v3416_v2  ;;  %v2309_v2 = vld [vmem:[#allocation4 + $0x110] sm:$0xff] }
 0x44f   : > { %v3921_v7 = vadd.f32 %v3920_v62, %v3752_v1  ;;  %3455 = vmatmul.bf16.gmra.mxu0 %v5947_v63  ;;  %v5991_v1 = vor.u32 %v6639_v54, %v5988_v55 }
 0x450   : > { %3624 = vmatmul.bf16.gmra.mxu1 %v5951_v0  ;;  %v5987_v0 = vor.u32 %v6641_v53, %v5986_v52 }
 0x451   : > { %v4073_v8 = vadd.f32 %v3921_v7, %v2305_v6  ;;  %3793 = vmatmul.bf16.gmra.mxu2 %v5955_v4 }
 0x452   : > { %3962 = vmatmul.bf16.gmra.mxu3 %v5959_v5 }
 0x453   : > { %4137 = vst [vmem:[#allocation4 + $0x168] sm:$0xff] %v4073_v8 }
 0x454   : > { %v3754_v10 = vpop.f32.mrf.mxu2  ;;  %v3418_v13 = vpop.f32.mrf.mxu0 }
 0x455   : > { %v3923_v11 = vpop.f32.mrf.mxu3  ;;  %v3755_v12 = vadd.f32 %v3754_v10, %v3586_v9  ;;  %v3587_v14 = vpop.f32.mrf.mxu1 }
 0x456   : > { %v3588_v26 = vadd.f32 %v3587_v14, %v3418_v13  ;;  %v5994_v13 = vld [vmem:[%s7687_s14 + $0x1c0] sm:$0xf]  ;;  %v6644_v14 = vld [vmem:[%s7687_s14 + $0x1cc] sm:$0xf0] }
 0x457   : > { %v3924_v16 = vadd.f32 %v3923_v11, %v3755_v12  ;;  %v2310_v11 = vld [vmem:[#allocation4 + $0x118] sm:$0xff]  ;;  %v5995_v25 = vor.u32 %v6644_v14, %v5994_v13  ;;  %v6028_v13 = vld [vmem:[%s7687_s14 + $0x210] sm:$0xf0]  ;;  %v6034_v14 = vld [vmem:[%s7687_s14 + $0x208] sm:$0xf] }
 0x459   : > { %v4074_v19 = vadd.f32 %v3924_v16, %v2306_v15  ;;  %v6642_v16 = vld [vmem:[%s7687_s14 + $0x1c4] sm:$0xf] }
 0x45b   : > { %4138 = vst [vmem:[#allocation4 + $0x130] sm:$0xff] %v4074_v19  ;;  %v6645_v19 = vld [vmem:[%s7687_s14 + $0x1d4] sm:$0xf0] }
 0x45c   : > { %v3756_v27 = vpop.f32.mrf.mxu2  ;;  %v3421_v32 = vpop.f32.mrf.mxu0 }
 0x45d   : > { %v3925_v28 = vpop.f32.mrf.mxu3  ;;  %v3757_v31 = vadd.f32 %v3756_v27, %v3588_v26  ;;  %v3590_v33 = vpop.f32.mrf.mxu1  ;;  %v5999_v26 = vor.u32 %v6642_v16, %v5996_v17  ;;  %v6651_v16 = vld [vmem:[%s7687_s14 + $0x20c] sm:$0xf]  ;;  %v6036_v17 = vld [vmem:[%s7687_s14 + $0x218] sm:$0xf0] }
 0x45e   : > { %v3591_v39 = vadd.f32 %v3590_v33, %v3421_v32  ;;  %v2311_v32 = vld [vmem:[#allocation4 + $0x98] sm:$0xff] }
 0x45f   : > { %v3926_v37 = vadd.f32 %v3925_v28, %v3757_v31  ;;  %3460 = vmatmul.bf16.gmra.mxu0 %v5963_v29  ;;  %v6007_v31 = vor.u32 %v6643_v20, %v6004_v21 }
 0x460   : > { %3629 = vmatmul.bf16.gmra.mxu1 %v5967_v30  ;;  %v6003_v30 = vor.u32 %v6645_v19, %v6002_v18 }
 0x461   : > { %v4075_v38 = vadd.f32 %v3926_v37, %v2307_v36  ;;  %3798 = vmatmul.bf16.gmra.mxu2 %v5971_v34 }
 0x462   : > { %3967 = vmatmul.bf16.gmra.mxu3 %v5975_v35 }
 0x463   : > { %4139 = vst [vmem:[#allocation4 + $0x48] sm:$0xff] %v4075_v38 }
 0x464   : > { %v3759_v40 = vpop.f32.mrf.mxu2  ;;  %v3423_v43 = vpop.f32.mrf.mxu0 }
 0x465   : > { %v3928_v41 = vpop.f32.mrf.mxu3  ;;  %v3760_v42 = vadd.f32 %v3759_v40, %v3591_v39  ;;  %v3592_v44 = vpop.f32.mrf.mxu1 }
 0x466   : > { %v3593_v56 = vadd.f32 %v3592_v44, %v3423_v43  ;;  %v6010_v43 = vld [vmem:[%s7687_s14 + $0x1e0] sm:$0xf]  ;;  %v6648_v44 = vld [vmem:[%s7687_s14 + $0x1ec] sm:$0xf0] }
 0x467   : > { %v3929_v46 = vadd.f32 %v3928_v41, %v3760_v42  ;;  %v2312_v41 = vld [vmem:[#allocation4 + $0x120] sm:$0xff]  ;;  %v6011_v55 = vor.u32 %v6648_v44, %v6010_v43  ;;  %v6044_v43 = vld [vmem:[%s7687_s14 + $0x230] sm:$0xf0]  ;;  %v6050_v44 = vld [vmem:[%s7687_s14 + $0x228] sm:$0xf] }
 0x469   : > { %v4076_v49 = vadd.f32 %v3929_v46, %v2308_v45  ;;  %v6646_v46 = vld [vmem:[%s7687_s14 + $0x1e4] sm:$0xf] }
 0x46b   : > { %4140 = vst [vmem:[#allocation4 + $0x180] sm:$0xff] %v4076_v49  ;;  %v6649_v49 = vld [vmem:[%s7687_s14 + $0x1f4] sm:$0xf0] }
 0x46c   : > { %v3761_v57 = vpop.f32.mrf.mxu2  ;;  %v3426_v62 = vpop.f32.mrf.mxu0 }
 0x46d   : > { %v3930_v58 = vpop.f32.mrf.mxu3  ;;  %v3762_v61 = vadd.f32 %v3761_v57, %v3593_v56  ;;  %v3595_v63 = vpop.f32.mrf.mxu1  ;;  %v6015_v56 = vor.u32 %v6646_v46, %v6012_v47  ;;  %v6655_v46 = vld [vmem:[%s7687_s14 + $0x22c] sm:$0xf]  ;;  %v6052_v47 = vld [vmem:[%s7687_s14 + $0x238] sm:$0xf0] }
 0x46e   : > { %v3596_v5 = vadd.f32 %v3595_v63, %v3426_v62  ;;  %v2313_v62 = vld [vmem:[#allocation4 + $0x150] sm:$0xff] }
 0x46f   : > { %v3931_v3 = vadd.f32 %v3930_v58, %v3762_v61  ;;  %3465 = vmatmul.bf16.gmra.mxu0 %v5979_v59  ;;  %v6023_v61 = vor.u32 %v6647_v50, %v6020_v51 }
 0x470   : > { %3634 = vmatmul.bf16.gmra.mxu1 %v5983_v60  ;;  %v6019_v60 = vor.u32 %v6649_v49, %v6018_v48 }
 0x471   : > { %v4077_v4 = vadd.f32 %v3931_v3, %v2309_v2  ;;  %3803 = vmatmul.bf16.gmra.mxu2 %v5987_v0 }
 0x472   : > { %3972 = vmatmul.bf16.gmra.mxu3 %v5991_v1 }
 0x473   : > { %4141 = vst [vmem:[#allocation4 + $0x110] sm:$0xff] %v4077_v4 }
 0x474   : > { %v3764_v6 = vpop.f32.mrf.mxu2  ;;  %v3428_v9 = vpop.f32.mrf.mxu0 }
 0x475   : > { %v3933_v7 = vpop.f32.mrf.mxu3  ;;  %v3765_v8 = vadd.f32 %v3764_v6, %v3596_v5  ;;  %v3597_v10 = vpop.f32.mrf.mxu1 }
 0x476   : > { %v3598_v22 = vadd.f32 %v3597_v10, %v3428_v9  ;;  %v6026_v9 = vld [vmem:[%s7687_s14 + $0x200] sm:$0xf]  ;;  %v6652_v10 = vld [vmem:[%s7687_s14 + $0x20c] sm:$0xf0] }
 0x477   : > { %v3934_v12 = vadd.f32 %v3933_v7, %v3765_v8  ;;  %v2314_v7 = vld [vmem:[#allocation4 + $0x108] sm:$0xff]  ;;  %v6027_v21 = vor.u32 %v6652_v10, %v6026_v9  ;;  %v6060_v9 = vld [vmem:[%s7687_s14 + $0x250] sm:$0xf0] }
 0x478   : > { %v6066_v10 = vld [vmem:[%s7687_s14 + $0x248] sm:$0xf] }
 0x479   : > { %v4078_v15 = vadd.f32 %v3934_v12, %v2310_v11  ;;  %v6650_v12 = vld [vmem:[%s7687_s14 + $0x204] sm:$0xf] }
 0x47b   : > { %4142 = vst [vmem:[#allocation4 + $0x118] sm:$0xff] %v4078_v15  ;;  %v6653_v15 = vld [vmem:[%s7687_s14 + $0x214] sm:$0xf0] }
 0x47c   : > { %v3766_v23 = vpop.f32.mrf.mxu2  ;;  %v3431_v28 = vpop.f32.mrf.mxu0 }
 0x47d   : > { %v3935_v24 = vpop.f32.mrf.mxu3  ;;  %v3767_v27 = vadd.f32 %v3766_v23, %v3598_v22  ;;  %v3600_v29 = vpop.f32.mrf.mxu1  ;;  %v6031_v22 = vor.u32 %v6650_v12, %v6028_v13  ;;  %v6659_v12 = vld [vmem:[%s7687_s14 + $0x24c] sm:$0xf]  ;;  %v6068_v13 = vld [vmem:[%s7687_s14 + $0x258] sm:$0xf0] }
 0x47e   : > { %v3601_v35 = vadd.f32 %v3600_v29, %v3431_v28  ;;  %v2315_v28 = vld [vmem:[#allocation4 + $0x60] sm:$0xff] }
 0x47f   : > { %v3936_v33 = vadd.f32 %v3935_v24, %v3767_v27  ;;  %3470 = vmatmul.bf16.gmra.mxu0 %v5995_v25  ;;  %v6039_v27 = vor.u32 %v6651_v16, %v6036_v17 }
 0x480   : > { %3639 = vmatmul.bf16.gmra.mxu1 %v5999_v26  ;;  %v6035_v26 = vor.u32 %v6653_v15, %v6034_v14 }
 0x481   : > { %v4079_v34 = vadd.f32 %v3936_v33, %v2311_v32  ;;  %3808 = vmatmul.bf16.gmra.mxu2 %v6003_v30 }
 0x482   : > { %3977 = vmatmul.bf16.gmra.mxu3 %v6007_v31 }
 0x483   : > { %4143 = vst [vmem:[#allocation4 + $0x98] sm:$0xff] %v4079_v34 }
 0x484   : > { %v3769_v36 = vpop.f32.mrf.mxu2  ;;  %v3433_v39 = vpop.f32.mrf.mxu0 }
 0x485   : > { %v3938_v37 = vpop.f32.mrf.mxu3  ;;  %v3770_v38 = vadd.f32 %v3769_v36, %v3601_v35  ;;  %v3602_v40 = vpop.f32.mrf.mxu1 }
 0x486   : > { %v3603_v52 = vadd.f32 %v3602_v40, %v3433_v39  ;;  %v6042_v39 = vld [vmem:[%s7687_s14 + $0x220] sm:$0xf]  ;;  %v6656_v40 = vld [vmem:[%s7687_s14 + $0x22c] sm:$0xf0] }
 0x487   : > { %v3939_v42 = vadd.f32 %v3938_v37, %v3770_v38  ;;  %v2316_v37 = vld [vmem:[#allocation4 + $0xe0] sm:$0xff]  ;;  %v6043_v51 = vor.u32 %v6656_v40, %v6042_v39  ;;  %v6076_v39 = vld [vmem:[%s7687_s14 + $0x270] sm:$0xf0]  ;;  %v6082_v40 = vld [vmem:[%s7687_s14 + $0x268] sm:$0xf] }
 0x489   : > { %v4080_v45 = vadd.f32 %v3939_v42, %v2312_v41  ;;  %v6654_v42 = vld [vmem:[%s7687_s14 + $0x224] sm:$0xf] }
 0x48b   : > { %4144 = vst [vmem:[#allocation4 + $0x120] sm:$0xff] %v4080_v45  ;;  %v6657_v45 = vld [vmem:[%s7687_s14 + $0x234] sm:$0xf0] }
 0x48c   : > { %v3771_v53 = vpop.f32.mrf.mxu2  ;;  %v3436_v58 = vpop.f32.mrf.mxu0 }
 0x48d   : > { %v3940_v54 = vpop.f32.mrf.mxu3  ;;  %v3772_v57 = vadd.f32 %v3771_v53, %v3603_v52  ;;  %v3605_v59 = vpop.f32.mrf.mxu1  ;;  %v6047_v52 = vor.u32 %v6654_v42, %v6044_v43  ;;  %v6663_v42 = vld [vmem:[%s7687_s14 + $0x26c] sm:$0xf]  ;;  %v6084_v43 = vld [vmem:[%s7687_s14 + $0x278] sm:$0xf0] }
 0x48e   : > { %v3606_v1 = vadd.f32 %v3605_v59, %v3436_v58  ;;  %v2317_v58 = vld [vmem:[#allocation4 + $0x188] sm:$0xff] }
 0x48f   : > { %v3941_v63 = vadd.f32 %v3940_v54, %v3772_v57  ;;  %3475 = vmatmul.bf16.gmra.mxu0 %v6011_v55  ;;  %v6055_v57 = vor.u32 %v6655_v46, %v6052_v47 }
 0x490   : > { %3644 = vmatmul.bf16.gmra.mxu1 %v6015_v56  ;;  %v6051_v56 = vor.u32 %v6657_v45, %v6050_v44 }
 0x491   : > { %v4081_v0 = vadd.f32 %v3941_v63, %v2313_v62  ;;  %3813 = vmatmul.bf16.gmra.mxu2 %v6019_v60 }
 0x492   : > { %3982 = vmatmul.bf16.gmra.mxu3 %v6023_v61 }
 0x493   : > { %4145 = vst [vmem:[#allocation4 + $0x150] sm:$0xff] %v4081_v0 }
 0x494   : > { %v3774_v2 = vpop.f32.mrf.mxu2  ;;  %v3438_v5 = vpop.f32.mrf.mxu0 }
 0x495   : > { %v3943_v3 = vpop.f32.mrf.mxu3  ;;  %v3775_v4 = vadd.f32 %v3774_v2, %v3606_v1  ;;  %v3607_v6 = vpop.f32.mrf.mxu1 }
 0x496   : > { %v3608_v18 = vadd.f32 %v3607_v6, %v3438_v5  ;;  %v6058_v5 = vld [vmem:[%s7687_s14 + $0x240] sm:$0xf]  ;;  %v6660_v6 = vld [vmem:[%s7687_s14 + $0x24c] sm:$0xf0] }
 0x497   : > { %v3944_v8 = vadd.f32 %v3943_v3, %v3775_v4  ;;  %v2318_v3 = vld [vmem:[#allocation4 + $0x138] sm:$0xff]  ;;  %v6059_v17 = vor.u32 %v6660_v6, %v6058_v5  ;;  %v6092_v5 = vld [vmem:[%s7687_s14 + $0x290] sm:$0xf0]  ;;  %v6098_v6 = vld [vmem:[%s7687_s14 + $0x288] sm:$0xf] }
 0x499   : > { %v4082_v11 = vadd.f32 %v3944_v8, %v2314_v7  ;;  %v6658_v8 = vld [vmem:[%s7687_s14 + $0x244] sm:$0xf] }
 0x49b   : > { %4146 = vst [vmem:[#allocation4 + $0x108] sm:$0xff] %v4082_v11  ;;  %v6661_v11 = vld [vmem:[%s7687_s14 + $0x254] sm:$0xf0] }
 0x49c   : > { %v3776_v19 = vpop.f32.mrf.mxu2  ;;  %v3441_v24 = vpop.f32.mrf.mxu0 }
 0x49d   : > { %v3945_v20 = vpop.f32.mrf.mxu3  ;;  %v3777_v23 = vadd.f32 %v3776_v19, %v3608_v18  ;;  %v3610_v25 = vpop.f32.mrf.mxu1  ;;  %v6063_v18 = vor.u32 %v6658_v8, %v6060_v9  ;;  %v6667_v8 = vld [vmem:[%s7687_s14 + $0x28c] sm:$0xf]  ;;  %v6100_v9 = vld [vmem:[%s7687_s14 + $0x298] sm:$0xf0] }
 0x49e   : > { %v3611_v31 = vadd.f32 %v3610_v25, %v3441_v24  ;;  %v2319_v24 = vld [vmem:[#allocation4 + $0x140] sm:$0xff] }
 0x49f   : > { %v3946_v29 = vadd.f32 %v3945_v20, %v3777_v23  ;;  %3480 = vmatmul.bf16.gmra.mxu0 %v6027_v21  ;;  %v6071_v23 = vor.u32 %v6659_v12, %v6068_v13 }
 0x4a0   : > { %3649 = vmatmul.bf16.gmra.mxu1 %v6031_v22  ;;  %v6067_v22 = vor.u32 %v6661_v11, %v6066_v10 }
 0x4a1   : > { %v4083_v30 = vadd.f32 %v3946_v29, %v2315_v28  ;;  %3818 = vmatmul.bf16.gmra.mxu2 %v6035_v26 }
 0x4a2   : > { %3987 = vmatmul.bf16.gmra.mxu3 %v6039_v27 }
 0x4a3   : > { %4147 = vst [vmem:[#allocation4 + $0x60] sm:$0xff] %v4083_v30 }
 0x4a4   : > { %v3779_v32 = vpop.f32.mrf.mxu2  ;;  %v3443_v35 = vpop.f32.mrf.mxu0 }
 0x4a5   : > { %v3948_v33 = vpop.f32.mrf.mxu3  ;;  %v3780_v34 = vadd.f32 %v3779_v32, %v3611_v31  ;;  %v3612_v36 = vpop.f32.mrf.mxu1 }
 0x4a6   : > { %v3613_v48 = vadd.f32 %v3612_v36, %v3443_v35  ;;  %v6074_v35 = vld [vmem:[%s7687_s14 + $0x260] sm:$0xf]  ;;  %v6664_v36 = vld [vmem:[%s7687_s14 + $0x26c] sm:$0xf0] }
 0x4a7   : > { %v3949_v38 = vadd.f32 %v3948_v33, %v3780_v34  ;;  %v2320_v33 = vld [vmem:[#allocation4 + $0x80] sm:$0xff]  ;;  %v6075_v47 = vor.u32 %v6664_v36, %v6074_v35  ;;  %v6108_v35 = vld [vmem:[%s7687_s14 + $0x2b0] sm:$0xf0]  ;;  %v6114_v36 = vld [vmem:[%s7687_s14 + $0x2a8] sm:$0xf] }
 0x4a9   : > { %v4084_v41 = vadd.f32 %v3949_v38, %v2316_v37  ;;  %v6662_v38 = vld [vmem:[%s7687_s14 + $0x264] sm:$0xf] }
 0x4ab   : > { %4148 = vst [vmem:[#allocation4 + $0xe0] sm:$0xff] %v4084_v41  ;;  %v6665_v41 = vld [vmem:[%s7687_s14 + $0x274] sm:$0xf0] }
 0x4ac   : > { %v3781_v49 = vpop.f32.mrf.mxu2  ;;  %v3446_v54 = vpop.f32.mrf.mxu0 }
 0x4ad   : > { %v3950_v50 = vpop.f32.mrf.mxu3  ;;  %v3782_v53 = vadd.f32 %v3781_v49, %v3613_v48  ;;  %v3615_v55 = vpop.f32.mrf.mxu1  ;;  %v6079_v48 = vor.u32 %v6662_v38, %v6076_v39  ;;  %v6671_v38 = vld [vmem:[%s7687_s14 + $0x2ac] sm:$0xf]  ;;  %v6116_v39 = vld [vmem:[%s7687_s14 + $0x2b8] sm:$0xf0] }
 0x4ae   : > { %v3616_v61 = vadd.f32 %v3615_v55, %v3446_v54  ;;  %v2321_v54 = vld [vmem:[#allocation4 + $0x1a8] sm:$0xff] }
 0x4af   : > { %v3951_v59 = vadd.f32 %v3950_v50, %v3782_v53  ;;  %3485 = vmatmul.bf16.gmra.mxu0 %v6043_v51  ;;  %v6087_v53 = vor.u32 %v6663_v42, %v6084_v43 }
 0x4b0   : > { %3654 = vmatmul.bf16.gmra.mxu1 %v6047_v52  ;;  %v6083_v52 = vor.u32 %v6665_v41, %v6082_v40 }
 0x4b1   : > { %v4085_v60 = vadd.f32 %v3951_v59, %v2317_v58  ;;  %3823 = vmatmul.bf16.gmra.mxu2 %v6051_v56 }
 0x4b2   : > { %3992 = vmatmul.bf16.gmra.mxu3 %v6055_v57 }
 0x4b3   : > { %4149 = vst [vmem:[#allocation4 + $0x188] sm:$0xff] %v4085_v60 }
 0x4b4   : > { %v3784_v62 = vpop.f32.mrf.mxu2  ;;  %v3448_v1 = vpop.f32.mrf.mxu0 }
 0x4b5   : > { %v3953_v63 = vpop.f32.mrf.mxu3  ;;  %v3785_v0 = vadd.f32 %v3784_v62, %v3616_v61  ;;  %v3617_v2 = vpop.f32.mrf.mxu1 }
 0x4b6   : > { %v3618_v14 = vadd.f32 %v3617_v2, %v3448_v1  ;;  %v6090_v1 = vld [vmem:[%s7687_s14 + $0x280] sm:$0xf]  ;;  %v6668_v2 = vld [vmem:[%s7687_s14 + $0x28c] sm:$0xf0] }
 0x4b7   : > { %v3954_v4 = vadd.f32 %v3953_v63, %v3785_v0  ;;  %v2322_v63 = vld [vmem:[#allocation4 + $0x1b8] sm:$0xff]  ;;  %v6091_v13 = vor.u32 %v6668_v2, %v6090_v1  ;;  %v6124_v1 = vld [vmem:[%s7687_s14 + $0x2d0] sm:$0xf0]  ;;  %v6130_v2 = vld [vmem:[%s7687_s14 + $0x2c8] sm:$0xf] }
 0x4b9   : > { %v4086_v7 = vadd.f32 %v3954_v4, %v2318_v3  ;;  %v6666_v4 = vld [vmem:[%s7687_s14 + $0x284] sm:$0xf] }
 0x4bb   : > { %4150 = vst [vmem:[#allocation4 + $0x138] sm:$0xff] %v4086_v7  ;;  %v6669_v7 = vld [vmem:[%s7687_s14 + $0x294] sm:$0xf0] }
 0x4bc   : > { %v3786_v15 = vpop.f32.mrf.mxu2  ;;  %v3451_v20 = vpop.f32.mrf.mxu0 }
 0x4bd   : > { %v3955_v16 = vpop.f32.mrf.mxu3  ;;  %v3787_v19 = vadd.f32 %v3786_v15, %v3618_v14  ;;  %v3620_v21 = vpop.f32.mrf.mxu1  ;;  %v6095_v14 = vor.u32 %v6666_v4, %v6092_v5  ;;  %v6675_v4 = vld [vmem:[%s7687_s14 + $0x2cc] sm:$0xf]  ;;  %v6132_v5 = vld [vmem:[%s7687_s14 + $0x2d8] sm:$0xf0] }
 0x4be   : > { %v3621_v27 = vadd.f32 %v3620_v21, %v3451_v20  ;;  %v2323_v20 = vld [vmem:[#allocation4 + $0x28] sm:$0xff] }
 0x4bf   : > { %v3956_v25 = vadd.f32 %v3955_v16, %v3787_v19  ;;  %3490 = vmatmul.bf16.gmra.mxu0 %v6059_v17  ;;  %v6103_v19 = vor.u32 %v6667_v8, %v6100_v9 }
 0x4c0   : > { %3659 = vmatmul.bf16.gmra.mxu1 %v6063_v18  ;;  %v6099_v18 = vor.u32 %v6669_v7, %v6098_v6 }
 0x4c1   : > { %v4087_v26 = vadd.f32 %v3956_v25, %v2319_v24  ;;  %3828 = vmatmul.bf16.gmra.mxu2 %v6067_v22 }
 0x4c2   : > { %3997 = vmatmul.bf16.gmra.mxu3 %v6071_v23 }
 0x4c3   : > { %4151 = vst [vmem:[#allocation4 + $0x140] sm:$0xff] %v4087_v26 }
 0x4c4   : > { %v3789_v28 = vpop.f32.mrf.mxu2  ;;  %v3453_v31 = vpop.f32.mrf.mxu0 }
 0x4c5   : > { %v3958_v29 = vpop.f32.mrf.mxu3  ;;  %v3790_v30 = vadd.f32 %v3789_v28, %v3621_v27  ;;  %v3622_v32 = vpop.f32.mrf.mxu1 }
 0x4c6   : > { %v3623_v44 = vadd.f32 %v3622_v32, %v3453_v31  ;;  %v6106_v31 = vld [vmem:[%s7687_s14 + $0x2a0] sm:$0xf]  ;;  %v6672_v32 = vld [vmem:[%s7687_s14 + $0x2ac] sm:$0xf0] }
 0x4c7   : > { %v3959_v34 = vadd.f32 %v3958_v29, %v3790_v30  ;;  %v2324_v29 = vld [vmem:[#allocation4 + $0x1e8] sm:$0xff]  ;;  %v6107_v43 = vor.u32 %v6672_v32, %v6106_v31  ;;  %v6140_v31 = vld [vmem:[%s7687_s14 + $0x2f0] sm:$0xf0] }
 0x4c8   : > { %v6146_v32 = vld [vmem:[%s7687_s14 + $0x2e8] sm:$0xf] }
 0x4c9   : > { %v4088_v37 = vadd.f32 %v3959_v34, %v2320_v33  ;;  %v6670_v34 = vld [vmem:[%s7687_s14 + $0x2a4] sm:$0xf] }
 0x4cb   : > { %4152 = vst [vmem:[#allocation4 + $0x80] sm:$0xff] %v4088_v37  ;;  %v6673_v37 = vld [vmem:[%s7687_s14 + $0x2b4] sm:$0xf0] }
 0x4cc   : > { %v3791_v45 = vpop.f32.mrf.mxu2  ;;  %v3456_v50 = vpop.f32.mrf.mxu0 }
 0x4cd   : > { %v3960_v46 = vpop.f32.mrf.mxu3  ;;  %v3792_v49 = vadd.f32 %v3791_v45, %v3623_v44  ;;  %v3625_v51 = vpop.f32.mrf.mxu1  ;;  %v6111_v44 = vor.u32 %v6670_v34, %v6108_v35  ;;  %v6679_v34 = vld [vmem:[%s7687_s14 + $0x2ec] sm:$0xf]  ;;  %v6148_v35 = vld [vmem:[%s7687_s14 + $0x2f8] sm:$0xf0] }
 0x4ce   : > { %v3626_v57 = vadd.f32 %v3625_v51, %v3456_v50  ;;  %v2325_v50 = vld [vmem:[#allocation4 + $0xf8] sm:$0xff] }
 0x4cf   : > { %v3961_v55 = vadd.f32 %v3960_v46, %v3792_v49  ;;  %3495 = vmatmul.bf16.gmra.mxu0 %v6075_v47  ;;  %v6119_v49 = vor.u32 %v6671_v38, %v6116_v39 }
 0x4d0   : > { %3664 = vmatmul.bf16.gmra.mxu1 %v6079_v48  ;;  %v6115_v48 = vor.u32 %v6673_v37, %v6114_v36 }
 0x4d1   : > { %v4089_v56 = vadd.f32 %v3961_v55, %v2321_v54  ;;  %3833 = vmatmul.bf16.gmra.mxu2 %v6083_v52 }
 0x4d2   : > { %4002 = vmatmul.bf16.gmra.mxu3 %v6087_v53 }
 0x4d3   : > { %4153 = vst [vmem:[#allocation4 + $0x1a8] sm:$0xff] %v4089_v56 }
 0x4d4   : > { %v3794_v58 = vpop.f32.mrf.mxu2  ;;  %v3458_v61 = vpop.f32.mrf.mxu0 }
 0x4d5   : > { %v3963_v59 = vpop.f32.mrf.mxu3  ;;  %v3795_v60 = vadd.f32 %v3794_v58, %v3626_v57  ;;  %v3627_v62 = vpop.f32.mrf.mxu1 }
 0x4d6   : > { %v3628_v10 = vadd.f32 %v3627_v62, %v3458_v61  ;;  %v6122_v61 = vld [vmem:[%s7687_s14 + $0x2c0] sm:$0xf]  ;;  %v6676_v62 = vld [vmem:[%s7687_s14 + $0x2cc] sm:$0xf0] }
 0x4d7   : > { %v3964_v0 = vadd.f32 %v3963_v59, %v3795_v60  ;;  %v2326_v59 = vld [vmem:[#allocation4 + $0x160] sm:$0xff]  ;;  %v6123_v9 = vor.u32 %v6676_v62, %v6122_v61  ;;  %v6156_v61 = vld [vmem:[%s7687_s14 + $0x310] sm:$0xf0]  ;;  %v6162_v62 = vld [vmem:[%s7687_s14 + $0x308] sm:$0xf] }
 0x4d9   : > { %v4090_v3 = vadd.f32 %v3964_v0, %v2322_v63  ;;  %v6674_v0 = vld [vmem:[%s7687_s14 + $0x2c4] sm:$0xf] }
 0x4db   : > { %4154 = vst [vmem:[#allocation4 + $0x1b8] sm:$0xff] %v4090_v3  ;;  %v6677_v3 = vld [vmem:[%s7687_s14 + $0x2d4] sm:$0xf0] }
 0x4dc   : > { %v3796_v11 = vpop.f32.mrf.mxu2  ;;  %v3461_v16 = vpop.f32.mrf.mxu0 }
 0x4dd   : > { %v3965_v12 = vpop.f32.mrf.mxu3  ;;  %v3797_v15 = vadd.f32 %v3796_v11, %v3628_v10  ;;  %v3630_v17 = vpop.f32.mrf.mxu1  ;;  %v6127_v10 = vor.u32 %v6674_v0, %v6124_v1  ;;  %v6683_v0 = vld [vmem:[%s7687_s14 + $0x30c] sm:$0xf]  ;;  %v6164_v1 = vld [vmem:[%s7687_s14 + $0x318] sm:$0xf0] }
 0x4de   : > { %v3631_v23 = vadd.f32 %v3630_v17, %v3461_v16  ;;  %v2327_v16 = vld [vmem:[#allocation4 + $0x30] sm:$0xff] }
 0x4df   : > { %v3966_v21 = vadd.f32 %v3965_v12, %v3797_v15  ;;  %3500 = vmatmul.bf16.gmra.mxu0 %v6091_v13  ;;  %v6135_v15 = vor.u32 %v6675_v4, %v6132_v5 }
 0x4e0   : > { %3669 = vmatmul.bf16.gmra.mxu1 %v6095_v14  ;;  %v6131_v14 = vor.u32 %v6677_v3, %v6130_v2 }
 0x4e1   : > { %v4091_v22 = vadd.f32 %v3966_v21, %v2323_v20  ;;  %3838 = vmatmul.bf16.gmra.mxu2 %v6099_v18 }
 0x4e2   : > { %4007 = vmatmul.bf16.gmra.mxu3 %v6103_v19 }
 0x4e3   : > { %4155 = vst [vmem:[#allocation4 + $0x28] sm:$0xff] %v4091_v22 }
 0x4e4   : > { %v3799_v24 = vpop.f32.mrf.mxu2  ;;  %v3463_v27 = vpop.f32.mrf.mxu0 }
 0x4e5   : > { %v3968_v25 = vpop.f32.mrf.mxu3  ;;  %v3800_v26 = vadd.f32 %v3799_v24, %v3631_v23  ;;  %v3632_v28 = vpop.f32.mrf.mxu1 }
 0x4e6   : > { %v3633_v40 = vadd.f32 %v3632_v28, %v3463_v27  ;;  %v6138_v27 = vld [vmem:[%s7687_s14 + $0x2e0] sm:$0xf]  ;;  %v6680_v28 = vld [vmem:[%s7687_s14 + $0x2ec] sm:$0xf0] }
 0x4e7   : > { %v3969_v30 = vadd.f32 %v3968_v25, %v3800_v26  ;;  %v2328_v25 = vld [vmem:[#allocation4 + $0x1e0] sm:$0xff]  ;;  %v6139_v39 = vor.u32 %v6680_v28, %v6138_v27  ;;  %v6172_v27 = vld [vmem:[%s7687_s14 + $0x330] sm:$0xf0]  ;;  %v6178_v28 = vld [vmem:[%s7687_s14 + $0x328] sm:$0xf] }
 0x4e9   : > { %v4092_v33 = vadd.f32 %v3969_v30, %v2324_v29  ;;  %v6678_v30 = vld [vmem:[%s7687_s14 + $0x2e4] sm:$0xf] }
 0x4eb   : > { %4156 = vst [vmem:[#allocation4 + $0x1e8] sm:$0xff] %v4092_v33  ;;  %v6681_v33 = vld [vmem:[%s7687_s14 + $0x2f4] sm:$0xf0] }
 0x4ec   : > { %v3801_v41 = vpop.f32.mrf.mxu2  ;;  %v3466_v46 = vpop.f32.mrf.mxu0 }
 0x4ed   : > { %v3970_v42 = vpop.f32.mrf.mxu3  ;;  %v3802_v45 = vadd.f32 %v3801_v41, %v3633_v40  ;;  %v3635_v47 = vpop.f32.mrf.mxu1  ;;  %v6143_v40 = vor.u32 %v6678_v30, %v6140_v31  ;;  %v6687_v30 = vld [vmem:[%s7687_s14 + $0x32c] sm:$0xf]  ;;  %v6180_v31 = vld [vmem:[%s7687_s14 + $0x338] sm:$0xf0] }
 0x4ee   : > { %v3636_v53 = vadd.f32 %v3635_v47, %v3466_v46  ;;  %v2329_v46 = vld [vmem:[#allocation4] sm:$0xff] }
 0x4ef   : > { %v3971_v51 = vadd.f32 %v3970_v42, %v3802_v45  ;;  %3505 = vmatmul.bf16.gmra.mxu0 %v6107_v43  ;;  %v6151_v45 = vor.u32 %v6679_v34, %v6148_v35 }
 0x4f0   : > { %3674 = vmatmul.bf16.gmra.mxu1 %v6111_v44  ;;  %v6147_v44 = vor.u32 %v6681_v33, %v6146_v32 }
 0x4f1   : > { %v4093_v52 = vadd.f32 %v3971_v51, %v2325_v50  ;;  %3843 = vmatmul.bf16.gmra.mxu2 %v6115_v48 }
 0x4f2   : > { %4012 = vmatmul.bf16.gmra.mxu3 %v6119_v49 }
 0x4f3   : > { %4157 = vst [vmem:[#allocation4 + $0xf8] sm:$0xff] %v4093_v52 }
 0x4f4   : > { %v3804_v54 = vpop.f32.mrf.mxu2  ;;  %v3468_v57 = vpop.f32.mrf.mxu0 }
 0x4f5   : > { %v3973_v55 = vpop.f32.mrf.mxu3  ;;  %v3805_v56 = vadd.f32 %v3804_v54, %v3636_v53  ;;  %v3637_v58 = vpop.f32.mrf.mxu1 }
 0x4f6   : > { %v3638_v6 = vadd.f32 %v3637_v58, %v3468_v57  ;;  %v6154_v57 = vld [vmem:[%s7687_s14 + $0x300] sm:$0xf]  ;;  %v6684_v58 = vld [vmem:[%s7687_s14 + $0x30c] sm:$0xf0] }
 0x4f7   : > { %v3974_v60 = vadd.f32 %v3973_v55, %v3805_v56  ;;  %v2330_v55 = vld [vmem:[#allocation4 + $0xf0] sm:$0xff]  ;;  %v6155_v5 = vor.u32 %v6684_v58, %v6154_v57  ;;  %v6194_v58 = vld [vmem:[%s7687_s14 + $0x348] sm:$0xf] }
 0x4f8   : > { %v6188_v57 = vld [vmem:[%s7687_s14 + $0x350] sm:$0xf0] }
 0x4f9   : > { %v4094_v63 = vadd.f32 %v3974_v60, %v2326_v59  ;;  %v6682_v60 = vld [vmem:[%s7687_s14 + $0x304] sm:$0xf] }
 0x4fb   : > { %4158 = vst [vmem:[#allocation4 + $0x160] sm:$0xff] %v4094_v63  ;;  %v6685_v63 = vld [vmem:[%s7687_s14 + $0x314] sm:$0xf0] }
 0x4fc   : > { %v3806_v7 = vpop.f32.mrf.mxu2  ;;  %v3471_v12 = vpop.f32.mrf.mxu0 }
 0x4fd   : > { %v3975_v8 = vpop.f32.mrf.mxu3  ;;  %v3807_v11 = vadd.f32 %v3806_v7, %v3638_v6  ;;  %v3640_v13 = vpop.f32.mrf.mxu1  ;;  %v6159_v6 = vor.u32 %v6682_v60, %v6156_v61  ;;  %v6691_v60 = vld [vmem:[%s7687_s14 + $0x34c] sm:$0xf]  ;;  %v6196_v61 = vld [vmem:[%s7687_s14 + $0x358] sm:$0xf0] }
 0x4fe   : > { %v3641_v19 = vadd.f32 %v3640_v13, %v3471_v12  ;;  %v2331_v12 = vld [vmem:[#allocation4 + $0x8] sm:$0xff] }
 0x4ff   : > { %v3976_v17 = vadd.f32 %v3975_v8, %v3807_v11  ;;  %3510 = vmatmul.bf16.gmra.mxu0 %v6123_v9  ;;  %v6167_v11 = vor.u32 %v6683_v0, %v6164_v1 }
 0x500   : > { %3679 = vmatmul.bf16.gmra.mxu1 %v6127_v10  ;;  %v6163_v10 = vor.u32 %v6685_v63, %v6162_v62 }
 0x501   : > { %v4095_v18 = vadd.f32 %v3976_v17, %v2327_v16  ;;  %3848 = vmatmul.bf16.gmra.mxu2 %v6131_v14 }
 0x502   : > { %4017 = vmatmul.bf16.gmra.mxu3 %v6135_v15 }
 0x503   : > { %4159 = vst [vmem:[#allocation4 + $0x30] sm:$0xff] %v4095_v18 }
 0x504   : > { %v3809_v20 = vpop.f32.mrf.mxu2  ;;  %v3473_v23 = vpop.f32.mrf.mxu0 }
 0x505   : > { %v3978_v21 = vpop.f32.mrf.mxu3  ;;  %v3810_v22 = vadd.f32 %v3809_v20, %v3641_v19  ;;  %v3642_v24 = vpop.f32.mrf.mxu1 }
 0x506   : > { %v3643_v36 = vadd.f32 %v3642_v24, %v3473_v23  ;;  %v6170_v23 = vld [vmem:[%s7687_s14 + $0x320] sm:$0xf]  ;;  %v6688_v24 = vld [vmem:[%s7687_s14 + $0x32c] sm:$0xf0] }
 0x507   : > { %v3979_v26 = vadd.f32 %v3978_v21, %v3810_v22  ;;  %v2332_v21 = vld [vmem:[#allocation4 + $0x148] sm:$0xff]  ;;  %v6171_v35 = vor.u32 %v6688_v24, %v6170_v23  ;;  %v6204_v23 = vld [vmem:[%s7687_s14 + $0x370] sm:$0xf0] }
 0x508   : > { %v6210_v24 = vld [vmem:[%s7687_s14 + $0x368] sm:$0xf] }
 0x509   : > { %v4096_v29 = vadd.f32 %v3979_v26, %v2328_v25  ;;  %v6686_v26 = vld [vmem:[%s7687_s14 + $0x324] sm:$0xf] }
 0x50b   : > { %4160 = vst [vmem:[#allocation4 + $0x1e0] sm:$0xff] %v4096_v29  ;;  %v6689_v29 = vld [vmem:[%s7687_s14 + $0x334] sm:$0xf0] }
 0x50c   : > { %v3811_v37 = vpop.f32.mrf.mxu2  ;;  %v3476_v42 = vpop.f32.mrf.mxu0 }
 0x50d   : > { %v3980_v38 = vpop.f32.mrf.mxu3  ;;  %v3812_v41 = vadd.f32 %v3811_v37, %v3643_v36  ;;  %v3645_v43 = vpop.f32.mrf.mxu1  ;;  %v6175_v36 = vor.u32 %v6686_v26, %v6172_v27  ;;  %v6695_v26 = vld [vmem:[%s7687_s14 + $0x36c] sm:$0xf]  ;;  %v6212_v27 = vld [vmem:[%s7687_s14 + $0x378] sm:$0xf0] }
 0x50e   : > { %v3646_v49 = vadd.f32 %v3645_v43, %v3476_v42  ;;  %v2333_v42 = vld [vmem:[#allocation4 + $0x1d0] sm:$0xff] }
 0x50f   : > { %v3981_v47 = vadd.f32 %v3980_v38, %v3812_v41  ;;  %3515 = vmatmul.bf16.gmra.mxu0 %v6139_v39  ;;  %v6183_v41 = vor.u32 %v6687_v30, %v6180_v31 }
 0x510   : > { %3684 = vmatmul.bf16.gmra.mxu1 %v6143_v40  ;;  %v6179_v40 = vor.u32 %v6689_v29, %v6178_v28 }
 0x511   : > { %v4097_v48 = vadd.f32 %v3981_v47, %v2329_v46  ;;  %3853 = vmatmul.bf16.gmra.mxu2 %v6147_v44 }
 0x512   : > { %4022 = vmatmul.bf16.gmra.mxu3 %v6151_v45 }
 0x513   : > { %4161 = vst [vmem:[#allocation4] sm:$0xff] %v4097_v48 }
 0x514   : > { %v3814_v50 = vpop.f32.mrf.mxu2  ;;  %v3478_v53 = vpop.f32.mrf.mxu0 }
 0x515   : > { %v3983_v51 = vpop.f32.mrf.mxu3  ;;  %v3815_v52 = vadd.f32 %v3814_v50, %v3646_v49  ;;  %v3647_v54 = vpop.f32.mrf.mxu1 }
 0x516   : > { %v3648_v2 = vadd.f32 %v3647_v54, %v3478_v53  ;;  %v6186_v53 = vld [vmem:[%s7687_s14 + $0x340] sm:$0xf]  ;;  %v6692_v54 = vld [vmem:[%s7687_s14 + $0x34c] sm:$0xf0] }
 0x517   : > { %v3984_v56 = vadd.f32 %v3983_v51, %v3815_v52  ;;  %v2334_v51 = vld [vmem:[#allocation4 + $0x100] sm:$0xff]  ;;  %v6187_v1 = vor.u32 %v6692_v54, %v6186_v53  ;;  %v6220_v53 = vld [vmem:[%s7687_s14 + $0x390] sm:$0xf0]  ;;  %v6226_v54 = vld [vmem:[%s7687_s14 + $0x388] sm:$0xf] }
 0x519   : > { %v4098_v59 = vadd.f32 %v3984_v56, %v2330_v55  ;;  %v6690_v56 = vld [vmem:[%s7687_s14 + $0x344] sm:$0xf] }
 0x51b   : > { %4162 = vst [vmem:[#allocation4 + $0xf0] sm:$0xff] %v4098_v59  ;;  %v6693_v59 = vld [vmem:[%s7687_s14 + $0x354] sm:$0xf0] }
 0x51c   : > { %v3816_v3 = vpop.f32.mrf.mxu2  ;;  %v3481_v8 = vpop.f32.mrf.mxu0 }
 0x51d   : > { %v3985_v4 = vpop.f32.mrf.mxu3  ;;  %v3817_v7 = vadd.f32 %v3816_v3, %v3648_v2  ;;  %v3650_v9 = vpop.f32.mrf.mxu1  ;;  %v6191_v2 = vor.u32 %v6690_v56, %v6188_v57  ;;  %v6699_v56 = vld [vmem:[%s7687_s14 + $0x38c] sm:$0xf]  ;;  %v6228_v57 = vld [vmem:[%s7687_s14 + $0x398] sm:$0xf0] }
 0x51e   : > { %v3651_v15 = vadd.f32 %v3650_v9, %v3481_v8  ;;  %v2335_v8 = vld [vmem:[#allocation4 + $0xc8] sm:$0xff] }
 0x51f   : > { %v3986_v13 = vadd.f32 %v3985_v4, %v3817_v7  ;;  %3520 = vmatmul.bf16.gmra.mxu0 %v6155_v5  ;;  %v6199_v7 = vor.u32 %v6691_v60, %v6196_v61 }
 0x520   : > { %3689 = vmatmul.bf16.gmra.mxu1 %v6159_v6  ;;  %v6195_v6 = vor.u32 %v6693_v59, %v6194_v58 }
 0x521   : > { %v4099_v14 = vadd.f32 %v3986_v13, %v2331_v12  ;;  %3858 = vmatmul.bf16.gmra.mxu2 %v6163_v10 }
 0x522   : > { %4027 = vmatmul.bf16.gmra.mxu3 %v6167_v11 }
 0x523   : > { %4163 = vst [vmem:[#allocation4 + $0x8] sm:$0xff] %v4099_v14 }
 0x524   : > { %v3819_v16 = vpop.f32.mrf.mxu2  ;;  %v3483_v19 = vpop.f32.mrf.mxu0 }
 0x525   : > { %v3988_v17 = vpop.f32.mrf.mxu3  ;;  %v3820_v18 = vadd.f32 %v3819_v16, %v3651_v15  ;;  %v3652_v20 = vpop.f32.mrf.mxu1 }
 0x526   : > { %v3653_v32 = vadd.f32 %v3652_v20, %v3483_v19  ;;  %v6202_v19 = vld [vmem:[%s7687_s14 + $0x360] sm:$0xf]  ;;  %v6696_v20 = vld [vmem:[%s7687_s14 + $0x36c] sm:$0xf0] }
 0x527   : > { %v3989_v22 = vadd.f32 %v3988_v17, %v3820_v18  ;;  %v2336_v17 = vld [vmem:[#allocation4 + $0x40] sm:$0xff]  ;;  %v6203_v31 = vor.u32 %v6696_v20, %v6202_v19  ;;  %v6236_v19 = vld [vmem:[%s7687_s14 + $0x3b0] sm:$0xf0]  ;;  %v6242_v20 = vld [vmem:[%s7687_s14 + $0x3a8] sm:$0xf] }
 0x529   : > { %v4100_v25 = vadd.f32 %v3989_v22, %v2332_v21  ;;  %v6694_v22 = vld [vmem:[%s7687_s14 + $0x364] sm:$0xf] }
 0x52b   : > { %4164 = vst [vmem:[#allocation4 + $0x148] sm:$0xff] %v4100_v25  ;;  %v6697_v25 = vld [vmem:[%s7687_s14 + $0x374] sm:$0xf0] }
 0x52c   : > { %v3821_v33 = vpop.f32.mrf.mxu2  ;;  %v3486_v38 = vpop.f32.mrf.mxu0 }
 0x52d   : > { %v3990_v34 = vpop.f32.mrf.mxu3  ;;  %v3822_v37 = vadd.f32 %v3821_v33, %v3653_v32  ;;  %v3655_v39 = vpop.f32.mrf.mxu1  ;;  %v6207_v32 = vor.u32 %v6694_v22, %v6204_v23  ;;  %v6703_v22 = vld [vmem:[%s7687_s14 + $0x3ac] sm:$0xf]  ;;  %v6244_v23 = vld [vmem:[%s7687_s14 + $0x3b8] sm:$0xf0] }
 0x52e   : > { %v3656_v45 = vadd.f32 %v3655_v39, %v3486_v38  ;;  %v2337_v38 = vld [vmem:[#allocation4 + $0x1f8] sm:$0xff] }
 0x52f   : > { %v3991_v43 = vadd.f32 %v3990_v34, %v3822_v37  ;;  %3525 = vmatmul.bf16.gmra.mxu0 %v6171_v35  ;;  %v6215_v37 = vor.u32 %v6695_v26, %v6212_v27 }
 0x530   : > { %3694 = vmatmul.bf16.gmra.mxu1 %v6175_v36  ;;  %v6211_v36 = vor.u32 %v6697_v25, %v6210_v24 }
 0x531   : > { %v4101_v44 = vadd.f32 %v3991_v43, %v2333_v42  ;;  %3863 = vmatmul.bf16.gmra.mxu2 %v6179_v40 }
 0x532   : > { %4032 = vmatmul.bf16.gmra.mxu3 %v6183_v41 }
 0x533   : > { %4165 = vst [vmem:[#allocation4 + $0x1d0] sm:$0xff] %v4101_v44 }
 0x534   : > { %v3824_v46 = vpop.f32.mrf.mxu2  ;;  %v3488_v49 = vpop.f32.mrf.mxu0 }
 0x535   : > { %v3993_v47 = vpop.f32.mrf.mxu3  ;;  %v3825_v48 = vadd.f32 %v3824_v46, %v3656_v45  ;;  %v3657_v50 = vpop.f32.mrf.mxu1 }
 0x536   : > { %v3658_v62 = vadd.f32 %v3657_v50, %v3488_v49  ;;  %v6218_v49 = vld [vmem:[%s7687_s14 + $0x380] sm:$0xf]  ;;  %v6700_v50 = vld [vmem:[%s7687_s14 + $0x38c] sm:$0xf0] }
 0x537   : > { %v3994_v52 = vadd.f32 %v3993_v47, %v3825_v48  ;;  %v2338_v47 = vld [vmem:[#allocation4 + $0x20] sm:$0xff]  ;;  %v6219_v61 = vor.u32 %v6700_v50, %v6218_v49  ;;  %v6252_v49 = vld [vmem:[%s7687_s14 + $0x3d0] sm:$0xf0]  ;;  %v6258_v50 = vld [vmem:[%s7687_s14 + $0x3c8] sm:$0xf] }
 0x539   : > { %v4102_v55 = vadd.f32 %v3994_v52, %v2334_v51  ;;  %v6698_v52 = vld [vmem:[%s7687_s14 + $0x384] sm:$0xf] }
 0x53b   : > { %4166 = vst [vmem:[#allocation4 + $0x100] sm:$0xff] %v4102_v55  ;;  %v6701_v55 = vld [vmem:[%s7687_s14 + $0x394] sm:$0xf0] }
 0x53c   : > { %v3826_v63 = vpop.f32.mrf.mxu2  ;;  %v3491_v4 = vpop.f32.mrf.mxu0 }
 0x53d   : > { %v3995_v0 = vpop.f32.mrf.mxu3  ;;  %v3827_v3 = vadd.f32 %v3826_v63, %v3658_v62  ;;  %v3660_v5 = vpop.f32.mrf.mxu1  ;;  %v6223_v62 = vor.u32 %v6698_v52, %v6220_v53  ;;  %v6707_v52 = vld [vmem:[%s7687_s14 + $0x3cc] sm:$0xf]  ;;  %v6260_v53 = vld [vmem:[%s7687_s14 + $0x3d8] sm:$0xf0] }
 0x53e   : > { %v3661_v11 = vadd.f32 %v3660_v5, %v3491_v4  ;;  %v2339_v4 = vld [vmem:[#allocation4 + $0x128] sm:$0xff] }
 0x53f   : > { %v3996_v9 = vadd.f32 %v3995_v0, %v3827_v3  ;;  %3530 = vmatmul.bf16.gmra.mxu0 %v6187_v1  ;;  %v6231_v3 = vor.u32 %v6699_v56, %v6228_v57 }
 0x540   : > { %3699 = vmatmul.bf16.gmra.mxu1 %v6191_v2  ;;  %v6227_v2 = vor.u32 %v6701_v55, %v6226_v54 }
 0x541   : > { %v4103_v10 = vadd.f32 %v3996_v9, %v2335_v8  ;;  %3868 = vmatmul.bf16.gmra.mxu2 %v6195_v6 }
 0x542   : > { %4037 = vmatmul.bf16.gmra.mxu3 %v6199_v7 }
 0x543   : > { %4167 = vst [vmem:[#allocation4 + $0xc8] sm:$0xff] %v4103_v10 }
 0x544   : > { %v3829_v12 = vpop.f32.mrf.mxu2  ;;  %v3493_v15 = vpop.f32.mrf.mxu0 }
 0x545   : > { %v3998_v13 = vpop.f32.mrf.mxu3  ;;  %v3830_v14 = vadd.f32 %v3829_v12, %v3661_v11  ;;  %v3662_v16 = vpop.f32.mrf.mxu1 }
 0x546   : > { %v3663_v28 = vadd.f32 %v3662_v16, %v3493_v15  ;;  %v6234_v15 = vld [vmem:[%s7687_s14 + $0x3a0] sm:$0xf]  ;;  %v6704_v16 = vld [vmem:[%s7687_s14 + $0x3ac] sm:$0xf0] }
 0x547   : > { %v3999_v18 = vadd.f32 %v3998_v13, %v3830_v14  ;;  %v2340_v13 = vld [vmem:[#allocation4 + $0x1a0] sm:$0xff]  ;;  %v6235_v27 = vor.u32 %v6704_v16, %v6234_v15  ;;  %v6268_v15 = vld [vmem:[%s7687_s14 + $0x3f0] sm:$0xf0]  ;;  %v6274_v16 = vld [vmem:[%s7687_s14 + $0x3e8] sm:$0xf] }
 0x549   : > { %v4104_v21 = vadd.f32 %v3999_v18, %v2336_v17  ;;  %v6702_v18 = vld [vmem:[%s7687_s14 + $0x3a4] sm:$0xf] }
 0x54b   : > { %4168 = vst [vmem:[#allocation4 + $0x40] sm:$0xff] %v4104_v21  ;;  %v6705_v21 = vld [vmem:[%s7687_s14 + $0x3b4] sm:$0xf0] }
 0x54c   : > { %v3831_v29 = vpop.f32.mrf.mxu2  ;;  %v3496_v34 = vpop.f32.mrf.mxu0 }
 0x54d   : > { %v4000_v30 = vpop.f32.mrf.mxu3  ;;  %v3832_v33 = vadd.f32 %v3831_v29, %v3663_v28  ;;  %v3665_v35 = vpop.f32.mrf.mxu1  ;;  %v6239_v28 = vor.u32 %v6702_v18, %v6236_v19  ;;  %v6711_v18 = vld [vmem:[%s7687_s14 + $0x3ec] sm:$0xf]  ;;  %v6276_v19 = vld [vmem:[%s7687_s14 + $0x3f8] sm:$0xf0] }
 0x54e   : > { %v3666_v41 = vadd.f32 %v3665_v35, %v3496_v34  ;;  %v2341_v34 = vld [vmem:[#allocation4 + $0x1f0] sm:$0xff] }
 0x54f   : > { %v4001_v39 = vadd.f32 %v4000_v30, %v3832_v33  ;;  %3535 = vmatmul.bf16.gmra.mxu0 %v6203_v31  ;;  %v6247_v33 = vor.u32 %v6703_v22, %v6244_v23 }
 0x550   : > { %3704 = vmatmul.bf16.gmra.mxu1 %v6207_v32  ;;  %v6243_v32 = vor.u32 %v6705_v21, %v6242_v20 }
 0x551   : > { %v4105_v40 = vadd.f32 %v4001_v39, %v2337_v38  ;;  %3873 = vmatmul.bf16.gmra.mxu2 %v6211_v36 }
 0x552   : > { %4042 = vmatmul.bf16.gmra.mxu3 %v6215_v37 }
 0x553   : > { %4169 = vst [vmem:[#allocation4 + $0x1f8] sm:$0xff] %v4105_v40 }
 0x554   : > { %v3834_v42 = vpop.f32.mrf.mxu2  ;;  %v3498_v45 = vpop.f32.mrf.mxu0 }
 0x555   : > { %v4003_v43 = vpop.f32.mrf.mxu3  ;;  %v3835_v44 = vadd.f32 %v3834_v42, %v3666_v41  ;;  %v3667_v46 = vpop.f32.mrf.mxu1 }
 0x556   : > { %v3668_v58 = vadd.f32 %v3667_v46, %v3498_v45  ;;  %v6250_v45 = vld [vmem:[%s7687_s14 + $0x3c0] sm:$0xf]  ;;  %v6708_v46 = vld [vmem:[%s7687_s14 + $0x3cc] sm:$0xf0] }
 0x557   : > { %v4004_v48 = vadd.f32 %v4003_v43, %v3835_v44  ;;  %v2342_v43 = vld [vmem:[#allocation4 + $0xe8] sm:$0xff]  ;;  %v6251_v57 = vor.u32 %v6708_v46, %v6250_v45 }
 0x559   : > { %v4106_v51 = vadd.f32 %v4004_v48, %v2338_v47  ;;  %v6706_v48 = vld [vmem:[%s7687_s14 + $0x3c4] sm:$0xf] }
 0x55b   : > { %4170 = vst [vmem:[#allocation4 + $0x20] sm:$0xff] %v4106_v51  ;;  %v6709_v51 = vld [vmem:[%s7687_s14 + $0x3d4] sm:$0xf0] }
 0x55c   : > { %v3836_v59 = vpop.f32.mrf.mxu2  ;;  %v3501_v0 = vpop.f32.mrf.mxu0 }
 0x55d   : > { %v4005_v60 = vpop.f32.mrf.mxu3  ;;  %v3837_v63 = vadd.f32 %v3836_v59, %v3668_v58  ;;  %v3670_v1 = vpop.f32.mrf.mxu1  ;;  %v6255_v58 = vor.u32 %v6706_v48, %v6252_v49  ;;  %v2347_v48 = vld [vmem:[#allocation4 + $0xd0] sm:$0xff] }
 0x55e   : > { %v3671_v7 = vadd.f32 %v3670_v1, %v3501_v0  ;;  %v2343_v0 = vld [vmem:[#allocation4 + $0x78] sm:$0xff] }
 0x55f   : > { %v4006_v5 = vadd.f32 %v4005_v60, %v3837_v63  ;;  %3540 = vmatmul.bf16.gmra.mxu0 %v6219_v61  ;;  %v6263_v63 = vor.u32 %v6707_v52, %v6260_v53 }
 0x560   : > { %3709 = vmatmul.bf16.gmra.mxu1 %v6223_v62  ;;  %v6259_v62 = vor.u32 %v6709_v51, %v6258_v50 }
 0x561   : > { %v4107_v6 = vadd.f32 %v4006_v5, %v2339_v4  ;;  %3878 = vmatmul.bf16.gmra.mxu2 %v6227_v2 }
 0x562   : > { %4047 = vmatmul.bf16.gmra.mxu3 %v6231_v3 }
 0x563   : > { %4171 = vst [vmem:[#allocation4 + $0x128] sm:$0xff] %v4107_v6 }
 0x564   : > { %v3839_v8 = vpop.f32.mrf.mxu2  ;;  %v3503_v11 = vpop.f32.mrf.mxu0 }
 0x565   : > { %v4008_v9 = vpop.f32.mrf.mxu3  ;;  %v3840_v10 = vadd.f32 %v3839_v8, %v3671_v7  ;;  %v3672_v12 = vpop.f32.mrf.mxu1 }
 0x566   : > { %v3673_v24 = vadd.f32 %v3672_v12, %v3503_v11  ;;  %v6266_v11 = vld [vmem:[%s7687_s14 + $0x3e0] sm:$0xf]  ;;  %v6712_v12 = vld [vmem:[%s7687_s14 + $0x3ec] sm:$0xf0] }
 0x567   : > { %v4009_v14 = vadd.f32 %v4008_v9, %v3840_v10  ;;  %v2344_v9 = vld [vmem:[#allocation4 + $0x70] sm:$0xff]  ;;  %v6267_v23 = vor.u32 %v6712_v12, %v6266_v11  ;;  %v2350_v11 = vld [vmem:[#allocation4 + $0xa8] sm:$0xff] }
 0x569   : > { %v4108_v17 = vadd.f32 %v4009_v14, %v2340_v13  ;;  %v6710_v14 = vld [vmem:[%s7687_s14 + $0x3e4] sm:$0xf] }
 0x56b   : > { %4172 = vst [vmem:[#allocation4 + $0x1a0] sm:$0xff] %v4108_v17  ;;  %v6713_v17 = vld [vmem:[%s7687_s14 + $0x3f4] sm:$0xf0] }
 0x56c   : > { %v3841_v25 = vpop.f32.mrf.mxu2  ;;  %v3506_v30 = vpop.f32.mrf.mxu0 }
 0x56d   : > { %v4010_v26 = vpop.f32.mrf.mxu3  ;;  %v3842_v29 = vadd.f32 %v3841_v25, %v3673_v24  ;;  %v3675_v31 = vpop.f32.mrf.mxu1  ;;  %v6271_v24 = vor.u32 %v6710_v14, %v6268_v15 }
 0x56e   : > { %v3676_v37 = vadd.f32 %v3675_v31, %v3506_v30  ;;  %v2345_v30 = vld [vmem:[#allocation4 + $0x90] sm:$0xff] }
 0x56f   : > { %v4011_v35 = vadd.f32 %v4010_v26, %v3842_v29  ;;  %3545 = vmatmul.bf16.gmra.mxu0 %v6235_v27  ;;  %v6279_v29 = vor.u32 %v6711_v18, %v6276_v19 }
 0x570   : > { %3714 = vmatmul.bf16.gmra.mxu1 %v6239_v28  ;;  %v6275_v28 = vor.u32 %v6713_v17, %v6274_v16 }
 0x571   : > { %v4109_v36 = vadd.f32 %v4011_v35, %v2341_v34  ;;  %3883 = vmatmul.bf16.gmra.mxu2 %v6243_v32 }
 0x572   : > { %4052 = vmatmul.bf16.gmra.mxu3 %v6247_v33 }
 0x573   : > { %4173 = vst [vmem:[#allocation4 + $0x1f0] sm:$0xff] %v4109_v36 }
 0x574   : > { %v3844_v38 = vpop.f32.mrf.mxu2  ;;  %v3508_v41 = vpop.f32.mrf.mxu0 }
 0x575   : > { %v4013_v39 = vpop.f32.mrf.mxu3  ;;  %v3845_v40 = vadd.f32 %v3844_v38, %v3676_v37  ;;  %v3677_v42 = vpop.f32.mrf.mxu1 }
 0x576   : > { %v3678_v54 = vadd.f32 %v3677_v42, %v3508_v41 }
 0x577   : > { %v4014_v44 = vadd.f32 %v4013_v39, %v3845_v40  ;;  %v2346_v39 = vld [vmem:[#allocation4 + $0x1d8] sm:$0xff] }
 0x579   : > { %v4110_v47 = vadd.f32 %v4014_v44, %v2342_v43 }
 0x57b   : > { %4174 = vst [vmem:[#allocation4 + $0xe8] sm:$0xff] %v4110_v47 }
 0x57c   : > { %v3846_v55 = vpop.f32.mrf.mxu2  ;;  %v3511_v60 = vpop.f32.mrf.mxu0 }
 0x57d   : > { %v4015_v56 = vpop.f32.mrf.mxu3  ;;  %v3847_v59 = vadd.f32 %v3846_v55, %v3678_v54  ;;  %v3680_v61 = vpop.f32.mrf.mxu1 }
 0x57e   : > { %v3681_v3 = vadd.f32 %v3680_v61, %v3511_v60 }
 0x57f   : > { %v4016_v1 = vadd.f32 %v4015_v56, %v3847_v59  ;;  %3550 = vmatmul.bf16.gmra.mxu0 %v6251_v57  ;;  %v2348_v57 = vld [vmem:[#allocation4 + $0xb8] sm:$0xff] }
 0x580   : > { %3719 = vmatmul.bf16.gmra.mxu1 %v6255_v58 }
 0x581   : > { %v4111_v2 = vadd.f32 %v4016_v1, %v2343_v0  ;;  %3888 = vmatmul.bf16.gmra.mxu2 %v6259_v62 }
 0x582   : > { %4057 = vmatmul.bf16.gmra.mxu3 %v6263_v63 }
 0x583   : > { %4175 = vst [vmem:[#allocation4 + $0x78] sm:$0xff] %v4111_v2  ;;  %v2349_v2 = vld [vmem:[#allocation4 + $0x88] sm:$0xff] }
 0x584   : > { %v3849_v4 = vpop.f32.mrf.mxu2  ;;  %v3513_v7 = vpop.f32.mrf.mxu0 }
 0x585   : > { %v4018_v5 = vpop.f32.mrf.mxu3  ;;  %v3850_v6 = vadd.f32 %v3849_v4, %v3681_v3  ;;  %v3682_v8 = vpop.f32.mrf.mxu1 }
 0x586   : > { %v3683_v20 = vadd.f32 %v3682_v8, %v3513_v7 }
 0x587   : > { %v4019_v10 = vadd.f32 %v4018_v5, %v3850_v6 }
 0x589   : > { %v4112_v13 = vadd.f32 %v4019_v10, %v2344_v9 }
 0x58b   : > { %4176 = vst [vmem:[#allocation4 + $0x70] sm:$0xff] %v4112_v13 }
 0x58c   : > { %v3851_v21 = vpop.f32.mrf.mxu2  ;;  %v3516_v26 = vpop.f32.mrf.mxu0 }
 0x58d   : > { %v4020_v22 = vpop.f32.mrf.mxu3  ;;  %v3852_v25 = vadd.f32 %v3851_v21, %v3683_v20  ;;  %v3685_v27 = vpop.f32.mrf.mxu1  ;;  %v2351_v20 = vld [vmem:[#allocation4 + $0x1c8] sm:$0xff] }
 0x58e   : > { %v3686_v33 = vadd.f32 %v3685_v27, %v3516_v26 }
 0x58f   : > { %v4021_v31 = vadd.f32 %v4020_v22, %v3852_v25  ;;  %3555 = vmatmul.bf16.gmra.mxu0 %v6267_v23 }
 0x590   : > { %3724 = vmatmul.bf16.gmra.mxu1 %v6271_v24 }
 0x591   : > { %v4113_v32 = vadd.f32 %v4021_v31, %v2345_v30  ;;  %3893 = vmatmul.bf16.gmra.mxu2 %v6275_v28 }
 0x592   : > { %4062 = vmatmul.bf16.gmra.mxu3 %v6279_v29  ;;  %v2352_v29 = vld [vmem:[#allocation4 + $0x170] sm:$0xff] }
 0x593   : > { %4177 = vst [vmem:[#allocation4 + $0x90] sm:$0xff] %v4113_v32 }
 0x594   : > { %v3854_v34 = vpop.f32.mrf.mxu2  ;;  %v3518_v37 = vpop.f32.mrf.mxu0 }
 0x595   : > { %v4023_v35 = vpop.f32.mrf.mxu3  ;;  %v3855_v36 = vadd.f32 %v3854_v34, %v3686_v33  ;;  %v3687_v38 = vpop.f32.mrf.mxu1 }
 0x596   : > { %v3688_v42 = vadd.f32 %v3687_v38, %v3518_v37  ;;  %v2353_v38 = vld [vmem:[#allocation4 + $0x178] sm:$0xff] }
 0x597   : > { %v4024_v40 = vadd.f32 %v4023_v35, %v3855_v36 }
 0x599   : > { %v4114_v41 = vadd.f32 %v4024_v40, %v2346_v39 }
 0x59b   : > { %4178 = vst [vmem:[#allocation4 + $0x1d8] sm:$0xff] %v4114_v41 }
 0x59c   : > { %v3856_v43 = vpop.f32.mrf.mxu2  ;;  %v3521_v46 = vpop.f32.mrf.mxu0 }
 0x59d   : > { %v4025_v44 = vpop.f32.mrf.mxu3  ;;  %v3857_v45 = vadd.f32 %v3856_v43, %v3688_v42  ;;  %v3690_v47 = vpop.f32.mrf.mxu1 }
 0x59e   : > { %v3691_v51 = vadd.f32 %v3690_v47, %v3521_v46  ;;  %v2354_v47 = vld [vmem:[#allocation4 + $0x68] sm:$0xff] }
 0x59f   : > { %v4026_v49 = vadd.f32 %v4025_v44, %v3857_v45 }
 0x5a1   : > { %v4115_v50 = vadd.f32 %v4026_v49, %v2347_v48 }
 0x5a3   : > { %4179 = vst [vmem:[#allocation4 + $0xd0] sm:$0xff] %v4115_v50 }
 0x5a4   : > { %v3859_v52 = vpop.f32.mrf.mxu2  ;;  %v3523_v55 = vpop.f32.mrf.mxu0 }
 0x5a5   : > { %v4028_v53 = vpop.f32.mrf.mxu3  ;;  %v3860_v54 = vadd.f32 %v3859_v52, %v3691_v51  ;;  %v3692_v56 = vpop.f32.mrf.mxu1 }
 0x5a6   : > { %v3693_v60 = vadd.f32 %v3692_v56, %v3523_v55  ;;  %v2355_v56 = vld [vmem:[#allocation4 + $0x190] sm:$0xff] }
 0x5a7   : > { %v4029_v58 = vadd.f32 %v4028_v53, %v3860_v54 }
 0x5a9   : > { %v4116_v59 = vadd.f32 %v4029_v58, %v2348_v57 }
 0x5ab   : > { %4180 = vst [vmem:[#allocation4 + $0xb8] sm:$0xff] %v4116_v59 }
 0x5ac   : > { %v3861_v61 = vpop.f32.mrf.mxu2  ;;  %v3526_v0 = vpop.f32.mrf.mxu0 }
 0x5ad   : > { %v4030_v62 = vpop.f32.mrf.mxu3  ;;  %v3862_v63 = vadd.f32 %v3861_v61, %v3693_v60  ;;  %v3695_v1 = vpop.f32.mrf.mxu1 }
 0x5ae   : > { %v3696_v5 = vadd.f32 %v3695_v1, %v3526_v0  ;;  %v2356_v1 = vld [vmem:[#allocation4 + $0x198] sm:$0xff] }
 0x5af   : > { %v4031_v3 = vadd.f32 %v4030_v62, %v3862_v63 }
 0x5b1   : > { %v4117_v4 = vadd.f32 %v4031_v3, %v2349_v2 }
 0x5b3   : > { %4181 = vst [vmem:[#allocation4 + $0x88] sm:$0xff] %v4117_v4 }
 0x5b4   : > { %v3864_v6 = vpop.f32.mrf.mxu2  ;;  %v3528_v9 = vpop.f32.mrf.mxu0 }
 0x5b5   : > { %v4033_v7 = vpop.f32.mrf.mxu3  ;;  %v3865_v8 = vadd.f32 %v3864_v6, %v3696_v5  ;;  %v3697_v10 = vpop.f32.mrf.mxu1 }
 0x5b6   : > { %v3698_v14 = vadd.f32 %v3697_v10, %v3528_v9  ;;  %v2357_v10 = vld [vmem:[#allocation4 + $0x38] sm:$0xff] }
 0x5b7   : > { %v4034_v12 = vadd.f32 %v4033_v7, %v3865_v8 }
 0x5b9   : > { %v4118_v13 = vadd.f32 %v4034_v12, %v2350_v11 }
 0x5bb   : > { %4182 = vst [vmem:[#allocation4 + $0xa8] sm:$0xff] %v4118_v13 }
 0x5bc   : > { %v3866_v15 = vpop.f32.mrf.mxu2  ;;  %v3531_v18 = vpop.f32.mrf.mxu0 }
 0x5bd   : > { %v4035_v16 = vpop.f32.mrf.mxu3  ;;  %v3867_v17 = vadd.f32 %v3866_v15, %v3698_v14  ;;  %v3700_v19 = vpop.f32.mrf.mxu1 }
 0x5be   : > { %v3701_v23 = vadd.f32 %v3700_v19, %v3531_v18  ;;  %v2358_v19 = vld [vmem:[#allocation4 + $0xc0] sm:$0xff] }
 0x5bf   : > { %v4036_v21 = vadd.f32 %v4035_v16, %v3867_v17 }
 0x5c1   : > { %v4119_v22 = vadd.f32 %v4036_v21, %v2351_v20 }
 0x5c3   : > { %4183 = vst [vmem:[#allocation4 + $0x1c8] sm:$0xff] %v4119_v22 }
 0x5c4   : > { %v3869_v24 = vpop.f32.mrf.mxu2  ;;  %v3533_v27 = vpop.f32.mrf.mxu0 }
 0x5c5   : > { %v4038_v25 = vpop.f32.mrf.mxu3  ;;  %v3870_v26 = vadd.f32 %v3869_v24, %v3701_v23  ;;  %v3702_v28 = vpop.f32.mrf.mxu1 }
 0x5c6   : > { %v3703_v32 = vadd.f32 %v3702_v28, %v3533_v27  ;;  %v2359_v28 = vld [vmem:[#allocation4 + $0x1c0] sm:$0xff] }
 0x5c7   : > { %v4039_v30 = vadd.f32 %v4038_v25, %v3870_v26 }
 0x5c9   : > { %v4120_v31 = vadd.f32 %v4039_v30, %v2352_v29 }
 0x5cb   : > { %4184 = vst [vmem:[#allocation4 + $0x170] sm:$0xff] %v4120_v31 }
 0x5cc   : > { %v3871_v33 = vpop.f32.mrf.mxu2  ;;  %v3536_v36 = vpop.f32.mrf.mxu0 }
 0x5cd   : > { %v4040_v34 = vpop.f32.mrf.mxu3  ;;  %v3872_v35 = vadd.f32 %v3871_v33, %v3703_v32  ;;  %v3705_v37 = vpop.f32.mrf.mxu1 }
 0x5ce   : > { %v3706_v41 = vadd.f32 %v3705_v37, %v3536_v36  ;;  %v2360_v37 = vld [vmem:[#allocation4 + $0x158] sm:$0xff] }
 0x5cf   : > { %v4041_v39 = vadd.f32 %v4040_v34, %v3872_v35 }
 0x5d1   : > { %v4121_v40 = vadd.f32 %v4041_v39, %v2353_v38 }
 0x5d3   : > { %4185 = vst [vmem:[#allocation4 + $0x178] sm:$0xff] %v4121_v40 }
 0x5d4   : > { %v3874_v42 = vpop.f32.mrf.mxu2  ;;  %v3538_v45 = vpop.f32.mrf.mxu0 }
 0x5d5   : > { %v4043_v43 = vpop.f32.mrf.mxu3  ;;  %v3875_v44 = vadd.f32 %v3874_v42, %v3706_v41  ;;  %v3707_v46 = vpop.f32.mrf.mxu1 }
 0x5d6   : > { %v3708_v50 = vadd.f32 %v3707_v46, %v3538_v45 }
 0x5d7   : > { %v4044_v48 = vadd.f32 %v4043_v43, %v3875_v44  ;;  %v2361_v44 = vld [vmem:[#allocation4 + $0x10] sm:$0xff] }
 0x5d9   : > { %v4122_v49 = vadd.f32 %v4044_v48, %v2354_v47 }
 0x5db   : > { %4186 = vst [vmem:[#allocation4 + $0x68] sm:$0xff] %v4122_v49 }
 0x5dc   : > { %v3876_v51 = vpop.f32.mrf.mxu2  ;;  %v3541_v54 = vpop.f32.mrf.mxu0 }
 0x5dd   : > { %v4045_v52 = vpop.f32.mrf.mxu3  ;;  %v3877_v53 = vadd.f32 %v3876_v51, %v3708_v50  ;;  %v3710_v55 = vpop.f32.mrf.mxu1 }
 0x5de   : > { %v3711_v59 = vadd.f32 %v3710_v55, %v3541_v54 }
 0x5df   : > { %v4046_v57 = vadd.f32 %v4045_v52, %v3877_v53  ;;  %v2362_v53 = vld [vmem:[#allocation4 + $0x58] sm:$0xff] }
 0x5e1   : > { %v4123_v58 = vadd.f32 %v4046_v57, %v2355_v56 }
 0x5e3   : > { %4187 = vst [vmem:[#allocation4 + $0x190] sm:$0xff] %v4123_v58 }
 0x5e4   : > { %v3879_v60 = vpop.f32.mrf.mxu2  ;;  %v3543_v63 = vpop.f32.mrf.mxu0 }
 0x5e5   : > { %v4048_v61 = vpop.f32.mrf.mxu3  ;;  %v3880_v62 = vadd.f32 %v3879_v60, %v3711_v59  ;;  %v3712_v0 = vpop.f32.mrf.mxu1 }
 0x5e6   : > { %v3713_v4 = vadd.f32 %v3712_v0, %v3543_v63 }
 0x5e7   : > { %v4049_v2 = vadd.f32 %v4048_v61, %v3880_v62  ;;  %v2363_v61 = vld [vmem:[#allocation4 + $0xa0] sm:$0xff] }
 0x5e9   : > { %v4124_v3 = vadd.f32 %v4049_v2, %v2356_v1 }
 0x5eb   : > { %4188 = vst [vmem:[#allocation4 + $0x198] sm:$0xff] %v4124_v3 }
 0x5ec   : > { %v3881_v5 = vpop.f32.mrf.mxu2  ;;  %v3546_v8 = vpop.f32.mrf.mxu0 }
 0x5ed   : > { %v4050_v6 = vpop.f32.mrf.mxu3  ;;  %v3882_v7 = vadd.f32 %v3881_v5, %v3713_v4  ;;  %v3715_v9 = vpop.f32.mrf.mxu1 }
 0x5ee   : > { %v3716_v13 = vadd.f32 %v3715_v9, %v3546_v8 }
 0x5ef   : > { %v4051_v11 = vadd.f32 %v4050_v6, %v3882_v7 }
 0x5f1   : > { %v4125_v12 = vadd.f32 %v4051_v11, %v2357_v10 }
 0x5f3   : > { %4189 = vst [vmem:[#allocation4 + $0x38] sm:$0xff] %v4125_v12 }
 0x5f4   : > { %v3884_v14 = vpop.f32.mrf.mxu2  ;;  %v3548_v17 = vpop.f32.mrf.mxu0 }
 0x5f5   : > { %v4053_v15 = vpop.f32.mrf.mxu3  ;;  %v3885_v16 = vadd.f32 %v3884_v14, %v3716_v13  ;;  %v3717_v18 = vpop.f32.mrf.mxu1 }
 0x5f6   : > { %v3718_v22 = vadd.f32 %v3717_v18, %v3548_v17 }
 0x5f7   : > { %v4054_v20 = vadd.f32 %v4053_v15, %v3885_v16 }
 0x5f9   : > { %v4126_v21 = vadd.f32 %v4054_v20, %v2358_v19 }
 0x5fb   : > { %4190 = vst [vmem:[#allocation4 + $0xc0] sm:$0xff] %v4126_v21 }
 0x5fc   : > { %v3886_v23 = vpop.f32.mrf.mxu2  ;;  %v3551_v26 = vpop.f32.mrf.mxu0 }
 0x5fd   : > { %v4055_v24 = vpop.f32.mrf.mxu3  ;;  %v3887_v25 = vadd.f32 %v3886_v23, %v3718_v22  ;;  %v3720_v27 = vpop.f32.mrf.mxu1 }
 0x5fe   : > { %v3721_v31 = vadd.f32 %v3720_v27, %v3551_v26 }
 0x5ff   : > { %v4056_v29 = vadd.f32 %v4055_v24, %v3887_v25 }
 0x601   : > { %v4127_v30 = vadd.f32 %v4056_v29, %v2359_v28 }
 0x603   : > { %4191 = vst [vmem:[#allocation4 + $0x1c0] sm:$0xff] %v4127_v30 }
 0x604   : > { %v3889_v32 = vpop.f32.mrf.mxu2  ;;  %v3553_v35 = vpop.f32.mrf.mxu0 }
 0x605   : > { %v4058_v33 = vpop.f32.mrf.mxu3  ;;  %v3890_v34 = vadd.f32 %v3889_v32, %v3721_v31  ;;  %v3722_v36 = vpop.f32.mrf.mxu1 }
 0x606   : > { %v3723_v40 = vadd.f32 %v3722_v36, %v3553_v35 }
 0x607   : > { %v4059_v38 = vadd.f32 %v4058_v33, %v3890_v34 }
 0x609   : > { %v4128_v39 = vadd.f32 %v4059_v38, %v2360_v37 }
 0x60b   : > { %4192 = vst [vmem:[#allocation4 + $0x158] sm:$0xff] %v4128_v39 }
 0x60c   : > { %v3891_v41 = vpop.f32.mrf.mxu2  ;;  %v3556_v45 = vpop.f32.mrf.mxu0 }
 0x60d   : > { %v4060_v42 = vpop.f32.mrf.mxu3  ;;  %v3892_v43 = vadd.f32 %v3891_v41, %v3723_v40  ;;  %v3725_v46 = vpop.f32.mrf.mxu1 }
 0x60e   : > { %v3726_v49 = vadd.f32 %v3725_v46, %v3556_v45 }
 0x60f   : > { %v4061_v47 = vadd.f32 %v4060_v42, %v3892_v43 }
 0x611   : > { %v4129_v48 = vadd.f32 %v4061_v47, %v2361_v44 }
 0x613   : > { %4193 = vst [vmem:[#allocation4 + $0x10] sm:$0xff] %v4129_v48 }
 0x614   : > { %v3894_v50 = vpop.f32.mrf.mxu2  ;;  %v3558_v55 = vpop.f32.mrf.mxu0 }
 0x615   : > { %v4063_v51 = vpop.f32.mrf.mxu3  ;;  %v3895_v52 = vadd.f32 %v3894_v50, %v3726_v49  ;;  %v3727_v56 = vpop.f32.mrf.mxu1 }
 0x616   : > { %v3728_v58 = vadd.f32 %v3727_v56, %v3558_v55 }
 0x617   : > { %v4064_v54 = vadd.f32 %v4063_v51, %v3895_v52 }
 0x619   : > { %v4130_v57 = vadd.f32 %v4064_v54, %v2362_v53 }
 0x61b   : > { %4194 = vst [vmem:[#allocation4 + $0x58] sm:$0xff] %v4130_v57 }
 0x61c   : > { %v3896_v59 = vpop.f32.mrf.mxu2 }
 0x61d   : > { %v3897_v60 = vadd.f32 %v3896_v59, %v3728_v58  ;;  %v4065_v62 = vpop.f32.mrf.mxu3 }
 0x61f   : > { %v4066_v63 = vadd.f32 %v4065_v62, %v3897_v60 }
 0x621   : > { %v4131_v0 = vadd.f32 %v4066_v63, %v2363_v61 }
 0x623   : > { %4195 = vst [vmem:[#allocation4 + $0xa0] sm:$0xff] %v4131_v0 }
 0x624 PF: > { %s9286_s14 = sld [smem:[#allocation20_spill]] }
 0x62a   : > { %p6408_p0 = scmp.ne.s32.totalorder %s9286_s14, 1 }
 0x62c   : > { %4199 = sbr.rel (%p6408_p0) target bundleno = 1870 (0x74e), region = 60 }
 0x631   : > { %s9287_s27 = sld [smem:[#allocation22_spill]]  ;;  %v8371_v1 = vld [vmem:[#allocation4 + $0xb0] sm:$0xff]  ;;  %v8375_v3 = vld [vmem:[#allocation4 + $0xd8] sm:$0xff]  ;;  %v8381_v6 = vld [vmem:[#allocation4 + $0x168] sm:$0xff] }
 0x632   : > { %s9288_s1 = sld [smem:[#allocation21_spill]]  ;;  %v8373_v2 = vld [vmem:[#allocation4 + $0x1b0] sm:$0xff]  ;;  %9289 = vst [vmem:[#allocation30_spill] sm:$0xff] %v8375_v3  ;;  %v8377_v4 = vld [vmem:[#allocation4 + $0x18] sm:$0xff]  ;;  %v8388_v9 = vld [vmem:[#allocation4 + $0x48] sm:$0xff] }
 0x633   : > { %9290 = vst [vmem:[#allocation31_spill] sm:$0xff] %v8377_v4  ;;  %v8379_v5 = vld [vmem:[#allocation4 + $0x50] sm:$0xff]  ;;  %v6750_v7 = vpack.c.bf16 %v8373_v2, %v8371_v1  ;;  %v6755_v10 = vpack.c.bf16 %v8377_v4, %v8375_v3  ;;  %v8392_v11 = vld [vmem:[#allocation4 + $0x180] sm:$0xff]  ;;  %v8398_v14 = vld [vmem:[#allocation4 + $0x118] sm:$0xff] }
 0x634   : > { %v8386_v8 = vld [vmem:[#allocation4 + $0x130] sm:$0xff]  ;;  %v6760_v13 = vpack.c.bf16 %v8381_v6, %v8379_v5  ;;  %v8400_v15 = vld [vmem:[#allocation4 + $0x98] sm:$0xff]  ;;  %v8404_v17 = vld [vmem:[#allocation4 + $0x120] sm:$0xff] }
 0x635   : > { %v8394_v12 = vld [vmem:[#allocation4 + $0x110] sm:$0xff]  ;;  %v6765_v16 = vpack.c.bf16 %v8388_v9, %v8386_v8  ;;  %v8413_v20 = vld [vmem:[#allocation4 + $0x108] sm:$0xff]  ;;  %v8415_v21 = vld [vmem:[#allocation4 + $0x60] sm:$0xff]  ;;  %v6775_v22 = vpack.c.bf16 %v8400_v15, %v8398_v14 }
 0x636   : > { %v8406_v18 = vld [vmem:[#allocation4 + $0x150] sm:$0xff]  ;;  %v6770_v19 = vpack.c.bf16 %v8394_v12, %v8392_v11  ;;  %v8420_v23 = vld [vmem:[#allocation4 + $0xe0] sm:$0xff]  ;;  %v8422_v24 = vld [vmem:[#allocation4 + $0x188] sm:$0xff]  ;;  %v6785_v28 = vpack.c.bf16 %v8415_v21, %v8413_v20 }
 0x637   : > { %s4265_s20 = sadd.s32 1, %s9287_s27  ;;  %v6780_v25 = vpack.c.bf16 %v8406_v18, %v8404_v17  ;;  %v8427_v26 = vld [vmem:[#allocation4 + $0x138] sm:$0xff]  ;;  %v8429_v27 = vld [vmem:[#allocation4 + $0x140] sm:$0xff]  ;;  %v8436_v30 = vld [vmem:[#allocation4 + $0x1a8] sm:$0xff]  ;;  %v6790_v31 = vpack.c.bf16 %v8422_v24, %v8420_v23 }
 0x638   : > { %p4266_p4 = scmp.lt.s32.totalorder %s4265_s20, 0  ;;  %s4267_s3 = ssub.s32 0, %s4265_s20  ;;  %v8434_v29 = vld [vmem:[#allocation4 + $0x80] sm:$0xff]  ;;  %v8441_v32 = vld [vmem:[#allocation4 + $0x1b8] sm:$0xff]  ;;  %v8443_v33 = vld [vmem:[#allocation4 + $0x28] sm:$0xff]  ;;  %v6795_v34 = vpack.c.bf16 %v8429_v27, %v8427_v26 }
 0x639   : > { %s6410_s0 = smin.u32 %s4267_s3, %s4265_s20  ;;  %s8369_s18 = sshll.u32 %s9288_s1, 9  ;;  %v8448_v35 = vld [vmem:[#allocation4 + $0x1e8] sm:$0xff]  ;;  %v8450_v36 = vld [vmem:[#allocation4 + $0xf8] sm:$0xff]  ;;  %v6800_v37 = vpack.c.bf16 %v8436_v30, %v8434_v29  ;;  %v8455_v38 = vld [vmem:[#allocation4 + $0x160] sm:$0xff]  ;;  %v6805_v40 = vpack.c.bf16 %v8443_v33, %v8441_v32 }
 0x63a   : > { %s4269_s21 = sand.u32 1, %s6410_s0   ;;  %v8457_v39 = vld [vmem:[#allocation4 + $0x30] sm:$0xff]  ;;  %v8462_v41 = vld [vmem:[#allocation4 + $0x1e0] sm:$0xff]  ;;  %v6810_v43 = vpack.c.bf16 %v8450_v36, %v8448_v35  ;;  %v8471_v45 = vld [vmem:[#allocation4 + $0x8] sm:$0xff]  ;;  %s8612_s5 = scalar_lea.vmem (!%p5120_p3), [#allocation3], %s8369_s18 }
 0x63b   : > { %s4270_s12 = ssub.s32 0, %s4269_s21  ;;  %v8464_v42 = vld [vmem:[#allocation4] sm:$0xff]  ;;  %v8469_v44 = vld [vmem:[#allocation4 + $0xf0] sm:$0xff]  ;;  %v6815_v46 = vpack.c.bf16 %v8457_v39, %v8455_v38  ;;  %v8476_v47 = vld [vmem:[#allocation4 + $0x148] sm:$0xff] }
 0x63c   : > { %s9380_s12 = smov (!%p4266_p4, %s4270_s12), %s4269_s21  ;;  %v8478_v48 = vld [vmem:[#allocation4 + $0x1d0] sm:$0xff]  ;;  %v6820_v49 = vpack.c.bf16 %v8464_v42, %v8462_v41  ;;  %v8483_v50 = vld [vmem:[#allocation4 + $0x100] sm:$0xff]  ;;  %v8485_v51 = vld [vmem:[#allocation4 + $0xc8] sm:$0xff]  ;;  %v6825_v52 = vpack.c.bf16 %v8471_v45, %v8469_v44 }
 0x63d   : > { %p6412_p9 = scmp.lt.s32.totalorder %s9380_s12, 0  ;;  %s4276_s2 = sadd.s32 2, %s9380_s12  ;;  %v8490_v53 = vld [vmem:[#allocation4 + $0x40] sm:$0xff]  ;;  %v8492_v54 = vld [vmem:[#allocation4 + $0x1f8] sm:$0xff]  ;;  %v6830_v55 = vpack.c.bf16 %v8478_v48, %v8476_v47  ;;  %v8499_v57 = vld [vmem:[#allocation4 + $0x128] sm:$0xff]  ;;  %v6835_v58 = vpack.c.bf16 %v8485_v51, %v8483_v50 }
 0x63e   : > { %v8497_v56 = vld [vmem:[#allocation4 + $0x20] sm:$0xff]  ;;  %v8506_v60 = vld [vmem:[#allocation4 + $0x1f0] sm:$0xff]  ;;  %v6840_v61 = vpack.c.bf16 %v8492_v54, %v8490_v53  ;;  %v8511_v62 = vld [vmem:[#allocation4 + $0xe8] sm:$0xff] }
 0x63f   : > { %s9382_s2 = smov (!%p6412_p9, %s4276_s2), %s9380_s12  ;;  %v8504_v59 = vld [vmem:[#allocation4 + $0x1a0] sm:$0xff]  ;;  %v8513_v63 = vld [vmem:[#allocation4 + $0x78] sm:$0xff]  ;;  %v6845_v0 = vpack.c.bf16 %v8499_v57, %v8497_v56 }
 0x640   : > { %s6413_s11 = sshll.u32 %s9382_s2, 10 }
 0x641   : > { %s4279_s9 = sadd.s32 %s6413_s11, %s8369_s18 }
 0x642   : > { %s4344_s26 = sshra.s32 %s4279_s9, 3 }
 0x643   : > { %s6414_s23 = sshll.u32 %s4344_s26, 2 }
 0x644   : > { %s8408_s15 = scalar_lea.vmem [#allocation2], %s6414_s23 }
 0x645   : > { %6751 = vst [vmem:[%s8408_s15] sm:$0xff] %v6750_v7   ;;  %v8518_v7 = vld [vmem:[#allocation4 + $0x70] sm:$0xff] }
 0x646   : > { %6907 = vst [vmem:[%s8408_s15 + $0x8] sm:$0xff] %v6755_v10   ;;  %v8520_v10 = vld [vmem:[#allocation4 + $0x90] sm:$0xff] }
 0x647   : > { %6908 = vst [vmem:[%s8408_s15 + $0x10] sm:$0xff] %v6760_v13   ;;  %v6850_v13 = vpack.c.bf16 %v8506_v60, %v8504_v59 }
 0x648   : > { %6909 = vst [vmem:[%s8408_s15 + $0x18] sm:$0xff] %v6765_v16   ;;  %v8525_v16 = vld [vmem:[#allocation4 + $0x1d8] sm:$0xff] }
 0x649   : > { %6910 = vst [vmem:[%s8408_s15 + $0x20] sm:$0xff] %v6770_v19   ;;  %v8527_v19 = vld [vmem:[#allocation4 + $0xd0] sm:$0xff] }
 0x64a   : > { %6911 = vst [vmem:[%s8408_s15 + $0x28] sm:$0xff] %v6775_v22   ;;  %v6855_v22 = vpack.c.bf16 %v8513_v63, %v8511_v62 }
 0x64b   : > { %6912 = vst [vmem:[%s8408_s15 + $0x30] sm:$0xff] %v6780_v25   ;;  %v8532_v25 = vld [vmem:[#allocation4 + $0xb8] sm:$0xff] }
 0x64c   : > { %6913 = vst [vmem:[%s8408_s15 + $0x38] sm:$0xff] %v6785_v28   ;;  %v8534_v28 = vld [vmem:[#allocation4 + $0x88] sm:$0xff] }
 0x64d   : > { %6914 = vst [vmem:[%s8408_s15 + $0x40] sm:$0xff] %v6790_v31   ;;  %v6860_v31 = vpack.c.bf16 %v8520_v10, %v8518_v7 }
 0x64e   : > { %6915 = vst [vmem:[%s8408_s15 + $0x48] sm:$0xff] %v6795_v34   ;;  %v8539_v34 = vld [vmem:[#allocation4 + $0xa8] sm:$0xff] }
 0x64f   : > { %6916 = vst [vmem:[%s8408_s15 + $0x50] sm:$0xff] %v6800_v37   ;;  %v8541_v37 = vld [vmem:[#allocation4 + $0x1c8] sm:$0xff] }
 0x650   : > { %6917 = vst [vmem:[%s8408_s15 + $0x58] sm:$0xff] %v6805_v40   ;;  %v6865_v40 = vpack.c.bf16 %v8527_v19, %v8525_v16 }
 0x651   : > { %6918 = vst [vmem:[%s8408_s15 + $0x60] sm:$0xff] %v6810_v43   ;;  %v8546_v43 = vld [vmem:[#allocation4 + $0x170] sm:$0xff] }
 0x652   : > { %6919 = vst [vmem:[%s8408_s15 + $0x68] sm:$0xff] %v6815_v46   ;;  %v8548_v46 = vld [vmem:[#allocation4 + $0x178] sm:$0xff] }
 0x653   : > { %6920 = vst [vmem:[%s8408_s15 + $0x70] sm:$0xff] %v6820_v49   ;;  %v6870_v49 = vpack.c.bf16 %v8534_v28, %v8532_v25 }
 0x654   : > { %6921 = vst [vmem:[%s8408_s15 + $0x78] sm:$0xff] %v6825_v52   ;;  %v8553_v52 = vld [vmem:[#allocation4 + $0x68] sm:$0xff] }
 0x655   : > { %9291 = vst [vmem:[#allocation32_spill] sm:$0xff] %v8518_v7 }
 0x656   : > { %9292 = vst [vmem:[#allocation33_spill] sm:$0xff] %v8520_v10 }
 0x657   : > { %6922 = vst [vmem:[%s8408_s15 + $0x80] sm:$0xff] %v6830_v55   ;;  %v8555_v55 = vld [vmem:[#allocation4 + $0x190] sm:$0xff] }
 0x658   : > { %9293 = vst [vmem:[#allocation34_spill] sm:$0xff] %v8525_v16 }
 0x659   : > { %9294 = vst [vmem:[#allocation35_spill] sm:$0xff] %v8527_v19 }
 0x65a   : > { %6923 = vst [vmem:[%s8408_s15 + $0x88] sm:$0xff] %v6835_v58   ;;  %v6875_v58 = vpack.c.bf16 %v8541_v37, %v8539_v34 }
 0x65b   : > { %9295 = vst [vmem:[#allocation36_spill] sm:$0xff] %v8532_v25  ;;  %v8569_v25 = vld [vmem:[#allocation4 + $0x1c0] sm:$0xff] }
 0x65c   : > { %9296 = vst [vmem:[#allocation37_spill] sm:$0xff] %v8534_v28  ;;  %v8567_v28 = vld [vmem:[#allocation4 + $0xc0] sm:$0xff] }
 0x65d   : > { %6924 = vst [vmem:[%s8408_s15 + $0x90] sm:$0xff] %v6840_v61   ;;  %v8560_v61 = vld [vmem:[#allocation4 + $0x198] sm:$0xff] }
 0x65e   : > { %9297 = vst [vmem:[#allocation38_spill] sm:$0xff] %v8539_v34  ;;  %v8576_v34 = vld [vmem:[#allocation4 + $0x10] sm:$0xff] }
 0x65f   : > { %9298 = vst [vmem:[#allocation39_spill] sm:$0xff] %v8541_v37  ;;  %v8574_v37 = vld [vmem:[#allocation4 + $0x158] sm:$0xff] }
 0x660   : > { %6925 = vst [vmem:[%s8408_s15 + $0x98] sm:$0xff] %v6845_v0   ;;  %v8562_v0 = vld [vmem:[#allocation4 + $0x38] sm:$0xff] }
 0x661   : > { %9299 = vst [vmem:[#allocation40_spill] sm:$0xff] %v8546_v43 }
 0x662   : > { %9300 = vst [vmem:[#allocation41_spill] sm:$0xff] %v8548_v46 }
 0x663   : > { %6926 = vst [vmem:[%s8408_s15 + $0xa0] sm:$0xff] %v6850_v13   ;;  %v6880_v13 = vpack.c.bf16 %v8548_v46, %v8546_v43  ;;  %v8581_v46 = vld [vmem:[#allocation4 + $0x58] sm:$0xff]  ;;  %v8583_v43 = vld [vmem:[#allocation4 + $0xa0] sm:$0xff] }
 0x664   : > { %9301 = vst [vmem:[#allocation42_spill] sm:$0xff] %v8553_v52 }
 0x665   : > { %9302 = vst [vmem:[#allocation43_spill] sm:$0xff] %v8555_v55 }
 0x666   : > { %6927 = vst [vmem:[%s8408_s15 + $0xa8] sm:$0xff] %v6855_v22   ;;  %v6885_v22 = vpack.c.bf16 %v8555_v55, %v8553_v52  ;;  %v6900_v55 = vpack.c.bf16 %v8576_v34, %v8574_v37  ;;  %v6905_v52 = vpack.c.bf16 %v8583_v43, %v8581_v46 }
 0x667   : > { %6928 = vst [vmem:[%s8408_s15 + $0xb0] sm:$0xff] %v6860_v31   ;;  %v6890_v31 = vpack.c.bf16 %v8562_v0, %v8560_v61 }
 0x668   : > { %6929 = vst [vmem:[%s8408_s15 + $0xb8] sm:$0xff] %v6865_v40   ;;  %v6895_v40 = vpack.c.bf16 %v8569_v25, %v8567_v28 }
 0x669   : > { %9303 = vst [vmem:[#allocation44_spill] sm:$0xff] %v8576_v34 }
 0x66a   : > { %6930 = vst [vmem:[%s8408_s15 + $0xc0] sm:$0xff] %v6870_v49  }
 0x66b   : > { %9304 = vst [vmem:[#allocation45_spill] sm:$0xff] %v8581_v46 }
 0x66c   : > { %9305 = vst [vmem:[#allocation46_spill] sm:$0xff] %v8583_v43 }
 0x66d   : > { %6931 = vst [vmem:[%s8408_s15 + $0xc8] sm:$0xff] %v6875_v58  }
 0x66e   : > { %6932 = vst [vmem:[%s8408_s15 + $0xd0] sm:$0xff] %v6880_v13  }
 0x66f   : > { %6933 = vst [vmem:[%s8408_s15 + $0xd8] sm:$0xff] %v6885_v22   ;;  %4414 = sbr.rel (%p5120_p3) target bundleno = 1719 (0x6b7), region = 64 }
 0x670   : > { %6934 = vst [vmem:[%s8408_s15 + $0xe0] sm:$0xff] %v6890_v31  }
 0x671   : > { %6935 = vst [vmem:[%s8408_s15 + $0xe8] sm:$0xff] %v6895_v40  }
 0x672   : > { %6936 = vst [vmem:[%s8408_s15 + $0xf0] sm:$0xff] %v6900_v55  }
 0x673   : > { %6937 = vst [vmem:[%s8408_s15 + $0xf8] sm:$0xff] %v6905_v52  }
 0x674   : > { %v4415_v49 = vld [vmem:[%s7702_s24] sm:$0xff]  ;;  %v4416_v58 = vld [vmem:[%s7702_s24 + $0x8] sm:$0xff]  ;;  %v4417_v13 = vld [vmem:[%s7702_s24 + $0x10] sm:$0xff] }
 0x675   : > { %v4479_v22 = vadd.f32 %v4415_v49, %v8371_v1  ;;  %v4480_v52 = vadd.f32 %v4416_v58, %v8373_v2  ;;  %v4481_v55 = vadd.f32 %v4417_v13, %v8375_v3  ;;  %v4418_v31 = vld [vmem:[%s7702_s24 + $0x18] sm:$0xff]  ;;  %v4419_v40 = vld [vmem:[%s7702_s24 + $0x20] sm:$0xff]  ;;  %v4420_v43 = vld [vmem:[%s7702_s24 + $0x28] sm:$0xff] }
 0x676   : > { %v4482_v46 = vadd.f32 %v4418_v31, %v8377_v4  ;;  %v4421_v34 = vld [vmem:[%s7702_s24 + $0x30] sm:$0xff]  ;;  %v4483_v49 = vadd.f32 %v4419_v40, %v8379_v5  ;;  %v4422_v58 = vld [vmem:[%s7702_s24 + $0x38] sm:$0xff]  ;;  %v4484_v13 = vadd.f32 %v4420_v43, %v8381_v6  ;;  %v4423_v31 = vld [vmem:[%s7702_s24 + $0x40] sm:$0xff] }
 0x677   : > { %4544 = vst [vmem:[%s8612_s5] sm:$0xff] %v4479_v22  ;;  %v4485_v4 = vadd.f32 %v4421_v34, %v8386_v8  ;;  %v4424_v3 = vld [vmem:[%s7702_s24 + $0x48] sm:$0xff]  ;;  %v4486_v22 = vadd.f32 %v4422_v58, %v8388_v9  ;;  %v4425_v40 = vld [vmem:[%s7702_s24 + $0x50] sm:$0xff]  ;;  %v4426_v43 = vld [vmem:[%s7702_s24 + $0x58] sm:$0xff] }
 0x678   : > { %4545 = vst [vmem:[%s8612_s5 + $0x8] sm:$0xff] %v4480_v52  ;;  %v4487_v52 = vadd.f32 %v4423_v31, %v8392_v11  ;;  %v4427_v34 = vld [vmem:[%s7702_s24 + $0x60] sm:$0xff]  ;;  %v4428_v58 = vld [vmem:[%s7702_s24 + $0x68] sm:$0xff]  ;;  %v4429_v31 = vld [vmem:[%s7702_s24 + $0x70] sm:$0xff] }
 0x679   : > { %4546 = vst [vmem:[%s8612_s5 + $0x10] sm:$0xff] %v4481_v55  ;;  %v4488_v55 = vadd.f32 %v4424_v3, %v8394_v12  ;;  %v4430_v3 = vld [vmem:[%s7702_s24 + $0x78] sm:$0xff] }
 0x67a   : > { %4547 = vst [vmem:[%s8612_s5 + $0x18] sm:$0xff] %v4482_v46  ;;  %v4489_v46 = vadd.f32 %v4425_v40, %v8398_v14  ;;  %v4431_v40 = vld [vmem:[%s7702_s24 + $0x80] sm:$0xff] }
 0x67b   : > { %4548 = vst [vmem:[%s8612_s5 + $0x20] sm:$0xff] %v4483_v49  ;;  %v4490_v49 = vadd.f32 %v4426_v43, %v8400_v15  ;;  %v4432_v43 = vld [vmem:[%s7702_s24 + $0x88] sm:$0xff] }
 0x67c   : > { %4549 = vst [vmem:[%s8612_s5 + $0x28] sm:$0xff] %v4484_v13  ;;  %v4491_v13 = vadd.f32 %v4427_v34, %v8404_v17  ;;  %v4433_v34 = vld [vmem:[%s7702_s24 + $0x90] sm:$0xff] }
 0x67d   : > { %4550 = vst [vmem:[%s8612_s5 + $0x30] sm:$0xff] %v4485_v4  ;;  %v4492_v4 = vadd.f32 %v4428_v58, %v8406_v18  ;;  %v4434_v58 = vld [vmem:[%s7702_s24 + $0x98] sm:$0xff] }
 0x67e   : > { %4551 = vst [vmem:[%s8612_s5 + $0x38] sm:$0xff] %v4486_v22  ;;  %v4493_v22 = vadd.f32 %v4429_v31, %v8413_v20  ;;  %v4435_v31 = vld [vmem:[%s7702_s24 + $0xa0] sm:$0xff] }
 0x67f   : > { %4552 = vst [vmem:[%s8612_s5 + $0x40] sm:$0xff] %v4487_v52  ;;  %v4494_v52 = vadd.f32 %v4430_v3, %v8415_v21  ;;  %v4436_v3 = vld [vmem:[%s7702_s24 + $0xa8] sm:$0xff] }
 0x680   : > { %4553 = vst [vmem:[%s8612_s5 + $0x48] sm:$0xff] %v4488_v55  ;;  %v4495_v55 = vadd.f32 %v4431_v40, %v8420_v23  ;;  %v4437_v40 = vld [vmem:[%s7702_s24 + $0xb0] sm:$0xff] }
 0x681   : > { %4554 = vst [vmem:[%s8612_s5 + $0x50] sm:$0xff] %v4489_v46  ;;  %v4496_v46 = vadd.f32 %v4432_v43, %v8422_v24  ;;  %v4438_v43 = vld [vmem:[%s7702_s24 + $0xb8] sm:$0xff] }
 0x682   : > { %4555 = vst [vmem:[%s8612_s5 + $0x58] sm:$0xff] %v4490_v49  ;;  %v4497_v49 = vadd.f32 %v4433_v34, %v8427_v26  ;;  %v4439_v34 = vld [vmem:[%s7702_s24 + $0xc0] sm:$0xff] }
 0x683   : > { %4556 = vst [vmem:[%s8612_s5 + $0x60] sm:$0xff] %v4491_v13  ;;  %v4498_v13 = vadd.f32 %v4434_v58, %v8429_v27  ;;  %v4440_v58 = vld [vmem:[%s7702_s24 + $0xc8] sm:$0xff] }
 0x684   : > { %4557 = vst [vmem:[%s8612_s5 + $0x68] sm:$0xff] %v4492_v4  ;;  %v4499_v4 = vadd.f32 %v4435_v31, %v8434_v29  ;;  %v4441_v31 = vld [vmem:[%s7702_s24 + $0xd0] sm:$0xff] }
 0x685   : > { %4558 = vst [vmem:[%s8612_s5 + $0x70] sm:$0xff] %v4493_v22  ;;  %v4500_v22 = vadd.f32 %v4436_v3, %v8436_v30  ;;  %v4442_v3 = vld [vmem:[%s7702_s24 + $0xd8] sm:$0xff] }
 0x686   : > { %4559 = vst [vmem:[%s8612_s5 + $0x78] sm:$0xff] %v4494_v52  ;;  %v4501_v52 = vadd.f32 %v4437_v40, %v8441_v32  ;;  %v4443_v40 = vld [vmem:[%s7702_s24 + $0xe0] sm:$0xff] }
 0x687   : > { %4560 = vst [vmem:[%s8612_s5 + $0x80] sm:$0xff] %v4495_v55  ;;  %v4502_v55 = vadd.f32 %v4438_v43, %v8443_v33  ;;  %v4444_v43 = vld [vmem:[%s7702_s24 + $0xe8] sm:$0xff] }
 0x688   : > { %4561 = vst [vmem:[%s8612_s5 + $0x88] sm:$0xff] %v4496_v46  ;;  %v4503_v46 = vadd.f32 %v4439_v34, %v8448_v35  ;;  %v4445_v34 = vld [vmem:[%s7702_s24 + $0xf0] sm:$0xff] }
 0x689   : > { %4562 = vst [vmem:[%s8612_s5 + $0x90] sm:$0xff] %v4497_v49  ;;  %v4504_v49 = vadd.f32 %v4440_v58, %v8450_v36  ;;  %v4446_v58 = vld [vmem:[%s7702_s24 + $0xf8] sm:$0xff] }
 0x68a   : > { %4563 = vst [vmem:[%s8612_s5 + $0x98] sm:$0xff] %v4498_v13  ;;  %v4505_v13 = vadd.f32 %v4441_v31, %v8455_v38  ;;  %v4447_v31 = vld [vmem:[%s7702_s24 + $0x100] sm:$0xff] }
 0x68b   : > { %4564 = vst [vmem:[%s8612_s5 + $0xa0] sm:$0xff] %v4499_v4  ;;  %v4506_v4 = vadd.f32 %v4442_v3, %v8457_v39  ;;  %v4448_v3 = vld [vmem:[%s7702_s24 + $0x108] sm:$0xff] }
 0x68c   : > { %4565 = vst [vmem:[%s8612_s5 + $0xa8] sm:$0xff] %v4500_v22  ;;  %v4507_v22 = vadd.f32 %v4443_v40, %v8462_v41  ;;  %v4449_v40 = vld [vmem:[%s7702_s24 + $0x110] sm:$0xff] }
 0x68d   : > { %4566 = vst [vmem:[%s8612_s5 + $0xb0] sm:$0xff] %v4501_v52  ;;  %v4508_v52 = vadd.f32 %v4444_v43, %v8464_v42  ;;  %v4450_v43 = vld [vmem:[%s7702_s24 + $0x118] sm:$0xff] }
 0x68e   : > { %4567 = vst [vmem:[%s8612_s5 + $0xb8] sm:$0xff] %v4502_v55  ;;  %v4509_v55 = vadd.f32 %v4445_v34, %v8469_v44  ;;  %v4451_v34 = vld [vmem:[%s7702_s24 + $0x120] sm:$0xff] }
 0x68f   : > { %4568 = vst [vmem:[%s8612_s5 + $0xc0] sm:$0xff] %v4503_v46  ;;  %v4510_v46 = vadd.f32 %v4446_v58, %v8471_v45  ;;  %v4452_v58 = vld [vmem:[%s7702_s24 + $0x128] sm:$0xff] }
 0x690   : > { %4569 = vst [vmem:[%s8612_s5 + $0xc8] sm:$0xff] %v4504_v49  ;;  %v4511_v49 = vadd.f32 %v4447_v31, %v8476_v47  ;;  %v4453_v31 = vld [vmem:[%s7702_s24 + $0x130] sm:$0xff] }
 0x691   : > { %4570 = vst [vmem:[%s8612_s5 + $0xd0] sm:$0xff] %v4505_v13  ;;  %v4512_v13 = vadd.f32 %v4448_v3, %v8478_v48  ;;  %v4454_v3 = vld [vmem:[%s7702_s24 + $0x138] sm:$0xff] }
 0x692   : > { %4571 = vst [vmem:[%s8612_s5 + $0xd8] sm:$0xff] %v4506_v4  ;;  %v4513_v4 = vadd.f32 %v4449_v40, %v8483_v50  ;;  %v4455_v40 = vld [vmem:[%s7702_s24 + $0x140] sm:$0xff] }
 0x693   : > { %4572 = vst [vmem:[%s8612_s5 + $0xe0] sm:$0xff] %v4507_v22  ;;  %v4514_v22 = vadd.f32 %v4450_v43, %v8485_v51  ;;  %v4456_v43 = vld [vmem:[%s7702_s24 + $0x148] sm:$0xff] }
 0x694   : > { %4573 = vst [vmem:[%s8612_s5 + $0xe8] sm:$0xff] %v4508_v52  ;;  %v4515_v52 = vadd.f32 %v4451_v34, %v8490_v53  ;;  %v4457_v34 = vld [vmem:[%s7702_s24 + $0x150] sm:$0xff] }
 0x695   : > { %4574 = vst [vmem:[%s8612_s5 + $0xf0] sm:$0xff] %v4509_v55  ;;  %v4516_v55 = vadd.f32 %v4452_v58, %v8492_v54  ;;  %v4458_v58 = vld [vmem:[%s7702_s24 + $0x158] sm:$0xff] }
 0x696   : > { %4575 = vst [vmem:[%s8612_s5 + $0xf8] sm:$0xff] %v4510_v46  ;;  %v4517_v46 = vadd.f32 %v4453_v31, %v8497_v56  ;;  %v4459_v31 = vld [vmem:[%s7702_s24 + $0x160] sm:$0xff] }
 0x697   : > { %4576 = vst [vmem:[%s8612_s5 + $0x100] sm:$0xff] %v4511_v49  ;;  %v4518_v49 = vadd.f32 %v4454_v3, %v8499_v57  ;;  %v4460_v3 = vld [vmem:[%s7702_s24 + $0x168] sm:$0xff] }
 0x698   : > { %4577 = vst [vmem:[%s8612_s5 + $0x108] sm:$0xff] %v4512_v13  ;;  %v4519_v13 = vadd.f32 %v4455_v40, %v8504_v59  ;;  %v4461_v40 = vld [vmem:[%s7702_s24 + $0x170] sm:$0xff] }
 0x699   : > { %4578 = vst [vmem:[%s8612_s5 + $0x110] sm:$0xff] %v4513_v4  ;;  %v4520_v4 = vadd.f32 %v4456_v43, %v8506_v60  ;;  %v4462_v43 = vld [vmem:[%s7702_s24 + $0x178] sm:$0xff] }
 0x69a   : > { %4579 = vst [vmem:[%s8612_s5 + $0x118] sm:$0xff] %v4514_v22  ;;  %v4521_v22 = vadd.f32 %v4457_v34, %v8511_v62  ;;  %v4463_v34 = vld [vmem:[%s7702_s24 + $0x180] sm:$0xff] }
 0x69b   : > { %4580 = vst [vmem:[%s8612_s5 + $0x120] sm:$0xff] %v4515_v52  ;;  %v4522_v52 = vadd.f32 %v4458_v58, %v8513_v63  ;;  %v4464_v58 = vld [vmem:[%s7702_s24 + $0x188] sm:$0xff] }
 0x69c   : > { %4581 = vst [vmem:[%s8612_s5 + $0x128] sm:$0xff] %v4516_v55  ;;  %v4523_v55 = vadd.f32 %v4459_v31, %v8518_v7  ;;  %v4465_v31 = vld [vmem:[%s7702_s24 + $0x190] sm:$0xff] }
 0x69d   : > { %4582 = vst [vmem:[%s8612_s5 + $0x130] sm:$0xff] %v4517_v46  ;;  %v4524_v46 = vadd.f32 %v4460_v3, %v8520_v10  ;;  %v9306_v7 = vld [vmem:[#allocation36_spill] sm:$0xff]  ;;  %v4466_v3 = vld [vmem:[%s7702_s24 + $0x198] sm:$0xff] }
 0x69e   : > { %4583 = vst [vmem:[%s8612_s5 + $0x138] sm:$0xff] %v4518_v49  ;;  %v4525_v49 = vadd.f32 %v4461_v40, %v8525_v16  ;;  %v9307_v10 = vld [vmem:[#allocation37_spill] sm:$0xff]  ;;  %v4467_v40 = vld [vmem:[%s7702_s24 + $0x1a0] sm:$0xff] }
 0x69f   : > { %4584 = vst [vmem:[%s8612_s5 + $0x140] sm:$0xff] %v4519_v13  ;;  %v4526_v13 = vadd.f32 %v4462_v43, %v8527_v19  ;;  %v9308_v16 = vld [vmem:[#allocation38_spill] sm:$0xff]  ;;  %v4468_v43 = vld [vmem:[%s7702_s24 + $0x1a8] sm:$0xff] }
 0x6a0   : > { %4585 = vst [vmem:[%s8612_s5 + $0x148] sm:$0xff] %v4520_v4  ;;  %v4527_v4 = vadd.f32 %v4463_v34, %v9306_v7  ;;  %v9309_v19 = vld [vmem:[#allocation39_spill] sm:$0xff]  ;;  %v4469_v7 = vld [vmem:[%s7702_s24 + $0x1b0] sm:$0xff] }
 0x6a1   : > { %4586 = vst [vmem:[%s8612_s5 + $0x150] sm:$0xff] %v4521_v22  ;;  %v4528_v22 = vadd.f32 %v4464_v58, %v9307_v10  ;;  %v9310_v34 = vld [vmem:[#allocation40_spill] sm:$0xff]  ;;  %v4470_v10 = vld [vmem:[%s7702_s24 + $0x1b8] sm:$0xff] }
 0x6a2   : > { %4587 = vst [vmem:[%s8612_s5 + $0x158] sm:$0xff] %v4522_v52  ;;  %v4529_v52 = vadd.f32 %v4465_v31, %v9308_v16  ;;  %v9311_v58 = vld [vmem:[#allocation41_spill] sm:$0xff]  ;;  %v4471_v16 = vld [vmem:[%s7702_s24 + $0x1c0] sm:$0xff] }
 0x6a3   : > { %4588 = vst [vmem:[%s8612_s5 + $0x160] sm:$0xff] %v4523_v55  ;;  %v4530_v55 = vadd.f32 %v4466_v3, %v9309_v19  ;;  %v9312_v31 = vld [vmem:[#allocation42_spill] sm:$0xff]  ;;  %v4472_v19 = vld [vmem:[%s7702_s24 + $0x1c8] sm:$0xff] }
 0x6a4   : > { %4589 = vst [vmem:[%s8612_s5 + $0x168] sm:$0xff] %v4524_v46  ;;  %v4531_v46 = vadd.f32 %v4467_v40, %v9310_v34  ;;  %v9313_v3 = vld [vmem:[#allocation43_spill] sm:$0xff]  ;;  %v4473_v40 = vld [vmem:[%s7702_s24 + $0x1d0] sm:$0xff]  ;;  %v4475_v34 = vld [vmem:[%s7702_s24 + $0x1e0] sm:$0xff] }
 0x6a5   : > { %4590 = vst [vmem:[%s8612_s5 + $0x170] sm:$0xff] %v4525_v49  ;;  %v4532_v49 = vadd.f32 %v4468_v43, %v9311_v58  ;;  %v4474_v43 = vld [vmem:[%s7702_s24 + $0x1d8] sm:$0xff]  ;;  %v4539_v58 = vadd.f32 %v4475_v34, %v8574_v37 }
 0x6a6   : > { %4591 = vst [vmem:[%s8612_s5 + $0x178] sm:$0xff] %v4526_v13  ;;  %v4533_v13 = vadd.f32 %v4469_v7, %v9312_v31  ;;  %v4476_v7 = vld [vmem:[%s7702_s24 + $0x1e8] sm:$0xff] }
 0x6a7   : > { %4592 = vst [vmem:[%s8612_s5 + $0x180] sm:$0xff] %v4527_v4  ;;  %v4534_v4 = vadd.f32 %v4470_v10, %v9313_v3  ;;  %v4477_v10 = vld [vmem:[%s7702_s24 + $0x1f0] sm:$0xff]  ;;  %v9316_v3 = vld [vmem:[#allocation46_spill] sm:$0xff] }
 0x6a8   : > { %4593 = vst [vmem:[%s8612_s5 + $0x188] sm:$0xff] %v4528_v22  ;;  %v4535_v22 = vadd.f32 %v4471_v16, %v8560_v61  ;;  %v9314_v16 = vld [vmem:[#allocation44_spill] sm:$0xff] }
 0x6a9   : > { %4594 = vst [vmem:[%s8612_s5 + $0x190] sm:$0xff] %v4529_v52  ;;  %v4536_v52 = vadd.f32 %v4472_v19, %v8562_v0  ;;  %v4540_v31 = vadd.f32 %v4476_v7, %v9314_v16  ;;  %v9315_v19 = vld [vmem:[#allocation45_spill] sm:$0xff] }
 0x6aa   : > { %4595 = vst [vmem:[%s8612_s5 + $0x198] sm:$0xff] %v4530_v55  ;;  %v4537_v55 = vadd.f32 %v4473_v40, %v8567_v28 }
 0x6ab   : > { %4596 = vst [vmem:[%s8612_s5 + $0x1a0] sm:$0xff] %v4531_v46  ;;  %v4538_v46 = vadd.f32 %v4474_v43, %v8569_v25 }
 0x6ac   : > { %4597 = vst [vmem:[%s8612_s5 + $0x1a8] sm:$0xff] %v4532_v49  ;;  %v4478_v49 = vld [vmem:[%s7702_s24 + $0x1f8] sm:$0xff] }
 0x6ad   : > { %4598 = vst [vmem:[%s8612_s5 + $0x1b0] sm:$0xff] %v4533_v13  ;;  %v4541_v13 = vadd.f32 %v4477_v10, %v9315_v19  ;;  %v4542_v40 = vadd.f32 %v4478_v49, %v9316_v3 }
 0x6ae   : > { %4599 = vst [vmem:[%s8612_s5 + $0x1b8] sm:$0xff] %v4534_v4 }
 0x6af   : > { %4600 = vst [vmem:[%s8612_s5 + $0x1c0] sm:$0xff] %v4535_v22 }
 0x6b0   : > { %4601 = vst [vmem:[%s8612_s5 + $0x1c8] sm:$0xff] %v4536_v52 }
 0x6b1   : > { %4602 = vst [vmem:[%s8612_s5 + $0x1d0] sm:$0xff] %v4537_v55 }
 0x6b2   : > { %4603 = vst [vmem:[%s8612_s5 + $0x1d8] sm:$0xff] %v4538_v46 }
 0x6b3   : > { %4604 = vst [vmem:[%s8612_s5 + $0x1e0] sm:$0xff] %v4539_v58 }
 0x6b4   : > { %4605 = vst [vmem:[%s8612_s5 + $0x1e8] sm:$0xff] %v4540_v31 }
 0x6b5   : > { %4606 = vst [vmem:[%s8612_s5 + $0x1f0] sm:$0xff] %v4541_v13 }
 0x6b6   : > { %4607 = vst [vmem:[%s8612_s5 + $0x1f8] sm:$0xff] %v4542_v40 }
 0x6b7 PF: > { %4610 = sbr.rel (%p5761_p12) target bundleno = 1792 (0x700), region = 68  ;;  %s8798_s27 = scalar_lea.vmem (!%p5761_p12), [#allocation3], %s8369_s18 }
 0x6bc   : > { %v9318_v55 = vld [vmem:[#allocation30_spill] sm:$0xff]  ;;  %v9319_v49 = vld [vmem:[#allocation31_spill] sm:$0xff] }
 0x6bd   : > { %v4612_v4 = vld [vmem:[%s8798_s27] sm:$0xff]  ;;  %v4613_v22 = vld [vmem:[%s8798_s27 + $0x8] sm:$0xff]  ;;  %v4614_v43 = vld [vmem:[%s8798_s27 + $0x10] sm:$0xff] }
 0x6be   : > { %v4676_v52 = vadd.f32 %v4612_v4, %v8371_v1  ;;  %v4677_v34 = vadd.f32 %v4613_v22, %v8373_v2  ;;  %v4678_v7 = vadd.f32 %v4614_v43, %v9318_v55  ;;  %v4615_v46 = vld [vmem:[%s8798_s27 + $0x18] sm:$0xff]  ;;  %v4616_v10 = vld [vmem:[%s8798_s27 + $0x20] sm:$0xff]  ;;  %v4617_v58 = vld [vmem:[%s8798_s27 + $0x28] sm:$0xff] }
 0x6bf   : > { %v4679_v16 = vadd.f32 %v4615_v46, %v9319_v49  ;;  %v4618_v31 = vld [vmem:[%s8798_s27 + $0x30] sm:$0xff]  ;;  %v4680_v19 = vadd.f32 %v4616_v10, %v8379_v5  ;;  %v4619_v1 = vld [vmem:[%s8798_s27 + $0x38] sm:$0xff]  ;;  %v4681_v2 = vadd.f32 %v4617_v58, %v8381_v6  ;;  %v4620_v13 = vld [vmem:[%s8798_s27 + $0x40] sm:$0xff] }
 0x6c0   : > { %4740 = vst [vmem:[%s8798_s27] sm:$0xff] %v4676_v52  ;;  %v4682_v3 = vadd.f32 %v4618_v31, %v8386_v8  ;;  %v4621_v40 = vld [vmem:[%s8798_s27 + $0x48] sm:$0xff]  ;;  %v4683_v4 = vadd.f32 %v4619_v1, %v8388_v9  ;;  %v4622_v5 = vld [vmem:[%s8798_s27 + $0x50] sm:$0xff]  ;;  %v4684_v22 = vadd.f32 %v4620_v13, %v8392_v11  ;;  %v4623_v6 = vld [vmem:[%s8798_s27 + $0x58] sm:$0xff] }
 0x6c1   : > { %4741 = vst [vmem:[%s8798_s27 + $0x8] sm:$0xff] %v4677_v34  ;;  %v4685_v43 = vadd.f32 %v4621_v40, %v8394_v12  ;;  %v4624_v8 = vld [vmem:[%s8798_s27 + $0x60] sm:$0xff]  ;;  %v4686_v52 = vadd.f32 %v4622_v5, %v8398_v14  ;;  %v4625_v9 = vld [vmem:[%s8798_s27 + $0x68] sm:$0xff]  ;;  %v4687_v34 = vadd.f32 %v4623_v6, %v8400_v15  ;;  %v4626_v11 = vld [vmem:[%s8798_s27 + $0x70] sm:$0xff] }
 0x6c2   : > { %4742 = vst [vmem:[%s8798_s27 + $0x10] sm:$0xff] %v4678_v7  ;;  %v4688_v55 = vadd.f32 %v4624_v8, %v8404_v17  ;;  %v4627_v12 = vld [vmem:[%s8798_s27 + $0x78] sm:$0xff]  ;;  %v4689_v7 = vadd.f32 %v4625_v9, %v8406_v18  ;;  %v4628_v14 = vld [vmem:[%s8798_s27 + $0x80] sm:$0xff]  ;;  %v4690_v46 = vadd.f32 %v4626_v11, %v8413_v20  ;;  %v4629_v15 = vld [vmem:[%s8798_s27 + $0x88] sm:$0xff] }
 0x6c3   : > { %4743 = vst [vmem:[%s8798_s27 + $0x18] sm:$0xff] %v4679_v16  ;;  %v4691_v10 = vadd.f32 %v4627_v12, %v8415_v21  ;;  %v4630_v17 = vld [vmem:[%s8798_s27 + $0x90] sm:$0xff]  ;;  %v4692_v58 = vadd.f32 %v4628_v14, %v8420_v23  ;;  %v4631_v18 = vld [vmem:[%s8798_s27 + $0x98] sm:$0xff]  ;;  %v4693_v49 = vadd.f32 %v4629_v15, %v8422_v24  ;;  %v4632_v20 = vld [vmem:[%s8798_s27 + $0xa0] sm:$0xff] }
 0x6c4   : > { %4744 = vst [vmem:[%s8798_s27 + $0x20] sm:$0xff] %v4680_v19  ;;  %v4694_v16 = vadd.f32 %v4630_v17, %v8427_v26  ;;  %v4633_v21 = vld [vmem:[%s8798_s27 + $0xa8] sm:$0xff]  ;;  %v4695_v31 = vadd.f32 %v4631_v18, %v8429_v27  ;;  %v4634_v23 = vld [vmem:[%s8798_s27 + $0xb0] sm:$0xff]  ;;  %v4696_v19 = vadd.f32 %v4632_v20, %v8434_v29  ;;  %v4635_v24 = vld [vmem:[%s8798_s27 + $0xb8] sm:$0xff] }
 0x6c5   : > { %4745 = vst [vmem:[%s8798_s27 + $0x28] sm:$0xff] %v4681_v2  ;;  %v4697_v1 = vadd.f32 %v4633_v21, %v8436_v30  ;;  %v4636_v26 = vld [vmem:[%s8798_s27 + $0xc0] sm:$0xff]  ;;  %v4698_v2 = vadd.f32 %v4634_v23, %v8441_v32  ;;  %v4637_v27 = vld [vmem:[%s8798_s27 + $0xc8] sm:$0xff]  ;;  %v4699_v13 = vadd.f32 %v4635_v24, %v8443_v33  ;;  %v4638_v29 = vld [vmem:[%s8798_s27 + $0xd0] sm:$0xff] }
 0x6c6   : > { %4746 = vst [vmem:[%s8798_s27 + $0x30] sm:$0xff] %v4682_v3  ;;  %v4700_v3 = vadd.f32 %v4636_v26, %v8448_v35  ;;  %v4639_v30 = vld [vmem:[%s8798_s27 + $0xd8] sm:$0xff]  ;;  %v4701_v40 = vadd.f32 %v4637_v27, %v8450_v36  ;;  %v4640_v32 = vld [vmem:[%s8798_s27 + $0xe0] sm:$0xff]  ;;  %v4641_v33 = vld [vmem:[%s8798_s27 + $0xe8] sm:$0xff] }
 0x6c7   : > { %4747 = vst [vmem:[%s8798_s27 + $0x38] sm:$0xff] %v4683_v4  ;;  %v4702_v4 = vadd.f32 %v4638_v29, %v8455_v38  ;;  %v4703_v5 = vadd.f32 %v4639_v30, %v8457_v39  ;;  %v4642_v35 = vld [vmem:[%s8798_s27 + $0xf0] sm:$0xff]  ;;  %v4643_v36 = vld [vmem:[%s8798_s27 + $0xf8] sm:$0xff]  ;;  %v4705_v6 = vadd.f32 %v4641_v33, %v8464_v42  ;;  %v4644_v38 = vld [vmem:[%s8798_s27 + $0x100] sm:$0xff] }
 0x6c8   : > { %4748 = vst [vmem:[%s8798_s27 + $0x40] sm:$0xff] %v4684_v22  ;;  %v4704_v22 = vadd.f32 %v4640_v32, %v8462_v41  ;;  %v4645_v39 = vld [vmem:[%s8798_s27 + $0x108] sm:$0xff]  ;;  %v4707_v8 = vadd.f32 %v4643_v36, %v8471_v45  ;;  %v4646_v41 = vld [vmem:[%s8798_s27 + $0x110] sm:$0xff]  ;;  %v4647_v42 = vld [vmem:[%s8798_s27 + $0x118] sm:$0xff] }
 0x6c9   : > { %4749 = vst [vmem:[%s8798_s27 + $0x48] sm:$0xff] %v4685_v43  ;;  %v4706_v43 = vadd.f32 %v4642_v35, %v8469_v44  ;;  %v4709_v9 = vadd.f32 %v4645_v39, %v8478_v48  ;;  %v4648_v44 = vld [vmem:[%s8798_s27 + $0x120] sm:$0xff]  ;;  %v4649_v45 = vld [vmem:[%s8798_s27 + $0x128] sm:$0xff]  ;;  %v4711_v11 = vadd.f32 %v4647_v42, %v8485_v51  ;;  %v4651_v48 = vld [vmem:[%s8798_s27 + $0x138] sm:$0xff] }
 0x6ca   : > { %4750 = vst [vmem:[%s8798_s27 + $0x50] sm:$0xff] %v4686_v52  ;;  %v4708_v52 = vadd.f32 %v4644_v38, %v8476_v47  ;;  %v4650_v47 = vld [vmem:[%s8798_s27 + $0x130] sm:$0xff]  ;;  %v4713_v12 = vadd.f32 %v4649_v45, %v8492_v54  ;;  %v4653_v51 = vld [vmem:[%s8798_s27 + $0x148] sm:$0xff]  ;;  %v4715_v14 = vadd.f32 %v4651_v48, %v8499_v57  ;;  %v4655_v54 = vld [vmem:[%s8798_s27 + $0x158] sm:$0xff] }
 0x6cb   : > { %4751 = vst [vmem:[%s8798_s27 + $0x58] sm:$0xff] %v4687_v34  ;;  %v4710_v34 = vadd.f32 %v4646_v41, %v8483_v50  ;;  %v4652_v50 = vld [vmem:[%s8798_s27 + $0x140] sm:$0xff]  ;;  %v4717_v15 = vadd.f32 %v4653_v51, %v8506_v60  ;;  %v4657_v57 = vld [vmem:[%s8798_s27 + $0x168] sm:$0xff]  ;;  %v4719_v17 = vadd.f32 %v4655_v54, %v8513_v63  ;;  %v4659_v60 = vld [vmem:[%s8798_s27 + $0x178] sm:$0xff] }
 0x6cc   : > { %4752 = vst [vmem:[%s8798_s27 + $0x60] sm:$0xff] %v4688_v55  ;;  %v4712_v55 = vadd.f32 %v4648_v44, %v8490_v53  ;;  %v4654_v53 = vld [vmem:[%s8798_s27 + $0x150] sm:$0xff]  ;;  %v4661_v63 = vld [vmem:[%s8798_s27 + $0x188] sm:$0xff]  ;;  %v4663_v26 = vld [vmem:[%s8798_s27 + $0x198] sm:$0xff] }
 0x6cd   : > { %4753 = vst [vmem:[%s8798_s27 + $0x68] sm:$0xff] %v4689_v7  ;;  %v4714_v7 = vadd.f32 %v4650_v47, %v8497_v56  ;;  %v4656_v56 = vld [vmem:[%s8798_s27 + $0x160] sm:$0xff]  ;;  %v9324_v24 = vld [vmem:[#allocation36_spill] sm:$0xff]  ;;  %v4665_v30 = vld [vmem:[%s8798_s27 + $0x1a8] sm:$0xff] }
 0x6ce   : > { %4754 = vst [vmem:[%s8798_s27 + $0x70] sm:$0xff] %v4690_v46  ;;  %v4716_v46 = vadd.f32 %v4652_v50, %v8504_v59  ;;  %v4658_v59 = vld [vmem:[%s8798_s27 + $0x170] sm:$0xff]  ;;  %v9326_v29 = vld [vmem:[#allocation38_spill] sm:$0xff]  ;;  %v4667_v35 = vld [vmem:[%s8798_s27 + $0x1b8] sm:$0xff] }
 0x6cf   : > { %4755 = vst [vmem:[%s8798_s27 + $0x78] sm:$0xff] %v4691_v10  ;;  %v4718_v10 = vadd.f32 %v4654_v53, %v8511_v62  ;;  %v4660_v62 = vld [vmem:[%s8798_s27 + $0x180] sm:$0xff]  ;;  %v9328_v33 = vld [vmem:[#allocation40_spill] sm:$0xff]  ;;  %v4669_v39 = vld [vmem:[%s8798_s27 + $0x1c8] sm:$0xff] }
 0x6d0   : > { %4756 = vst [vmem:[%s8798_s27 + $0x80] sm:$0xff] %v4692_v58  ;;  %v9320_v58 = vld [vmem:[#allocation32_spill] sm:$0xff]  ;;  %v9330_v38 = vld [vmem:[#allocation42_spill] sm:$0xff]  ;;  %v4733_v44 = vadd.f32 %v4669_v39, %v8562_v0  ;;  %v4675_v48 = vld [vmem:[%s8798_s27 + $0x1f8] sm:$0xff] }
 0x6d1   : > { %4757 = vst [vmem:[%s8798_s27 + $0x88] sm:$0xff] %v4693_v49  ;;  %v4720_v18 = vadd.f32 %v4656_v56, %v9320_v58  ;;  %v9321_v49 = vld [vmem:[#allocation33_spill] sm:$0xff]  ;;  %v9334_v51 = vld [vmem:[#allocation46_spill] sm:$0xff] }
 0x6d2   : > { %4758 = vst [vmem:[%s8798_s27 + $0x90] sm:$0xff] %v4694_v16  ;;  %v4721_v20 = vadd.f32 %v4657_v57, %v9321_v49  ;;  %v9322_v16 = vld [vmem:[#allocation34_spill] sm:$0xff]  ;;  %v9333_v50 = vld [vmem:[#allocation45_spill] sm:$0xff] }
 0x6d3   : > { %4759 = vst [vmem:[%s8798_s27 + $0x98] sm:$0xff] %v4695_v31  ;;  %v4722_v21 = vadd.f32 %v4658_v59, %v9322_v16  ;;  %v9323_v31 = vld [vmem:[#allocation35_spill] sm:$0xff] }
 0x6d4   : > { %4760 = vst [vmem:[%s8798_s27 + $0xa0] sm:$0xff] %v4696_v19  ;;  %v4723_v23 = vadd.f32 %v4659_v60, %v9323_v31  ;;  %v4662_v19 = vld [vmem:[%s8798_s27 + $0x190] sm:$0xff] }
 0x6d5   : > { %4761 = vst [vmem:[%s8798_s27 + $0xa8] sm:$0xff] %v4697_v1  ;;  %v4724_v1 = vadd.f32 %v4660_v62, %v9324_v24 }
 0x6d6   : > { %4762 = vst [vmem:[%s8798_s27 + $0xb0] sm:$0xff] %v4698_v2  ;;  %v9325_v2 = vld [vmem:[#allocation37_spill] sm:$0xff] }
 0x6d7   : > { %4763 = vst [vmem:[%s8798_s27 + $0xb8] sm:$0xff] %v4699_v13  ;;  %v4725_v27 = vadd.f32 %v4661_v63, %v9325_v2  ;;  %v4664_v13 = vld [vmem:[%s8798_s27 + $0x1a0] sm:$0xff] }
 0x6d8   : > { %4764 = vst [vmem:[%s8798_s27 + $0xc0] sm:$0xff] %v4700_v3  ;;  %v4726_v3 = vadd.f32 %v4662_v19, %v9326_v29 }
 0x6d9   : > { %4765 = vst [vmem:[%s8798_s27 + $0xc8] sm:$0xff] %v4701_v40  ;;  %v9327_v40 = vld [vmem:[#allocation39_spill] sm:$0xff] }
 0x6da   : > { %4766 = vst [vmem:[%s8798_s27 + $0xd0] sm:$0xff] %v4702_v4  ;;  %v4727_v32 = vadd.f32 %v4663_v26, %v9327_v40  ;;  %v4666_v4 = vld [vmem:[%s8798_s27 + $0x1b0] sm:$0xff] }
 0x6db   : > { %4767 = vst [vmem:[%s8798_s27 + $0xd8] sm:$0xff] %v4703_v5  ;;  %v4728_v5 = vadd.f32 %v4664_v13, %v9328_v33 }
 0x6dc   : > { %4768 = vst [vmem:[%s8798_s27 + $0xe0] sm:$0xff] %v4704_v22  ;;  %v9329_v22 = vld [vmem:[#allocation41_spill] sm:$0xff] }
 0x6dd   : > { %4769 = vst [vmem:[%s8798_s27 + $0xe8] sm:$0xff] %v4705_v6  ;;  %v4729_v36 = vadd.f32 %v4665_v30, %v9329_v22  ;;  %v4668_v6 = vld [vmem:[%s8798_s27 + $0x1c0] sm:$0xff] }
 0x6de   : > { %4770 = vst [vmem:[%s8798_s27 + $0xf0] sm:$0xff] %v4706_v43  ;;  %v4730_v43 = vadd.f32 %v4666_v4, %v9330_v38  ;;  %v4732_v42 = vadd.f32 %v4668_v6, %v8560_v61 }
 0x6df   : > { %4771 = vst [vmem:[%s8798_s27 + $0xf8] sm:$0xff] %v4707_v8  ;;  %v9331_v8 = vld [vmem:[#allocation43_spill] sm:$0xff] }
 0x6e0   : > { %4772 = vst [vmem:[%s8798_s27 + $0x100] sm:$0xff] %v4708_v52  ;;  %v4731_v41 = vadd.f32 %v4667_v35, %v9331_v8  ;;  %v4670_v52 = vld [vmem:[%s8798_s27 + $0x1d0] sm:$0xff] }
 0x6e1   : > { %4773 = vst [vmem:[%s8798_s27 + $0x108] sm:$0xff] %v4709_v9  ;;  %v4671_v9 = vld [vmem:[%s8798_s27 + $0x1d8] sm:$0xff]  ;;  %v4734_v45 = vadd.f32 %v4670_v52, %v8567_v28  ;;  %v4739_v28 = vadd.f32 %v4675_v48, %v9334_v51 }
 0x6e2   : > { %4774 = vst [vmem:[%s8798_s27 + $0x110] sm:$0xff] %v4710_v34  ;;  %v4672_v34 = vld [vmem:[%s8798_s27 + $0x1e0] sm:$0xff]  ;;  %v4735_v47 = vadd.f32 %v4671_v9, %v8569_v25 }
 0x6e3   : > { %4775 = vst [vmem:[%s8798_s27 + $0x118] sm:$0xff] %v4711_v11  ;;  %v4673_v11 = vld [vmem:[%s8798_s27 + $0x1e8] sm:$0xff]  ;;  %v4736_v61 = vadd.f32 %v4672_v34, %v8574_v37 }
 0x6e4   : > { %4776 = vst [vmem:[%s8798_s27 + $0x120] sm:$0xff] %v4712_v55  ;;  %v4674_v55 = vld [vmem:[%s8798_s27 + $0x1f0] sm:$0xff] }
 0x6e5   : > { %4777 = vst [vmem:[%s8798_s27 + $0x128] sm:$0xff] %v4713_v12  ;;  %v9332_v12 = vld [vmem:[#allocation44_spill] sm:$0xff] }
 0x6e6   : > { %4778 = vst [vmem:[%s8798_s27 + $0x130] sm:$0xff] %v4714_v7  ;;  %v4737_v0 = vadd.f32 %v4673_v11, %v9332_v12  ;;  %v4738_v7 = vadd.f32 %v4674_v55, %v9333_v50 }
 0x6e7   : > { %4779 = vst [vmem:[%s8798_s27 + $0x138] sm:$0xff] %v4715_v14 }
 0x6e8   : > { %4780 = vst [vmem:[%s8798_s27 + $0x140] sm:$0xff] %v4716_v46 }
 0x6e9   : > { %4781 = vst [vmem:[%s8798_s27 + $0x148] sm:$0xff] %v4717_v15 }
 0x6ea   : > { %4782 = vst [vmem:[%s8798_s27 + $0x150] sm:$0xff] %v4718_v10 }
 0x6eb   : > { %4783 = vst [vmem:[%s8798_s27 + $0x158] sm:$0xff] %v4719_v17 }
 0x6ec   : > { %4784 = vst [vmem:[%s8798_s27 + $0x160] sm:$0xff] %v4720_v18 }
 0x6ed   : > { %4785 = vst [vmem:[%s8798_s27 + $0x168] sm:$0xff] %v4721_v20 }
 0x6ee   : > { %4786 = vst [vmem:[%s8798_s27 + $0x170] sm:$0xff] %v4722_v21 }
 0x6ef   : > { %4787 = vst [vmem:[%s8798_s27 + $0x178] sm:$0xff] %v4723_v23 }
 0x6f0   : > { %4788 = vst [vmem:[%s8798_s27 + $0x180] sm:$0xff] %v4724_v1 }
 0x6f1   : > { %4789 = vst [vmem:[%s8798_s27 + $0x188] sm:$0xff] %v4725_v27 }
 0x6f2   : > { %4790 = vst [vmem:[%s8798_s27 + $0x190] sm:$0xff] %v4726_v3 }
 0x6f3   : > { %4791 = vst [vmem:[%s8798_s27 + $0x198] sm:$0xff] %v4727_v32 }
 0x6f4   : > { %4792 = vst [vmem:[%s8798_s27 + $0x1a0] sm:$0xff] %v4728_v5 }
 0x6f5   : > { %4793 = vst [vmem:[%s8798_s27 + $0x1a8] sm:$0xff] %v4729_v36 }
 0x6f6   : > { %4794 = vst [vmem:[%s8798_s27 + $0x1b0] sm:$0xff] %v4730_v43 }
 0x6f7   : > { %4795 = vst [vmem:[%s8798_s27 + $0x1b8] sm:$0xff] %v4731_v41 }
 0x6f8   : > { %4796 = vst [vmem:[%s8798_s27 + $0x1c0] sm:$0xff] %v4732_v42 }
 0x6f9   : > { %4797 = vst [vmem:[%s8798_s27 + $0x1c8] sm:$0xff] %v4733_v44 }
 0x6fa   : > { %4798 = vst [vmem:[%s8798_s27 + $0x1d0] sm:$0xff] %v4734_v45 }
 0x6fb   : > { %4799 = vst [vmem:[%s8798_s27 + $0x1d8] sm:$0xff] %v4735_v47 }
 0x6fc   : > { %4800 = vst [vmem:[%s8798_s27 + $0x1e0] sm:$0xff] %v4736_v61 }
 0x6fd   : > { %4801 = vst [vmem:[%s8798_s27 + $0x1e8] sm:$0xff] %v4737_v0 }
 0x6fe   : > { %4802 = vst [vmem:[%s8798_s27 + $0x1f0] sm:$0xff] %v4738_v7 }
 0x6ff   : > { %4803 = vst [vmem:[%s8798_s27 + $0x1f8] sm:$0xff] %v4739_v28 }
 0x700 PF: > { %s9335_s24 = sld [smem:[#allocation22_spill]] }
 0x706   : > { %p6417_p8 = scmp.ne.s32.totalorder %s9335_s24, 2 }
 0x707   : > { %s8994_s1 = scalar_lea.vmem (!%p6417_p8), [#allocation3], %s8369_s18 }
 0x708   : > { %4807 = sbr.rel (%p6417_p8) target bundleno = 1870 (0x74e), region = 72 }
 0x70d   : > { %v4809_v25 = vld [vmem:[%s8994_s1] sm:$0xff]  ;;  %v4810_v37 = vld [vmem:[%s8994_s1 + $0x8] sm:$0xff]  ;;  %v4811_v14 = vld [vmem:[%s8994_s1 + $0x10] sm:$0xff] }
 0x70e   : > { %4873 = vst [vmem:[%s7711_s10] sm:$0xff] %v4809_v25  ;;  %v4812_v53 = vld [vmem:[%s8994_s1 + $0x18] sm:$0xff]  ;;  %v4813_v46 = vld [vmem:[%s8994_s1 + $0x20] sm:$0xff]  ;;  %v4814_v54 = vld [vmem:[%s8994_s1 + $0x28] sm:$0xff] }
 0x70f   : > { %4874 = vst [vmem:[%s7711_s10 + $0x8] sm:$0xff] %v4810_v37  ;;  %v4815_v15 = vld [vmem:[%s8994_s1 + $0x30] sm:$0xff]  ;;  %v4816_v56 = vld [vmem:[%s8994_s1 + $0x38] sm:$0xff]  ;;  %v4817_v10 = vld [vmem:[%s8994_s1 + $0x40] sm:$0xff] }
 0x710   : > { %4875 = vst [vmem:[%s7711_s10 + $0x10] sm:$0xff] %v4811_v14  ;;  %v4818_v57 = vld [vmem:[%s8994_s1 + $0x48] sm:$0xff]  ;;  %v4819_v17 = vld [vmem:[%s8994_s1 + $0x50] sm:$0xff]  ;;  %v4820_v59 = vld [vmem:[%s8994_s1 + $0x58] sm:$0xff] }
 0x711   : > { %4876 = vst [vmem:[%s7711_s10 + $0x18] sm:$0xff] %v4812_v53  ;;  %v4821_v58 = vld [vmem:[%s8994_s1 + $0x60] sm:$0xff]  ;;  %v4822_v18 = vld [vmem:[%s8994_s1 + $0x68] sm:$0xff]  ;;  %v4823_v60 = vld [vmem:[%s8994_s1 + $0x70] sm:$0xff] }
 0x712   : > { %4877 = vst [vmem:[%s7711_s10 + $0x20] sm:$0xff] %v4813_v46  ;;  %v4824_v49 = vld [vmem:[%s8994_s1 + $0x78] sm:$0xff]  ;;  %v4825_v20 = vld [vmem:[%s8994_s1 + $0x80] sm:$0xff]  ;;  %v4826_v62 = vld [vmem:[%s8994_s1 + $0x88] sm:$0xff] }
 0x713   : > { %4878 = vst [vmem:[%s7711_s10 + $0x28] sm:$0xff] %v4814_v54  ;;  %v4827_v16 = vld [vmem:[%s8994_s1 + $0x90] sm:$0xff]  ;;  %v4828_v21 = vld [vmem:[%s8994_s1 + $0x98] sm:$0xff]  ;;  %v4829_v63 = vld [vmem:[%s8994_s1 + $0xa0] sm:$0xff] }
 0x714   : > { %4879 = vst [vmem:[%s7711_s10 + $0x30] sm:$0xff] %v4815_v15  ;;  %v4830_v31 = vld [vmem:[%s8994_s1 + $0xa8] sm:$0xff]  ;;  %v4831_v23 = vld [vmem:[%s8994_s1 + $0xb0] sm:$0xff]  ;;  %v4832_v19 = vld [vmem:[%s8994_s1 + $0xb8] sm:$0xff] }
 0x715   : > { %4880 = vst [vmem:[%s7711_s10 + $0x38] sm:$0xff] %v4816_v56  ;;  %v4833_v24 = vld [vmem:[%s8994_s1 + $0xc0] sm:$0xff]  ;;  %v4834_v1 = vld [vmem:[%s8994_s1 + $0xc8] sm:$0xff]  ;;  %v4835_v26 = vld [vmem:[%s8994_s1 + $0xd0] sm:$0xff] }
 0x716   : > { %4881 = vst [vmem:[%s7711_s10 + $0x40] sm:$0xff] %v4817_v10  ;;  %v4836_v2 = vld [vmem:[%s8994_s1 + $0xd8] sm:$0xff]  ;;  %v4837_v27 = vld [vmem:[%s8994_s1 + $0xe0] sm:$0xff]  ;;  %v4838_v13 = vld [vmem:[%s8994_s1 + $0xe8] sm:$0xff] }
 0x717   : > { %4882 = vst [vmem:[%s7711_s10 + $0x48] sm:$0xff] %v4818_v57  ;;  %v4839_v29 = vld [vmem:[%s8994_s1 + $0xf0] sm:$0xff]  ;;  %v4840_v3 = vld [vmem:[%s8994_s1 + $0xf8] sm:$0xff]  ;;  %v4841_v30 = vld [vmem:[%s8994_s1 + $0x100] sm:$0xff] }
 0x718   : > { %4883 = vst [vmem:[%s7711_s10 + $0x50] sm:$0xff] %v4819_v17  ;;  %v4842_v40 = vld [vmem:[%s8994_s1 + $0x108] sm:$0xff]  ;;  %v4843_v32 = vld [vmem:[%s8994_s1 + $0x110] sm:$0xff]  ;;  %v4844_v4 = vld [vmem:[%s8994_s1 + $0x118] sm:$0xff] }
 0x719   : > { %4884 = vst [vmem:[%s7711_s10 + $0x58] sm:$0xff] %v4820_v59  ;;  %v4845_v33 = vld [vmem:[%s8994_s1 + $0x120] sm:$0xff]  ;;  %v4846_v5 = vld [vmem:[%s8994_s1 + $0x128] sm:$0xff]  ;;  %v4847_v35 = vld [vmem:[%s8994_s1 + $0x130] sm:$0xff] }
 0x71a   : > { %4885 = vst [vmem:[%s7711_s10 + $0x60] sm:$0xff] %v4821_v58  ;;  %v4848_v22 = vld [vmem:[%s8994_s1 + $0x138] sm:$0xff]  ;;  %v4849_v36 = vld [vmem:[%s8994_s1 + $0x140] sm:$0xff]  ;;  %v4850_v6 = vld [vmem:[%s8994_s1 + $0x148] sm:$0xff] }
 0x71b   : > { %4886 = vst [vmem:[%s7711_s10 + $0x68] sm:$0xff] %v4822_v18  ;;  %v4851_v38 = vld [vmem:[%s8994_s1 + $0x150] sm:$0xff]  ;;  %v4852_v43 = vld [vmem:[%s8994_s1 + $0x158] sm:$0xff]  ;;  %v4853_v39 = vld [vmem:[%s8994_s1 + $0x160] sm:$0xff] }
 0x71c   : > { %4887 = vst [vmem:[%s7711_s10 + $0x70] sm:$0xff] %v4823_v60  ;;  %v4854_v8 = vld [vmem:[%s8994_s1 + $0x168] sm:$0xff]  ;;  %v4855_v41 = vld [vmem:[%s8994_s1 + $0x170] sm:$0xff]  ;;  %v4856_v52 = vld [vmem:[%s8994_s1 + $0x178] sm:$0xff] }
 0x71d   : > { %4888 = vst [vmem:[%s7711_s10 + $0x78] sm:$0xff] %v4824_v49  ;;  %v4857_v42 = vld [vmem:[%s8994_s1 + $0x180] sm:$0xff]  ;;  %v4858_v9 = vld [vmem:[%s8994_s1 + $0x188] sm:$0xff]  ;;  %v4859_v44 = vld [vmem:[%s8994_s1 + $0x190] sm:$0xff] }
 0x71e   : > { %4889 = vst [vmem:[%s7711_s10 + $0x80] sm:$0xff] %v4825_v20  ;;  %v4860_v34 = vld [vmem:[%s8994_s1 + $0x198] sm:$0xff]  ;;  %v4861_v45 = vld [vmem:[%s8994_s1 + $0x1a0] sm:$0xff]  ;;  %v4862_v11 = vld [vmem:[%s8994_s1 + $0x1a8] sm:$0xff] }
 0x71f   : > { %4890 = vst [vmem:[%s7711_s10 + $0x88] sm:$0xff] %v4826_v62  ;;  %v4863_v47 = vld [vmem:[%s8994_s1 + $0x1b0] sm:$0xff]  ;;  %v4864_v55 = vld [vmem:[%s8994_s1 + $0x1b8] sm:$0xff]  ;;  %v4865_v61 = vld [vmem:[%s8994_s1 + $0x1c0] sm:$0xff] }
 0x720   : > { %4891 = vst [vmem:[%s7711_s10 + $0x90] sm:$0xff] %v4827_v16  ;;  %v4866_v48 = vld [vmem:[%s8994_s1 + $0x1c8] sm:$0xff]  ;;  %v4867_v12 = vld [vmem:[%s8994_s1 + $0x1d0] sm:$0xff]  ;;  %v4868_v0 = vld [vmem:[%s8994_s1 + $0x1d8] sm:$0xff] }
 0x721   : > { %4892 = vst [vmem:[%s7711_s10 + $0x98] sm:$0xff] %v4828_v21  ;;  %v4869_v50 = vld [vmem:[%s8994_s1 + $0x1e0] sm:$0xff]  ;;  %v4870_v7 = vld [vmem:[%s8994_s1 + $0x1e8] sm:$0xff]  ;;  %v4871_v51 = vld [vmem:[%s8994_s1 + $0x1f0] sm:$0xff] }
 0x722   : > { %4893 = vst [vmem:[%s7711_s10 + $0xa0] sm:$0xff] %v4829_v63  ;;  %v4872_v28 = vld [vmem:[%s8994_s1 + $0x1f8] sm:$0xff] }
 0x723   : > { %4894 = vst [vmem:[%s7711_s10 + $0xa8] sm:$0xff] %v4830_v31 }
 0x724   : > { %4895 = vst [vmem:[%s7711_s10 + $0xb0] sm:$0xff] %v4831_v23 }
 0x725   : > { %4896 = vst [vmem:[%s7711_s10 + $0xb8] sm:$0xff] %v4832_v19 }
 0x726   : > { %4897 = vst [vmem:[%s7711_s10 + $0xc0] sm:$0xff] %v4833_v24 }
 0x727   : > { %4898 = vst [vmem:[%s7711_s10 + $0xc8] sm:$0xff] %v4834_v1 }
 0x728   : > { %4899 = vst [vmem:[%s7711_s10 + $0xd0] sm:$0xff] %v4835_v26 }
 0x729   : > { %4900 = vst [vmem:[%s7711_s10 + $0xd8] sm:$0xff] %v4836_v2 }
 0x72a   : > { %4901 = vst [vmem:[%s7711_s10 + $0xe0] sm:$0xff] %v4837_v27 }
 0x72b   : > { %4902 = vst [vmem:[%s7711_s10 + $0xe8] sm:$0xff] %v4838_v13 }
 0x72c   : > { %4903 = vst [vmem:[%s7711_s10 + $0xf0] sm:$0xff] %v4839_v29 }
 0x72d   : > { %4904 = vst [vmem:[%s7711_s10 + $0xf8] sm:$0xff] %v4840_v3 }
 0x72e   : > { %4905 = vst [vmem:[%s7711_s10 + $0x100] sm:$0xff] %v4841_v30 }
 0x72f   : > { %4906 = vst [vmem:[%s7711_s10 + $0x108] sm:$0xff] %v4842_v40 }
 0x730   : > { %4907 = vst [vmem:[%s7711_s10 + $0x110] sm:$0xff] %v4843_v32 }
 0x731   : > { %4908 = vst [vmem:[%s7711_s10 + $0x118] sm:$0xff] %v4844_v4 }
 0x732   : > { %4909 = vst [vmem:[%s7711_s10 + $0x120] sm:$0xff] %v4845_v33 }
 0x733   : > { %4910 = vst [vmem:[%s7711_s10 + $0x128] sm:$0xff] %v4846_v5 }
 0x734   : > { %4911 = vst [vmem:[%s7711_s10 + $0x130] sm:$0xff] %v4847_v35 }
 0x735   : > { %4912 = vst [vmem:[%s7711_s10 + $0x138] sm:$0xff] %v4848_v22 }
 0x736   : > { %4913 = vst [vmem:[%s7711_s10 + $0x140] sm:$0xff] %v4849_v36 }
 0x737   : > { %4914 = vst [vmem:[%s7711_s10 + $0x148] sm:$0xff] %v4850_v6 }
 0x738   : > { %4915 = vst [vmem:[%s7711_s10 + $0x150] sm:$0xff] %v4851_v38 }
 0x739   : > { %4916 = vst [vmem:[%s7711_s10 + $0x158] sm:$0xff] %v4852_v43 }
 0x73a   : > { %4917 = vst [vmem:[%s7711_s10 + $0x160] sm:$0xff] %v4853_v39 }
 0x73b   : > { %4918 = vst [vmem:[%s7711_s10 + $0x168] sm:$0xff] %v4854_v8 }
 0x73c   : > { %4919 = vst [vmem:[%s7711_s10 + $0x170] sm:$0xff] %v4855_v41 }
 0x73d   : > { %4920 = vst [vmem:[%s7711_s10 + $0x178] sm:$0xff] %v4856_v52 }
 0x73e   : > { %4921 = vst [vmem:[%s7711_s10 + $0x180] sm:$0xff] %v4857_v42 }
 0x73f   : > { %4922 = vst [vmem:[%s7711_s10 + $0x188] sm:$0xff] %v4858_v9 }
 0x740   : > { %4923 = vst [vmem:[%s7711_s10 + $0x190] sm:$0xff] %v4859_v44 }
 0x741   : > { %4924 = vst [vmem:[%s7711_s10 + $0x198] sm:$0xff] %v4860_v34 }
 0x742   : > { %4925 = vst [vmem:[%s7711_s10 + $0x1a0] sm:$0xff] %v4861_v45 }
 0x743   : > { %4926 = vst [vmem:[%s7711_s10 + $0x1a8] sm:$0xff] %v4862_v11 }
 0x744   : > { %4927 = vst [vmem:[%s7711_s10 + $0x1b0] sm:$0xff] %v4863_v47 }
 0x745   : > { %4928 = vst [vmem:[%s7711_s10 + $0x1b8] sm:$0xff] %v4864_v55 }
 0x746   : > { %4929 = vst [vmem:[%s7711_s10 + $0x1c0] sm:$0xff] %v4865_v61 }
 0x747   : > { %4930 = vst [vmem:[%s7711_s10 + $0x1c8] sm:$0xff] %v4866_v48 }
 0x748   : > { %4931 = vst [vmem:[%s7711_s10 + $0x1d0] sm:$0xff] %v4867_v12 }
 0x749   : > { %4932 = vst [vmem:[%s7711_s10 + $0x1d8] sm:$0xff] %v4868_v0 }
 0x74a   : > { %4933 = vst [vmem:[%s7711_s10 + $0x1e0] sm:$0xff] %v4869_v50 }
 0x74b   : > { %4934 = vst [vmem:[%s7711_s10 + $0x1e8] sm:$0xff] %v4870_v7 }
 0x74c   : > { %4935 = vst [vmem:[%s7711_s10 + $0x1f0] sm:$0xff] %v4871_v51 }
 0x74d   : > { %4936 = vst [vmem:[%s7711_s10 + $0x1f8] sm:$0xff] %v4872_v28 }
 0x74e PF: > { %s9336_s20 = sld [smem:[#allocation21_spill]]  ;;  %s4950_s11 = sshll.u32 %s7711_s10, 4  ;;  %s4951_s11 = int_to_ptr.vmem [resolvable:$true] %s4950_s11 }
 0x74f   : > { %s9338_s2 = sld [smem:[#allocation50_spill]]  ;;  %s4938_s26 = scalar_lea.sflag [#allocation7], %s305_s4 }
 0x754   : > { %s6746_s0 = sshll.u32 %s9336_s20, 9 }
 0x755   : > { %s4949_s18 = scalar_lea.hbm %s9338_s2, %s6746_s0  ;;  %s7234_s27 = scalar_lea.hbm %s9338_s2, 1024 }
 0x756   : > { %s4952_s9 = sshll.u32 %s4949_s18, 4  ;;  %s4953_s9 = int_to_ptr.hbm [resolvable:$true] %s4952_s9 }
 0x757   : > { %s7228_s23 = sshra.s32 %s4953_s9, 4  ;;  %s7229_s23 = int_to_ptr.hbm [resolvable:$true] %s7228_s23 }
 0x758   : > { %s7230_s15 = scalar_lea.hbm %s7229_s23, 512  ;;  %p7235_p13 = scmp.lt.s32.totalorder %s7229_s23, %s9338_s2 }
 0x759   : > { %p7231_p11 = scmp.ne.s32.totalorder %s7229_s23, %s7230_s15  ;;  %p7236_p2 = scmp.lt.s32.totalorder %s7234_s27, %s7230_s15 }
 0x75b   : > { %p7232_p7 = pnand %p7231_p11, %p7596_p6  ;;  %p7237_p3 = por %p7236_p2, %p7235_p13 }
 0x75d   : > { %p7233_p1 = pneg %p7232_p7 }
 0x75f   : > { %p7238_p12 = pnand %p7237_p3, %p7233_p1 }
 0x761   : > { %7241 = shalt.err (!%p7238_p12)
}
 0x762   : > { %s7418_s4 = smov 128   ;;  %s7419_s10 = smov 8  }
 0x763   : > { %6944 = dma.vmem_to_hbm [thread:$0]  (%p7596_p6), %s4951_s11, 8192, %s4953_s9, %s4938_s26, %s7418_s4, %s7418_s4, %s7419_s10  }
 0x764 PF: > { %s9339_s20 = sld [smem:[#allocation16_spill]]  ;;  %p6961_p10 = scmp.ge.s32.totalorder %s7408_s30, 2 }
 0x765   : > { %p9340_p5 = scmp.ne.s32.totalorder %s9268_s6, 0 }
 0x767   : > { %p6957_p0 = pnand %p6961_p10, %p9340_p5 }
 0x769   : > { %p6958_p4 = pneg %p6957_p0 }
 0x76a   : > { %s4967_s0 = sand.u32 1, %s9339_s20  }
 0x76b   : > { %s4968_s21 = scalar_lea.sflag [#allocation7], %s4967_s0 }
 0x76c   : > { %7331 = dma.done.wait (%p6958_p4), %s4968_s21, 8192  }
 0x76d   : > { %7333 = vsyncadd (%p6958_p4), %s4968_s21, 4294959104  ;;  %s22_s30 = sadd.s32 1, %s7408_s30   ;;  %s9343_s3 = sld [smem:[#allocation17_spill]] }
 0x76e   : > { %p9146_p9 = scmp.ge.s32.totalorder %s22_s30, 14   ;;  %s9344_s14 = sld [smem:[#allocation26_spill]] }
 0x76f   : > { %s9345_s11 = sld [smem:[#allocation18_spill]]  ;;  %s9351_s12 = smov %s7340_s13 }
 0x770   : > { %s9346_s20 = sld [smem:[#allocation28_spill]]  ;;  %s9353_s15 = smov %s7352_s16 }
 0x771   : > { %s9347_s6 = sld [smem:[#allocation19_spill]]  ;;  %s9355_s16 = smov %s7356_s17 }
 0x772   : > { %s9348_s23 = sld [smem:[#allocation29_spill]]  ;;  %s9356_s17 = smov %s7676_s25 }
 0x773   : > { %s9349_s24 = sld [smem:[#allocation23_spill]]  ;;  %s9352_s13 = smov %s9343_s3 }
 0x774   : > { %s9350_s27 = sld [smem:[#allocation24_spill]]  ;;  %s9357_s18 = smov %s7364_s19 }
 0x775   : > { %s9358_s19 = smov %s9345_s11  ;;  %s9359_s21 = smov %s7376_s22 }
 0x776   : > { %s9361_s25 = smov %s7400_s28  ;;  %s9362_s26 = smov %s7404_s29 }
 0x777   : > { %s9360_s22 = smov %s9347_s6  ;;  %s9363_s28 = smov %s9370_s7 }
 0x778   : > { %s9364_s29 = smov %s9374_s8  ;;  %21 = sbr.rel (!%p9146_p9) target bundleno = 20 (0x14), region = 134 }
 0x77d   :  { %4974 = vsyncpa [#allocation6], 1 }
 0x77e   :  { %4976 = vsyncpa [#allocation6 + $0x1], 1 }
 0x77f   :  { %4977 = vsyncpa [#allocation9], 1 }
 0x780   :  { %4979 = vsyncpa [#allocation9 + $0x1], 1 }
 0x781   :  { %4980 = vsyncpa [#allocation7], 1 }
 0x782   :  { %4982 = vsyncpa [#allocation7 + $0x1], 1 }

</bundles_post_ra>
